<compile_context>
chip_gen: v7x
topology: tpu7x:2x2x1
jax: 0.10.0
libtpu: 0.0.40
codegen_flags: <defaults>
</compile_context>

<pallas_src>
import math
import numpy as np
import jax
import jax.numpy as jnp
from jax import lax
from jax.experimental import pallas as pl
from jax.experimental.pallas import tpu as pltpu

HC = 128  # ConvLSTM hidden channels (hidden_channels=128 in the module)


def _round_up(x, m):
    return ((x + m - 1) // m) * m


# ----------------------------- Pallas kernels ------------------------------

def _matmul_bias_kernel(a_ref, b_ref, bias_ref, o_ref):
    o_ref[...] = (
        jnp.dot(a_ref[...], b_ref[...], preferred_element_type=jnp.float32)
        + bias_ref[...]
    )


def pallas_matmul_bias(a, b, bias):
    """(M, K) @ (K, N) + bias[N]: bf16 operands on the MXU, f32 accumulate."""
    M, K = a.shape
    K2, N = b.shape
    assert K == K2
    tm = min(256, _round_up(M, 16))
    tn = min(256, _round_up(N, 128))
    Mp = _round_up(M, tm)
    Kp = _round_up(K, 128)
    Np = _round_up(N, tn)
    a_p = jnp.pad(a, ((0, Mp - M), (0, Kp - K))).astype(jnp.bfloat16)
    b_p = jnp.pad(b, ((0, Kp - K), (0, Np - N))).astype(jnp.bfloat16)
    bias_p = jnp.pad(bias.astype(jnp.float32).reshape(1, N), ((0, 0), (0, Np - N)))
    out = pl.pallas_call(
        _matmul_bias_kernel,
        out_shape=jax.ShapeDtypeStruct((Mp, Np), jnp.float32),
        grid=(Mp // tm, Np // tn),
        in_specs=[
            pl.BlockSpec((tm, Kp), lambda i, j: (i, 0)),
            pl.BlockSpec((Kp, tn), lambda i, j: (0, j)),
            pl.BlockSpec((1, tn), lambda i, j: (0, j)),
        ],
        out_specs=pl.BlockSpec((tm, tn), lambda i, j: (i, j)),
        compiler_params=pltpu.CompilerParams(
            dimension_semantics=("parallel", "parallel")),
    )(a_p, b_p, bias_p)
    return out[:M, :N]


def _convlstm_seq_kernel(xg_ref, nd_ref, h0_ref, c0_ref, s_ref, w_ref,
                         o_ref, hN_ref, cN_ref, h_scr, c_scr):
    """One grid step = one ConvLSTM timestep; h/c live in VMEM scratch."""
    t = pl.program_id(0)
    Mp = xg_ref.shape[1]

    @pl.when(t == 0)
    def _():
        h_scr[...] = h0_ref[...]
        c_scr[...] = c0_ref[...]

    nd = nd_ref[0]                                     # (Mp, 1) notdone mask
    h_scr[0:Mp, :] = h_scr[0:Mp, :] * nd               # reset state where done
    c = c_scr[0:Mp, :] * nd                            # (Mp, HC)

    # 3x3 "same" conv on h as 9 (gather-matrix @ h) @ W_tap MXU matmuls.
    h_b = h_scr[...].astype(jnp.bfloat16)              # (Kc, HC)
    hg = jnp.zeros((Mp, 4 * HC), jnp.float32)
    for tap in range(9):
        gathered = jnp.dot(s_ref[tap], h_b, preferred_element_type=jnp.float32)
        hg = hg + jnp.dot(gathered.astype(jnp.bfloat16), w_ref[tap],
                          preferred_element_type=jnp.float32)

    g = xg_ref[0] + hg                                 # (Mp, 4HC): [i | f | c | o]
    # Peephole weights Wci/Wcf/Wco are lazily-created zeros in the torch module,
    # so the c*Wci / c*Wcf / cc*Wco terms are identically zero and elided here.
    gi = jax.nn.sigmoid(g[:, 0 * HC:1 * HC])
    gf = jax.nn.sigmoid(g[:, 1 * HC:2 * HC])
    cc = gf * c + gi * jnp.tanh(g[:, 2 * HC:3 * HC])
    go = jax.nn.sigmoid(g[:, 3 * HC:4 * HC])
    ch = go * jnp.tanh(cc)

    h_scr[0:Mp, :] = ch
    c_scr[0:Mp, :] = cc
    o_ref[0] = ch
    hN_ref[...] = ch      # constant out-block: only final write hits HBM
    cN_ref[...] = cc


# ------------------------------- conv glue ---------------------------------

def conv2d(x_nhwc, w_oihw, bias, stride, pad_hw):
    """NHWC conv matching torch.nn.Conv2d semantics, via im2col + Pallas matmul."""
    # TODO(synk): strided tap-gather is not expressible in a BlockSpec; im2col stays
    # plain-JAX glue (runs once per call under jit, outside the time loop).
    Cout, Cin, Kh, Kw = w_oihw.shape
    ph, pw = pad_hw
    N, H, W, Cx = x_nhwc.shape
    assert Cx == Cin
    Ho = (H + 2 * ph - Kh) // stride + 1
    Wo = (W + 2 * pw - Kw) // stride + 1
    xp = jnp.pad(x_nhwc, ((0, 0), (ph, ph), (pw, pw), (0, 0)))
    cols = []
    for ki in range(Kh):
        for kj in range(Kw):
            cols.append(xp[:, ki:ki + (Ho - 1) * stride + 1:stride,
                           kj:kj + (Wo - 1) * stride + 1:stride, :])
    patches = jnp.stack(cols, axis=3)               # (N, Ho, Wo, Kh*Kw, Cin)
    a = patches.reshape(N * Ho * Wo, Kh * Kw * Cin)
    w = jnp.transpose(w_oihw, (2, 3, 1, 0)).reshape(Kh * Kw * Cin, Cout)
    out = pallas_matmul_bias(a, w, bias)
    return out.reshape(N, Ho, Wo, Cout)


def _build_shift_mats(B, Hf, Wf, Mp, Kc):
    """Per-tap (Mp, Kc) gather/mask matrices for a 3x3 'same' conv on flattened
    (b, y, x) rows.  Entry [m, m'] = 1 iff m' = m + di*Wf + dj is the in-bounds
    spatial neighbour of m for that tap."""
    M = B * Hf * Wf
    rows = jnp.arange(Mp)
    x = rows % Wf
    y = (rows // Wf) % Hf
    valid = rows < M
    cols = jnp.arange(Kc)
    mats = []
    for di in (-1, 0, 1):
        for dj in (-1, 0, 1):
            ok = (valid
                  & (x + dj >= 0) & (x + dj < Wf)
                  & (y + di >= 0) & (y + di < Hf))
            tgt = rows + di * Wf + dj
            mats.append((cols[None, :] == tgt[:, None]) & ok[:, None])
    return jnp.stack(mats, axis=0).astype(jnp.bfloat16)   # (9, Mp, Kc)


# ------------------------------ parameters ---------------------------------

def init_params(key):
    def conv_init(k, cout, cin, ksz, bias=True):
        kw, kb = jax.random.split(k)
        fan_in = cin * ksz * ksz
        bound = 1.0 / math.sqrt(fan_in)
        w = jax.random.uniform(kw, (cout, cin, ksz, ksz), jnp.float32, -bound, bound)
        b = (jax.random.uniform(kb, (cout,), jnp.float32, -bound, bound)
             if bias else jnp.zeros((cout,), jnp.float32))
        return w, b

    keys = jax.random.split(key, 10)
    p = {}
    p["cnn1_w"], p["cnn1_b"] = conv_init(keys[0], 32, 3, 8)
    p["cnn2_w"], p["cnn2_b"] = conv_init(keys[1], 64, 32, 4)
    # ConvLSTM: fuse the 4 x-convs (with bias) and 4 h-convs (no bias), order i,f,c,o
    wx, bx, wh = [], [], []
    for idx in range(4):
        w, b = conv_init(keys[2 + idx], HC, 64, 3, bias=True)
        wx.append(w)
        bx.append(b)
        wh_, _ = conv_init(keys[6 + idx], HC, HC, 3, bias=False)
        wh.append(wh_)
    p["wx"] = jnp.concatenate(wx, axis=0)   # (4*HC, 64, 3, 3)
    p["bx"] = jnp.concatenate(bx, axis=0)   # (4*HC,)
    p["wh"] = jnp.concatenate(wh, axis=0)   # (4*HC, HC, 3, 3)
    return p


# ------------------------------ forward pass --------------------------------

def _vision_forward_impl(params, X, done, vision_lstm_state):
    """X: (T,B,3,H,W) NCHW; done: (T,B) bool; state: (h, c) each (B,128,Hf,Wf)."""
    T, B = X.shape[0], X.shape[1]
    x = X.reshape((T * B,) + X.shape[2:]).astype(jnp.float32)
    x = jnp.transpose(x, (0, 2, 3, 1))                      # -> NHWC
    x = conv2d(x, params["cnn1_w"], params["cnn1_b"], stride=4, pad_hw=(1, 2))
    x = conv2d(x, params["cnn2_w"], params["cnn2_b"], stride=2, pad_hw=(2, 1))
    TB, Hf, Wf, _ = x.shape

    # All-timestep fused x-gate conv: Wxi|Wxf|Wxc|Wxo (done once, outside the loop)
    xg = conv2d(x, params["wx"], params["bx"], stride=1, pad_hw=(1, 1))
    M = B * Hf * Wf
    Mp = _round_up(M, 16)          # row padding (kept small on purpose)
    Kc = _round_up(Mp, 128)        # contraction padding for the gather matmuls
    xg = jnp.pad(xg.reshape(T, M, 4 * HC), ((0, 0), (0, Mp - M), (0, 0)))

    # notdone broadcast per flattened (b, y, x) row.
    nd = (~done).astype(jnp.float32)                        # (T, B)
    nd = jnp.repeat(nd, Hf * Wf, axis=1)                    # (T, M)
    nd = jnp.pad(nd, ((0, 0), (0, Mp - M)))[..., None]      # (T, Mp, 1)

    h0, c0 = vision_lstm_state

    def prep_state(s):
        s = jnp.transpose(s.astype(jnp.float32), (0, 2, 3, 1)).reshape(M, HC)
        return jnp.pad(s, ((0, Kc - M), (0, 0)))            # (Kc, HC)

    h0p, c0p = prep_state(h0), prep_state(c0)

    s_taps = _build_shift_mats(B, Hf, Wf, Mp, Kc)           # (9, Mp, Kc) bf16
    w_taps = jnp.transpose(params["wh"], (2, 3, 1, 0)).reshape(
        9, HC, 4 * HC).astype(jnp.bfloat16)                 # (9, HC, 4HC)

    # TODO(synk): for very large B*Hf*Wf add an M grid axis (tile Mp) so per-step
    # VMEM stays within v7x's 64 MiB; at these sizes a single M block is optimal.
    O, hN, cN = pl.pallas_call(
        _convlstm_seq_kernel,
        out_shape=(jax.ShapeDtypeStruct((T, Mp, HC), jnp.float32),
                   jax.ShapeDtypeStruct((Mp, HC), jnp.float32),
                   jax.ShapeDtypeStruct((Mp, HC), jnp.float32)),
        grid_spec=pltpu.PrefetchScalarGridSpec(
            num_scalar_prefetch=0,
            grid=(T,),
            in_specs=[
                pl.BlockSpec((1, Mp, 4 * HC), lambda t: (t, 0, 0)),   # xg[t]
                pl.BlockSpec((1, Mp, 1), lambda t: (t, 0, 0)),        # notdone[t]
                pl.BlockSpec((Kc, HC), lambda t: (0, 0)),             # h0
                pl.BlockSpec((Kc, HC), lambda t: (0, 0)),             # c0
                pl.BlockSpec((9, Mp, Kc), lambda t: (0, 0, 0)),       # gather mats
                pl.BlockSpec((9, HC, 4 * HC), lambda t: (0, 0, 0)),   # Wh taps
            ],
            out_specs=[
                pl.BlockSpec((1, Mp, HC), lambda t: (t, 0, 0)),       # O[t]
                pl.BlockSpec((Mp, HC), lambda t: (0, 0)),             # final h
                pl.BlockSpec((Mp, HC), lambda t: (0, 0)),             # final c
            ],
            scratch_shapes=[pltpu.VMEM((Kc, HC), jnp.float32),        # h state
                            pltpu.VMEM((Kc, HC), jnp.float32)],       # c state
        ),
        compiler_params=pltpu.CompilerParams(dimension_semantics=("arbitrary",)),
    )(xg, nd, h0p, c0p, s_taps, w_taps)

    O = O[:, :M, :].reshape(T * B, Hf, Wf, HC)
    O = jnp.transpose(O, (0, 3, 1, 2))                      # back to NCHW like torch
    h_out = jnp.transpose(hN[:M].reshape(B, Hf, Wf, HC), (0, 3, 1, 2))
    c_out = jnp.transpose(cN[:M].reshape(B, Hf, Wf, HC), (0, 3, 1, 2))
    return O, (h_out, c_out)


vision_network_forward = jax.jit(_vision_forward_impl)


# --------------------------- pure-JAX reference -----------------------------

def _conv_ref(x, w, b, stride, pad_hw):
    out = lax.conv_general_dilated(
        x, w, (stride, stride),
        ((pad_hw[0], pad_hw[0]), (pad_hw[1], pad_hw[1])),
        dimension_numbers=("NCHW", "OIHW", "NCHW"),
        precision=lax.Precision.HIGHEST)
    return out + b[None, :, None, None]


def reference_forward(params, X, done, state):
    T, B = X.shape[0], X.shape[1]
    x = X.reshape((T * B,) + X.shape[2:]).astype(jnp.float32)
    x = _conv_ref(x, params["cnn1_w"], params["cnn1_b"], 4, (1, 2))
    x = _conv_ref(x, params["cnn2_w"], params["cnn2_b"], 2, (2, 1))
    TB, C, Hf, Wf = x.shape
    x = x.reshape(T, B, C, Hf, Wf)
    wxi, wxf, wxc, wxo = jnp.split(params["wx"], 4, axis=0)
    bxi, bxf, bxc, bxo = jnp.split(params["bx"], 4, axis=0)
    whi, whf, whc, who = jnp.split(params["wh"], 4, axis=0)
    zb = jnp.zeros((HC,), jnp.float32)
    wci = jnp.zeros((1, HC, Hf, Wf), jnp.float32)
    wcf = wco = wci
    h, c = state
    h = h.astype(jnp.float32)
    c = c.astype(jnp.float32)
    notdone = (~done).astype(jnp.float32)
    outs = []
    for t in range(T):
        nd = notdone[t].reshape(B, 1, 1, 1)
        h = nd * h
        c = nd * c
        xt = x[t]
        ci = jax.nn.sigmoid(_conv_ref(xt, wxi, bxi, 1, (1, 1)) +
                            _conv_ref(h, whi, zb, 1, (1, 1)) + c * wci)
        cf = jax.nn.sigmoid(_conv_ref(xt, wxf, bxf, 1, (1, 1)) +
                            _conv_ref(h, whf, zb, 1, (1, 1)) + c * wcf)
        cc = cf * c + ci * jnp.tanh(_conv_ref(xt, wxc, bxc, 1, (1, 1)) +
                                    _conv_ref(h, whc, zb, 1, (1, 1)))
        co = jax.nn.sigmoid(_conv_ref(xt, wxo, bxo, 1, (1, 1)) +
                            _conv_ref(h, who, zb, 1, (1, 1)) + cc * wco)
        h = co * jnp.tanh(cc)
        c = cc
        outs.append(h)
    O = jnp.concatenate(outs, axis=0)
    return O, (h, c)


# ---------------------------------- main ------------------------------------

if __name__ == "__main__":
    key = jax.random.PRNGKey(0)
    kp, kx, kd, kh, kc = jax.random.split(key, 5)
    params = init_params(kp)

    T, B, Himg, Wimg = 2, 2, 32, 32
    X = jax.random.normal(kx, (T, B, 3, Himg, Wimg), jnp.float32)
    done = jax.random.bernoulli(kd, 0.3, (T, B))
    # CNN output for a 32x32 frame is 4x4 spatially (conv1: 7x8, conv2: 4x4)
    Hf, Wf = 4, 4
    h0 = 0.1 * jax.random.normal(kh, (B, HC, Hf, Wf), jnp.float32)
    c0 = 0.1 * jax.random.normal(kc, (B, HC, Hf, Wf), jnp.float32)

    O, (hn, cn) = jax.block_until_ready(
        vision_network_forward(params, X, done, (h0, c0)))

    O_ref, (h_ref, c_ref) = reference_forward(params, X, done, (h0, c0))
    np.testing.assert_allclose(np.asarray(O), np.asarray(O_ref), rtol=2e-2, atol=2e-2)
    np.testing.assert_allclose(np.asarray(hn), np.asarray(h_ref), rtol=2e-2, atol=2e-2)
    np.testing.assert_allclose(np.asarray(cn), np.asarray(c_ref), rtol=2e-2, atol=2e-2)
    assert O.shape == (T * B, HC, Hf, Wf)
    assert hn.shape == (B, HC, Hf, Wf) and cn.shape == (B, HC, Hf, Wf)

    print("KERNEL_OK")
</pallas_src>

<mosaic_0001>
module attributes {stable_mosaic.version = 11 : i64} {
  func.func @_matmul_bias_kernel(%arg0: i32, %arg1: i32, %arg2: memref<224x256xbf16, #tpu.memory_space<vmem>>, %arg3: memref<256x128xbf16, #tpu.memory_space<vmem>>, %arg4: memref<1x128xf32, #tpu.memory_space<vmem>>, %arg5: memref<224x128xf32, #tpu.memory_space<vmem>>) attributes {dimension_semantics = [#tpu.dimension_semantics<parallel>, #tpu.dimension_semantics<parallel>], iteration_bounds = array<i64: 1, 1>, scalar_prefetch = 0 : i64, scratch_operands = 0 : i64, tpu.core_type = #tpu.core_type<tc>, window_params = [{transform_indices = @transform_0, window_bounds = array<i64: 224, 256>}, {transform_indices = @transform_1, window_bounds = array<i64: 256, 128>}, {transform_indices = @transform_2, window_bounds = array<i64: 1, 128>}, {transform_indices = @transform_3, window_bounds = array<i64: 224, 128>}]} {
    %c0 = arith.constant 0 : index
    %c0_0 = arith.constant 0 : index
    %0 = vector.load %arg2[%c0, %c0_0] : memref<224x256xbf16, #tpu.memory_space<vmem>>, vector<224x256xbf16>
    %c0_1 = arith.constant 0 : index
    %c0_2 = arith.constant 0 : index
    %1 = vector.load %arg3[%c0_1, %c0_2] : memref<256x128xbf16, #tpu.memory_space<vmem>>, vector<256x128xbf16>
    %cst = arith.constant dense<0.000000e+00> : vector<224x128xf32>
    %2 = tpu.matmul %0, %1, %cst {dimension_numbers = #tpu.dot_dimension_numbers<[1], [0], [0], [1], [0, 0, 1, 1], [], []>} : vector<224x256xbf16>, vector<256x128xbf16>, vector<224x128xf32> -> vector<224x128xf32>
    %c0_3 = arith.constant 0 : index
    %c0_4 = arith.constant 0 : index
    %3 = vector.load %arg4[%c0_3, %c0_4] : memref<1x128xf32, #tpu.memory_space<vmem>>, vector<1x128xf32>
    %4 = vector.broadcast %3 : vector<1x128xf32> to vector<224x128xf32>
    %5 = arith.addf %2, %4 : vector<224x128xf32>
    %c0_5 = arith.constant 0 : index
    %c0_6 = arith.constant 0 : index
    %6 = vector.load %arg5[%c0_5, %c0_6] : memref<224x128xf32, #tpu.memory_space<vmem>>, vector<224x128xf32>
    tpu.vector_store %arg5[%c0_5, %c0_6], %5 {strides = array<i32>} : memref<224x128xf32, #tpu.memory_space<vmem>>, vector<224x128xf32>,
    return
  }
  func.func @transform_0(%arg0: i32, %arg1: i32) -> (i32, i32) {
    %c0_i32 = arith.constant 0 : i32
    %c0_i32_0 = arith.constant 0 : i32
    return %arg0, %c0_i32 : i32, i32
  }
  func.func @transform_1(%arg0: i32, %arg1: i32) -> (i32, i32) {
    %c0_i32 = arith.constant 0 : i32
    %c0_i32_0 = arith.constant 0 : i32
    return %c0_i32, %arg1 : i32, i32
  }
  func.func @transform_2(%arg0: i32, %arg1: i32) -> (i32, i32) {
    %c0_i32 = arith.constant 0 : i32
    %c0_i32_0 = arith.constant 0 : i32
    return %c0_i32, %arg1 : i32, i32
  }
  func.func @transform_3(%arg0: i32, %arg1: i32) -> (i32, i32) {
    %c0_i32 = arith.constant 0 : i32
    return %arg0, %arg1 : i32, i32
  }
}

module attributes {stable_mosaic.version = 11 : i64} {
  func.func @_matmul_bias_kernel(%arg0: i32, %arg1: i32, %arg2: memref<64x512xbf16, #tpu.memory_space<vmem>>, %arg3: memref<512x128xbf16, #tpu.memory_space<vmem>>, %arg4: memref<1x128xf32, #tpu.memory_space<vmem>>, %arg5: memref<64x128xf32, #tpu.memory_space<vmem>>) attributes {dimension_semantics = [#tpu.dimension_semantics<parallel>, #tpu.dimension_semantics<parallel>], iteration_bounds = array<i64: 1, 1>, scalar_prefetch = 0 : i64, scratch_operands = 0 : i64, tpu.core_type = #tpu.core_type<tc>, window_params = [{transform_indices = @transform_0, window_bounds = array<i64: 64, 512>}, {transform_indices = @transform_1, window_bounds = array<i64: 512, 128>}, {transform_indices = @transform_2, window_bounds = array<i64: 1, 128>}, {transform_indices = @transform_3, window_bounds = array<i64: 64, 128>}]} {
    %c0 = arith.constant 0 : index
    %c0_0 = arith.constant 0 : index
    %0 = vector.load %arg2[%c0, %c0_0] : memref<64x512xbf16, #tpu.memory_space<vmem>>, vector<64x512xbf16>
    %c0_1 = arith.constant 0 : index
    %c0_2 = arith.constant 0 : index
    %1 = vector.load %arg3[%c0_1, %c0_2] : memref<512x128xbf16, #tpu.memory_space<vmem>>, vector<512x128xbf16>
    %cst = arith.constant dense<0.000000e+00> : vector<64x128xf32>
    %2 = tpu.matmul %0, %1, %cst {dimension_numbers = #tpu.dot_dimension_numbers<[1], [0], [0], [1], [0, 0, 1, 1], [], []>} : vector<64x512xbf16>, vector<512x128xbf16>, vector<64x128xf32> -> vector<64x128xf32>
    %c0_3 = arith.constant 0 : index
    %c0_4 = arith.constant 0 : index
    %3 = vector.load %arg4[%c0_3, %c0_4] : memref<1x128xf32, #tpu.memory_space<vmem>>, vector<1x128xf32>
    %4 = vector.broadcast %3 : vector<1x128xf32> to vector<64x128xf32>
    %5 = arith.addf %2, %4 : vector<64x128xf32>
    %c0_5 = arith.constant 0 : index
    %c0_6 = arith.constant 0 : index
    %6 = vector.load %arg5[%c0_5, %c0_6] : memref<64x128xf32, #tpu.memory_space<vmem>>, vector<64x128xf32>
    tpu.vector_store %arg5[%c0_5, %c0_6], %5 {strides = array<i32>} : memref<64x128xf32, #tpu.memory_space<vmem>>, vector<64x128xf32>,
    return
  }
  func.func @transform_0(%arg0: i32, %arg1: i32) -> (i32, i32) {
    %c0_i32 = arith.constant 0 : i32
    %c0_i32_0 = arith.constant 0 : i32
    return %arg0, %c0_i32 : i32, i32
  }
  func.func @transform_1(%arg0: i32, %arg1: i32) -> (i32, i32) {
    %c0_i32 = arith.constant 0 : i32
    %c0_i32_0 = arith.constant 0 : i32
    return %c0_i32, %arg1 : i32, i32
  }
  func.func @transform_2(%arg0: i32, %arg1: i32) -> (i32, i32) {
    %c0_i32 = arith.constant 0 : i32
    %c0_i32_0 = arith.constant 0 : i32
    return %c0_i32, %arg1 : i32, i32
  }
  func.func @transform_3(%arg0: i32, %arg1: i32) -> (i32, i32) {
    %c0_i32 = arith.constant 0 : i32
    return %arg0, %arg1 : i32, i32
  }
}

module attributes {stable_mosaic.version = 11 : i64} {
  func.func @_matmul_bias_kernel(%arg0: i32, %arg1: i32, %arg2: memref<64x640xbf16, #tpu.memory_space<vmem>>, %arg3: memref<640x256xbf16, #tpu.memory_space<vmem>>, %arg4: memref<1x256xf32, #tpu.memory_space<vmem>>, %arg5: memref<64x256xf32, #tpu.memory_space<vmem>>) attributes {dimension_semantics = [#tpu.dimension_semantics<parallel>, #tpu.dimension_semantics<parallel>], iteration_bounds = array<i64: 1, 2>, scalar_prefetch = 0 : i64, scratch_operands = 0 : i64, tpu.core_type = #tpu.core_type<tc>, window_params = [{transform_indices = @transform_0, window_bounds = array<i64: 64, 640>}, {transform_indices = @transform_1, window_bounds = array<i64: 640, 256>}, {transform_indices = @transform_2, window_bounds = array<i64: 1, 256>}, {transform_indices = @transform_3, window_bounds = array<i64: 64, 256>}]} {
    %c0 = arith.constant 0 : index
    %c0_0 = arith.constant 0 : index
    %0 = vector.load %arg2[%c0, %c0_0] : memref<64x640xbf16, #tpu.memory_space<vmem>>, vector<64x640xbf16>
    %c0_1 = arith.constant 0 : index
    %c0_2 = arith.constant 0 : index
    %1 = vector.load %arg3[%c0_1, %c0_2] : memref<640x256xbf16, #tpu.memory_space<vmem>>, vector<640x256xbf16>
    %cst = arith.constant dense<0.000000e+00> : vector<64x256xf32>
    %2 = tpu.matmul %0, %1, %cst {dimension_numbers = #tpu.dot_dimension_numbers<[1], [0], [0], [1], [0, 0, 1, 1], [], []>} : vector<64x640xbf16>, vector<640x256xbf16>, vector<64x256xf32> -> vector<64x256xf32>
    %c0_3 = arith.constant 0 : index
    %c0_4 = arith.constant 0 : index
    %3 = vector.load %arg4[%c0_3, %c0_4] : memref<1x256xf32, #tpu.memory_space<vmem>>, vector<1x256xf32>
    %4 = vector.broadcast %3 : vector<1x256xf32> to vector<64x256xf32>
    %5 = arith.addf %2, %4 : vector<64x256xf32>
    %c0_5 = arith.constant 0 : index
    %c0_6 = arith.constant 0 : index
    %6 = vector.load %arg5[%c0_5, %c0_6] : memref<64x256xf32, #tpu.memory_space<vmem>>, vector<64x256xf32>
    tpu.vector_store %arg5[%c0_5, %c0_6], %5 {strides = array<i32>} : memref<64x256xf32, #tpu.memory_space<vmem>>, vector<64x256xf32>,
    return
  }
  func.func @transform_0(%arg0: i32, %arg1: i32) -> (i32, i32) {
    %c0_i32 = arith.constant 0 : i32
    %c0_i32_0 = arith.constant 0 : i32
    return %arg0, %c0_i32 : i32, i32
  }
  func.func @transform_1(%arg0: i32, %arg1: i32) -> (i32, i32) {
    %c0_i32 = arith.constant 0 : i32
    %c0_i32_0 = arith.constant 0 : i32
    return %c0_i32, %arg1 : i32, i32
  }
  func.func @transform_2(%arg0: i32, %arg1: i32) -> (i32, i32) {
    %c0_i32 = arith.constant 0 : i32
    %c0_i32_0 = arith.constant 0 : i32
    return %c0_i32, %arg1 : i32, i32
  }
  func.func @transform_3(%arg0: i32, %arg1: i32) -> (i32, i32) {
    %c0_i32 = arith.constant 0 : i32
    return %arg0, %arg1 : i32, i32
  }
}

module attributes {stable_mosaic.version = 11 : i64} {
  func.func @_convlstm_seq_kernel(%arg0: i32, %arg1: memref<1x32x512xf32, #tpu.memory_space<vmem>>, %arg2: memref<1x32x1xf32, #tpu.memory_space<vmem>>, %arg3: memref<128x128xf32, #tpu.memory_space<vmem>>, %arg4: memref<128x128xf32, #tpu.memory_space<vmem>>, %arg5: memref<9x32x128xbf16, #tpu.memory_space<vmem>>, %arg6: memref<9x128x512xbf16, #tpu.memory_space<vmem>>, %arg7: memref<1x32x128xf32, #tpu.memory_space<vmem>>, %arg8: memref<32x128xf32, #tpu.memory_space<vmem>>, %arg9: memref<32x128xf32, #tpu.memory_space<vmem>>, %arg10: memref<128x128xf32, #tpu.memory_space<vmem>>, %arg11: memref<128x128xf32, #tpu.memory_space<vmem>>) attributes {dimension_semantics = [#tpu.dimension_semantics<arbitrary>], iteration_bounds = array<i64: 2>, scalar_prefetch = 0 : i64, scratch_operands = 2 : i64, tpu.core_type = #tpu.core_type<tc>, window_params = [{transform_indices = @transform_0, window_bounds = array<i64: 1, 32, 512>}, {transform_indices = @transform_1, window_bounds = array<i64: 1, 32, 1>}, {pipeline_mode = #tpu.pipeline_mode<synchronous>, transform_indices = @transform_2, window_bounds = array<i64: 128, 128>}, {pipeline_mode = #tpu.pipeline_mode<synchronous>, transform_indices = @transform_3, window_bounds = array<i64: 128, 128>}, {pipeline_mode = #tpu.pipeline_mode<synchronous>, transform_indices = @transform_4, window_bounds = array<i64: 9, 32, 128>}, {pipeline_mode = #tpu.pipeline_mode<synchronous>, transform_indices = @transform_5, window_bounds = array<i64: 9, 128, 512>}, {transform_indices = @transform_6, window_bounds = array<i64: 1, 32, 128>}, {pipeline_mode = #tpu.pipeline_mode<synchronous>, transform_indices = @transform_7, window_bounds = array<i64: 32, 128>}, {pipeline_mode = #tpu.pipeline_mode<synchronous>, transform_indices = @transform_8, window_bounds = array<i64: 32, 128>}]} {
    %c0_i32 = arith.constant 0 : i32
    %0 = arith.cmpi eq, %arg0, %c0_i32 : i32
    %1 = arith.extui %0 : i1 to i32
    %c0_i32_0 = arith.constant 0 : i32
    %2 = arith.cmpi ne, %1, %c0_i32_0 : i32
    scf.if %2 {
      %c0_92 = arith.constant 0 : index
      %c0_93 = arith.constant 0 : index
      %122 = vector.load %arg3[%c0_92, %c0_93] : memref<128x128xf32, #tpu.memory_space<vmem>>, vector<128x128xf32>
      %c0_94 = arith.constant 0 : index
      %c0_95 = arith.constant 0 : index
      %123 = vector.load %arg10[%c0_94, %c0_95] : memref<128x128xf32, #tpu.memory_space<vmem>>, vector<128x128xf32>
      tpu.vector_store %arg10[%c0_94, %c0_95], %122 {strides = array<i32>} : memref<128x128xf32, #tpu.memory_space<vmem>>, vector<128x128xf32>,
      %c0_96 = arith.constant 0 : index
      %c0_97 = arith.constant 0 : index
      %124 = vector.load %arg4[%c0_96, %c0_97] : memref<128x128xf32, #tpu.memory_space<vmem>>, vector<128x128xf32>
      %c0_98 = arith.constant 0 : index
      %c0_99 = arith.constant 0 : index
      %125 = vector.load %arg11[%c0_98, %c0_99] : memref<128x128xf32, #tpu.memory_space<vmem>>, vector<128x128xf32>
      tpu.vector_store %arg11[%c0_98, %c0_99], %124 {strides = array<i32>} : memref<128x128xf32, #tpu.memory_space<vmem>>, vector<128x128xf32>,
    } else {
    }
    %c0 = arith.constant 0 : index
    %c0_1 = arith.constant 0 : index
    %c0_2 = arith.constant 0 : index
    %3 = vector.load %arg2[%c0, %c0_1, %c0_2] : memref<1x32x1xf32, #tpu.memory_space<vmem>>, vector<1x32x1xf32>
    %4 = vector.shape_cast %3 : vector<1x32x1xf32> to vector<32x1xf32>
    %c0_3 = arith.constant 0 : index
    %c0_4 = arith.constant 0 : index
    %5 = vector.load %arg10[%c0_3, %c0_4] : memref<128x128xf32, #tpu.memory_space<vmem>>, vector<32x128xf32>
    %6 = vector.broadcast %4 : vector<32x1xf32> to vector<32x128xf32>
    %7 = arith.mulf %5, %6 : vector<32x128xf32>
    %c0_5 = arith.constant 0 : index
    %c0_6 = arith.constant 0 : index
    %8 = vector.load %arg10[%c0_5, %c0_6] : memref<128x128xf32, #tpu.memory_space<vmem>>, vector<32x128xf32>
    tpu.vector_store %arg10[%c0_5, %c0_6], %7 {strides = array<i32>} : memref<128x128xf32, #tpu.memory_space<vmem>>, vector<32x128xf32>,
    %c0_7 = arith.constant 0 : index
    %c0_8 = arith.constant 0 : index
    %9 = vector.load %arg11[%c0_7, %c0_8] : memref<128x128xf32, #tpu.memory_space<vmem>>, vector<32x128xf32>
    %10 = vector.broadcast %4 : vector<32x1xf32> to vector<32x128xf32>
    %11 = arith.mulf %9, %10 : vector<32x128xf32>
    %c0_9 = arith.constant 0 : index
    %c0_10 = arith.constant 0 : index
    %12 = vector.load %arg10[%c0_9, %c0_10] : memref<128x128xf32, #tpu.memory_space<vmem>>, vector<128x128xf32>
    %13 = arith.truncf %12 : vector<128x128xf32> to vector<128x128xbf16>
    %cst = arith.constant 0.000000e+00 : f32
    %14 = vector.broadcast %cst : f32 to vector<32x512xf32>
    %c0_11 = arith.constant 0 : index
    %c0_12 = arith.constant 0 : index
    %c0_13 = arith.constant 0 : index
    %15 = vector.load %arg5[%c0_11, %c0_12, %c0_13] : memref<9x32x128xbf16, #tpu.memory_space<vmem>>, vector<1x32x128xbf16>
    %16 = vector.shape_cast %15 : vector<1x32x128xbf16> to vector<32x128xbf16>
    %cst_14 = arith.constant dense<0.000000e+00> : vector<32x128xf32>
    %17 = tpu.matmul %16, %13, %cst_14 {dimension_numbers = #tpu.dot_dimension_numbers<[1], [0], [0], [1], [0, 0, 1, 1], [], []>} : vector<32x128xbf16>, vector<128x128xbf16>, vector<32x128xf32> -> vector<32x128xf32>
    %18 = arith.truncf %17 : vector<32x128xf32> to vector<32x128xbf16>
    %c0_15 = arith.constant 0 : index
    %c0_16 = arith.constant 0 : index
    %c0_17 = arith.constant 0 : index
    %19 = vector.load %arg6[%c0_15, %c0_16, %c0_17] : memref<9x128x512xbf16, #tpu.memory_space<vmem>>, vector<1x128x512xbf16>
    %20 = vector.shape_cast %19 : vector<1x128x512xbf16> to vector<128x512xbf16>
    %cst_18 = arith.constant dense<0.000000e+00> : vector<32x512xf32>
    %21 = tpu.matmul %18, %20, %cst_18 {dimension_numbers = #tpu.dot_dimension_numbers<[1], [0], [0], [1], [0, 0, 1, 1], [], []>} : vector<32x128xbf16>, vector<128x512xbf16>, vector<32x512xf32> -> vector<32x512xf32>
    %22 = arith.addf %14, %21 : vector<32x512xf32>
    %c1 = arith.constant 1 : index
    %c0_19 = arith.constant 0 : index
    %c0_20 = arith.constant 0 : index
    %23 = vector.load %arg5[%c1, %c0_19, %c0_20] : memref<9x32x128xbf16, #tpu.memory_space<vmem>>, vector<1x32x128xbf16>
    %24 = vector.shape_cast %23 : vector<1x32x128xbf16> to vector<32x128xbf16>
    %cst_21 = arith.constant dense<0.000000e+00> : vector<32x128xf32>
    %25 = tpu.matmul %24, %13, %cst_21 {dimension_numbers = #tpu.dot_dimension_numbers<[1], [0], [0], [1], [0, 0, 1, 1], [], []>} : vector<32x128xbf16>, vector<128x128xbf16>, vector<32x128xf32> -> vector<32x128xf32>
    %26 = arith.truncf %25 : vector<32x128xf32> to vector<32x128xbf16>
    %c1_22 = arith.constant 1 : index
    %c0_23 = arith.constant 0 : index
    %c0_24 = arith.constant 0 : index
    %27 = vector.load %arg6[%c1_22, %c0_23, %c0_24] : memref<9x128x512xbf16, #tpu.memory_space<vmem>>, vector<1x128x512xbf16>
    %28 = vector.shape_cast %27 : vector<1x128x512xbf16> to vector<128x512xbf16>
    %cst_25 = arith.constant dense<0.000000e+00> : vector<32x512xf32>
    %29 = tpu.matmul %26, %28, %cst_25 {dimension_numbers = #tpu.dot_dimension_numbers<[1], [0], [0], [1], [0, 0, 1, 1], [], []>} : vector<32x128xbf16>, vector<128x512xbf16>, vector<32x512xf32> -> vector<32x512xf32>
    %30 = arith.addf %22, %29 : vector<32x512xf32>
    %c2 = arith.constant 2 : index
    %c0_26 = arith.constant 0 : index
    %c0_27 = arith.constant 0 : index
    %31 = vector.load %arg5[%c2, %c0_26, %c0_27] : memref<9x32x128xbf16, #tpu.memory_space<vmem>>, vector<1x32x128xbf16>
    %32 = vector.shape_cast %31 : vector<1x32x128xbf16> to vector<32x128xbf16>
    %cst_28 = arith.constant dense<0.000000e+00> : vector<32x128xf32>
    %33 = tpu.matmul %32, %13, %cst_28 {dimension_numbers = #tpu.dot_dimension_numbers<[1], [0], [0], [1], [0, 0, 1, 1], [], []>} : vector<32x128xbf16>, vector<128x128xbf16>, vector<32x128xf32> -> vector<32x128xf32>
    %34 = arith.truncf %33 : vector<32x128xf32> to vector<32x128xbf16>
    %c2_29 = arith.constant 2 : index
    %c0_30 = arith.constant 0 : index
    %c0_31 = arith.constant 0 : index
    %35 = vector.load %arg6[%c2_29, %c0_30, %c0_31] : memref<9x128x512xbf16, #tpu.memory_space<vmem>>, vector<1x128x512xbf16>
    %36 = vector.shape_cast %35 : vector<1x128x512xbf16> to vector<128x512xbf16>
    %cst_32 = arith.constant dense<0.000000e+00> : vector<32x512xf32>
    %37 = tpu.matmul %34, %36, %cst_32 {dimension_numbers = #tpu.dot_dimension_numbers<[1], [0], [0], [1], [0, 0, 1, 1], [], []>} : vector<32x128xbf16>, vector<128x512xbf16>, vector<32x512xf32> -> vector<32x512xf32>
    %38 = arith.addf %30, %37 : vector<32x512xf32>
    %c3 = arith.constant 3 : index
    %c0_33 = arith.constant 0 : index
    %c0_34 = arith.constant 0 : index
    %39 = vector.load %arg5[%c3, %c0_33, %c0_34] : memref<9x32x128xbf16, #tpu.memory_space<vmem>>, vector<1x32x128xbf16>
    %40 = vector.shape_cast %39 : vector<1x32x128xbf16> to vector<32x128xbf16>
    %cst_35 = arith.constant dense<0.000000e+00> : vector<32x128xf32>
    %41 = tpu.matmul %40, %13, %cst_35 {dimension_numbers = #tpu.dot_dimension_numbers<[1], [0], [0], [1], [0, 0, 1, 1], [], []>} : vector<32x128xbf16>, vector<128x128xbf16>, vector<32x128xf32> -> vector<32x128xf32>
    %42 = arith.truncf %41 : vector<32x128xf32> to vector<32x128xbf16>
    %c3_36 = arith.constant 3 : index
    %c0_37 = arith.constant 0 : index
    %c0_38 = arith.constant 0 : index
    %43 = vector.load %arg6[%c3_36, %c0_37, %c0_38] : memref<9x128x512xbf16, #tpu.memory_space<vmem>>, vector<1x128x512xbf16>
    %44 = vector.shape_cast %43 : vector<1x128x512xbf16> to vector<128x512xbf16>
    %cst_39 = arith.constant dense<0.000000e+00> : vector<32x512xf32>
    %45 = tpu.matmul %42, %44, %cst_39 {dimension_numbers = #tpu.dot_dimension_numbers<[1], [0], [0], [1], [0, 0, 1, 1], [], []>} : vector<32x128xbf16>, vector<128x512xbf16>, vector<32x512xf32> -> vector<32x512xf32>
    %46 = arith.addf %38, %45 : vector<32x512xf32>
    %c4 = arith.constant 4 : index
    %c0_40 = arith.constant 0 : index
    %c0_41 = arith.constant 0 : index
    %47 = vector.load %arg5[%c4, %c0_40, %c0_41] : memref<9x32x128xbf16, #tpu.memory_space<vmem>>, vector<1x32x128xbf16>
    %48 = vector.shape_cast %47 : vector<1x32x128xbf16> to vector<32x128xbf16>
    %cst_42 = arith.constant dense<0.000000e+00> : vector<32x128xf32>
    %49 = tpu.matmul %48, %13, %cst_42 {dimension_numbers = #tpu.dot_dimension_numbers<[1], [0], [0], [1], [0, 0, 1, 1], [], []>} : vector<32x128xbf16>, vector<128x128xbf16>, vector<32x128xf32> -> vector<32x128xf32>
    %50 = arith.truncf %49 : vector<32x128xf32> to vector<32x128xbf16>
    %c4_43 = arith.constant 4 : index
    %c0_44 = arith.constant 0 : index
    %c0_45 = arith.constant 0 : index
    %51 = vector.load %arg6[%c4_43, %c0_44, %c0_45] : memref<9x128x512xbf16, #tpu.memory_space<vmem>>, vector<1x128x512xbf16>
    %52 = vector.shape_cast %51 : vector<1x128x512xbf16> to vector<128x512xbf16>
    %cst_46 = arith.constant dense<0.000000e+00> : vector<32x512xf32>
    %53 = tpu.matmul %50, %52, %cst_46 {dimension_numbers = #tpu.dot_dimension_numbers<[1], [0], [0], [1], [0, 0, 1, 1], [], []>} : vector<32x128xbf16>, vector<128x512xbf16>, vector<32x512xf32> -> vector<32x512xf32>
    %54 = arith.addf %46, %53 : vector<32x512xf32>
    %c5 = arith.constant 5 : index
    %c0_47 = arith.constant 0 : index
    %c0_48 = arith.constant 0 : index
    %55 = vector.load %arg5[%c5, %c0_47, %c0_48] : memref<9x32x128xbf16, #tpu.memory_space<vmem>>, vector<1x32x128xbf16>
    %56 = vector.shape_cast %55 : vector<1x32x128xbf16> to vector<32x128xbf16>
    %cst_49 = arith.constant dense<0.000000e+00> : vector<32x128xf32>
    %57 = tpu.matmul %56, %13, %cst_49 {dimension_numbers = #tpu.dot_dimension_numbers<[1], [0], [0], [1], [0, 0, 1, 1], [], []>} : vector<32x128xbf16>, vector<128x128xbf16>, vector<32x128xf32> -> vector<32x128xf32>
    %58 = arith.truncf %57 : vector<32x128xf32> to vector<32x128xbf16>
    %c5_50 = arith.constant 5 : index
    %c0_51 = arith.constant 0 : index
    %c0_52 = arith.constant 0 : index
    %59 = vector.load %arg6[%c5_50, %c0_51, %c0_52] : memref<9x128x512xbf16, #tpu.memory_space<vmem>>, vector<1x128x512xbf16>
    %60 = vector.shape_cast %59 : vector<1x128x512xbf16> to vector<128x512xbf16>
    %cst_53 = arith.constant dense<0.000000e+00> : vector<32x512xf32>
    %61 = tpu.matmul %58, %60, %cst_53 {dimension_numbers = #tpu.dot_dimension_numbers<[1], [0], [0], [1], [0, 0, 1, 1], [], []>} : vector<32x128xbf16>, vector<128x512xbf16>, vector<32x512xf32> -> vector<32x512xf32>
    %62 = arith.addf %54, %61 : vector<32x512xf32>
    %c6 = arith.constant 6 : index
    %c0_54 = arith.constant 0 : index
    %c0_55 = arith.constant 0 : index
    %63 = vector.load %arg5[%c6, %c0_54, %c0_55] : memref<9x32x128xbf16, #tpu.memory_space<vmem>>, vector<1x32x128xbf16>
    %64 = vector.shape_cast %63 : vector<1x32x128xbf16> to vector<32x128xbf16>
    %cst_56 = arith.constant dense<0.000000e+00> : vector<32x128xf32>
    %65 = tpu.matmul %64, %13, %cst_56 {dimension_numbers = #tpu.dot_dimension_numbers<[1], [0], [0], [1], [0, 0, 1, 1], [], []>} : vector<32x128xbf16>, vector<128x128xbf16>, vector<32x128xf32> -> vector<32x128xf32>
    %66 = arith.truncf %65 : vector<32x128xf32> to vector<32x128xbf16>
    %c6_57 = arith.constant 6 : index
    %c0_58 = arith.constant 0 : index
    %c0_59 = arith.constant 0 : index
    %67 = vector.load %arg6[%c6_57, %c0_58, %c0_59] : memref<9x128x512xbf16, #tpu.memory_space<vmem>>, vector<1x128x512xbf16>
    %68 = vector.shape_cast %67 : vector<1x128x512xbf16> to vector<128x512xbf16>
    %cst_60 = arith.constant dense<0.000000e+00> : vector<32x512xf32>
    %69 = tpu.matmul %66, %68, %cst_60 {dimension_numbers = #tpu.dot_dimension_numbers<[1], [0], [0], [1], [0, 0, 1, 1], [], []>} : vector<32x128xbf16>, vector<128x512xbf16>, vector<32x512xf32> -> vector<32x512xf32>
    %70 = arith.addf %62, %69 : vector<32x512xf32>
    %c7 = arith.constant 7 : index
    %c0_61 = arith.constant 0 : index
    %c0_62 = arith.constant 0 : index
    %71 = vector.load %arg5[%c7, %c0_61, %c0_62] : memref<9x32x128xbf16, #tpu.memory_space<vmem>>, vector<1x32x128xbf16>
    %72 = vector.shape_cast %71 : vector<1x32x128xbf16> to vector<32x128xbf16>
    %cst_63 = arith.constant dense<0.000000e+00> : vector<32x128xf32>
    %73 = tpu.matmul %72, %13, %cst_63 {dimension_numbers = #tpu.dot_dimension_numbers<[1], [0], [0], [1], [0, 0, 1, 1], [], []>} : vector<32x128xbf16>, vector<128x128xbf16>, vector<32x128xf32> -> vector<32x128xf32>
    %74 = arith.truncf %73 : vector<32x128xf32> to vector<32x128xbf16>
    %c7_64 = arith.constant 7 : index
    %c0_65 = arith.constant 0 : index
    %c0_66 = arith.constant 0 : index
    %75 = vector.load %arg6[%c7_64, %c0_65, %c0_66] : memref<9x128x512xbf16, #tpu.memory_space<vmem>>, vector<1x128x512xbf16>
    %76 = vector.shape_cast %75 : vector<1x128x512xbf16> to vector<128x512xbf16>
    %cst_67 = arith.constant dense<0.000000e+00> : vector<32x512xf32>
    %77 = tpu.matmul %74, %76, %cst_67 {dimension_numbers = #tpu.dot_dimension_numbers<[1], [0], [0], [1], [0, 0, 1, 1], [], []>} : vector<32x128xbf16>, vector<128x512xbf16>, vector<32x512xf32> -> vector<32x512xf32>
    %78 = arith.addf %70, %77 : vector<32x512xf32>
    %c8 = arith.constant 8 : index
    %c0_68 = arith.constant 0 : index
    %c0_69 = arith.constant 0 : index
    %79 = vector.load %arg5[%c8, %c0_68, %c0_69] : memref<9x32x128xbf16, #tpu.memory_space<vmem>>, vector<1x32x128xbf16>
    %80 = vector.shape_cast %79 : vector<1x32x128xbf16> to vector<32x128xbf16>
    %cst_70 = arith.constant dense<0.000000e+00> : vector<32x128xf32>
    %81 = tpu.matmul %80, %13, %cst_70 {dimension_numbers = #tpu.dot_dimension_numbers<[1], [0], [0], [1], [0, 0, 1, 1], [], []>} : vector<32x128xbf16>, vector<128x128xbf16>, vector<32x128xf32> -> vector<32x128xf32>
    %82 = arith.truncf %81 : vector<32x128xf32> to vector<32x128xbf16>
    %c8_71 = arith.constant 8 : index
    %c0_72 = arith.constant 0 : index
    %c0_73 = arith.constant 0 : index
    %83 = vector.load %arg6[%c8_71, %c0_72, %c0_73] : memref<9x128x512xbf16, #tpu.memory_space<vmem>>, vector<1x128x512xbf16>
    %84 = vector.shape_cast %83 : vector<1x128x512xbf16> to vector<128x512xbf16>
    %cst_74 = arith.constant dense<0.000000e+00> : vector<32x512xf32>
    %85 = tpu.matmul %82, %84, %cst_74 {dimension_numbers = #tpu.dot_dimension_numbers<[1], [0], [0], [1], [0, 0, 1, 1], [], []>} : vector<32x128xbf16>, vector<128x512xbf16>, vector<32x512xf32> -> vector<32x512xf32>
    %86 = arith.addf %78, %85 : vector<32x512xf32>
    %c0_75 = arith.constant 0 : index
    %c0_76 = arith.constant 0 : index
    %c0_77 = arith.constant 0 : index
    %87 = vector.load %arg1[%c0_75, %c0_76, %c0_77] : memref<1x32x512xf32, #tpu.memory_space<vmem>>, vector<1x32x512xf32>
    %88 = vector.shape_cast %87 : vector<1x32x512xf32> to vector<32x512xf32>
    %89 = arith.addf %88, %86 : vector<32x512xf32>
    %90 = vector.extract_strided_slice %89 {offsets = [0, 0], sizes = [32, 128], strides = [1, 1]} : vector<32x512xf32> to vector<32x128xf32>
    %91 = arith.negf %90 : vector<32x128xf32>
    %92 = math.exp %91 : vector<32x128xf32>
    %cst_78 = arith.constant 1.000000e+00 : f32
    %93 = vector.broadcast %cst_78 : f32 to vector<32x128xf32>
    %94 = arith.addf %93, %92 : vector<32x128xf32>
    %95 = arith.divf %93, %94 : vector<32x128xf32>
    %96 = vector.extract_strided_slice %89 {offsets = [0, 128], sizes = [32, 128], strides = [1, 1]} : vector<32x512xf32> to vector<32x128xf32>
    %97 = arith.negf %96 : vector<32x128xf32>
    %98 = math.exp %97 : vector<32x128xf32>
    %cst_79 = arith.constant 1.000000e+00 : f32
    %99 = vector.broadcast %cst_79 : f32 to vector<32x128xf32>
    %100 = arith.addf %99, %98 : vector<32x128xf32>
    %101 = arith.divf %99, %100 : vector<32x128xf32>
    %102 = arith.mulf %101, %11 : vector<32x128xf32>
    %103 = vector.extract_strided_slice %89 {offsets = [0, 256], sizes = [32, 128], strides = [1, 1]} : vector<32x512xf32> to vector<32x128xf32>
    %104 = math.tanh %103 : vector<32x128xf32>
    %105 = arith.mulf %95, %104 : vector<32x128xf32>
    %106 = arith.addf %102, %105 : vector<32x128xf32>
    %107 = vector.extract_strided_slice %89 {offsets = [0, 384], sizes = [32, 128], strides = [1, 1]} : vector<32x512xf32> to vector<32x128xf32>
    %108 = arith.negf %107 : vector<32x128xf32>
    %109 = math.exp %108 : vector<32x128xf32>
    %cst_80 = arith.constant 1.000000e+00 : f32
    %110 = vector.broadcast %cst_80 : f32 to vector<32x128xf32>
    %111 = arith.addf %110, %109 : vector<32x128xf32>
    %112 = arith.divf %110, %111 : vector<32x128xf32>
    %113 = math.tanh %106 : vector<32x128xf32>
    %114 = arith.mulf %112, %113 : vector<32x128xf32>
    %c0_81 = arith.constant 0 : index
    %c0_82 = arith.constant 0 : index
    %115 = vector.load %arg10[%c0_81, %c0_82] : memref<128x128xf32, #tpu.memory_space<vmem>>, vector<32x128xf32>
    tpu.vector_store %arg10[%c0_81, %c0_82], %114 {strides = array<i32>} : memref<128x128xf32, #tpu.memory_space<vmem>>, vector<32x128xf32>,
    %c0_83 = arith.constant 0 : index
    %c0_84 = arith.constant 0 : index
    %116 = vector.load %arg11[%c0_83, %c0_84] : memref<128x128xf32, #tpu.memory_space<vmem>>, vector<32x128xf32>
    tpu.vector_store %arg11[%c0_83, %c0_84], %106 {strides = array<i32>} : memref<128x128xf32, #tpu.memory_space<vmem>>, vector<32x128xf32>,
    %c0_85 = arith.constant 0 : index
    %c0_86 = arith.constant 0 : index
    %c0_87 = arith.constant 0 : index
    %117 = vector.load %arg7[%c0_85, %c0_86, %c0_87] : memref<1x32x128xf32, #tpu.memory_space<vmem>>, vector<1x32x128xf32>
    %118 = vector.shape_cast %117 : vector<1x32x128xf32> to vector<32x128xf32>
    %119 = vector.shape_cast %114 : vector<32x128xf32> to vector<1x32x128xf32>
    tpu.vector_store %arg7[%c0_85, %c0_86, %c0_87], %119 {strides = array<i32>} : memref<1x32x128xf32, #tpu.memory_space<vmem>>, vector<1x32x128xf32>,
    %c0_88 = arith.constant 0 : index
    %c0_89 = arith.constant 0 : index
    %120 = vector.load %arg8[%c0_88, %c0_89] : memref<32x128xf32, #tpu.memory_space<vmem>>, vector<32x128xf32>
    tpu.vector_store %arg8[%c0_88, %c0_89], %114 {strides = array<i32>} : memref<32x128xf32, #tpu.memory_space<vmem>>, vector<32x128xf32>,
    %c0_90 = arith.constant 0 : index
    %c0_91 = arith.constant 0 : index
    %121 = vector.load %arg9[%c0_90, %c0_91] : memref<32x128xf32, #tpu.memory_space<vmem>>, vector<32x128xf32>
    tpu.vector_store %arg9[%c0_90, %c0_91], %106 {strides = array<i32>} : memref<32x128xf32, #tpu.memory_space<vmem>>, vector<32x128xf32>,
    return
  }
  func.func @transform_0(%arg0: i32) -> (i32, i32, i32) {
    %c0_i32 = arith.constant 0 : i32
    %c0_i32_0 = arith.constant 0 : i32
    %c0_i32_1 = arith.constant 0 : i32
    return %arg0, %c0_i32, %c0_i32_0 : i32, i32, i32
  }
  func.func @transform_1(%arg0: i32) -> (i32, i32, i32) {
    %c0_i32 = arith.constant 0 : i32
    %c0_i32_0 = arith.constant 0 : i32
    %c0_i32_1 = arith.constant 0 : i32
    return %arg0, %c0_i32, %c0_i32_0 : i32, i32, i32
  }
  func.func @transform_2(%arg0: i32) -> (i32, i32) {
    %c0_i32 = arith.constant 0 : i32
    %c0_i32_0 = arith.constant 0 : i32
    %c0_i32_1 = arith.constant 0 : i32
    return %c0_i32, %c0_i32_0 : i32, i32
  }
  func.func @transform_3(%arg0: i32) -> (i32, i32) {
    %c0_i32 = arith.constant 0 : i32
    %c0_i32_0 = arith.constant 0 : i32
    %c0_i32_1 = arith.constant 0 : i32
    return %c0_i32, %c0_i32_0 : i32, i32
  }
  func.func @transform_4(%arg0: i32) -> (i32, i32, i32) {
    %c0_i32 = arith.constant 0 : i32
    %c0_i32_0 = arith.constant 0 : i32
    %c0_i32_1 = arith.constant 0 : i32
    %c0_i32_2 = arith.constant 0 : i32
    return %c0_i32, %c0_i32_0, %c0_i32_1 : i32, i32, i32
  }
  func.func @transform_5(%arg0: i32) -> (i32, i32, i32) {
    %c0_i32 = arith.constant 0 : i32
    %c0_i32_0 = arith.constant 0 : i32
    %c0_i32_1 = arith.constant 0 : i32
    %c0_i32_2 = arith.constant 0 : i32
    return %c0_i32, %c0_i32_0, %c0_i32_1 : i32, i32, i32
  }
  func.func @transform_6(%arg0: i32) -> (i32, i32, i32) {
    %c0_i32 = arith.constant 0 : i32
    %c0_i32_0 = arith.constant 0 : i32
    %c0_i32_1 = arith.constant 0 : i32
    return %arg0, %c0_i32, %c0_i32_0 : i32, i32, i32
  }
  func.func @transform_7(%arg0: i32) -> (i32, i32) {
    %c0_i32 = arith.constant 0 : i32
    %c0_i32_0 = arith.constant 0 : i32
    %c0_i32_1 = arith.constant 0 : i32
    return %c0_i32, %c0_i32_0 : i32, i32
  }
  func.func @transform_8(%arg0: i32) -> (i32, i32) {
    %c0_i32 = arith.constant 0 : i32
    %c0_i32_0 = arith.constant 0 : i32
    %c0_i32_1 = arith.constant 0 : i32
    return %c0_i32, %c0_i32_0 : i32, i32
  }
}

</mosaic_0001>

<bundles_post_ra>
// kernel: _vision_forward_impl.4
= control target key start
LH: loop header
LB: loop body
LE: loop exit
PB: predicated region body
PF: predicated region fallthrough
CT: control target
= control target key end

     0   :  { %s983_s1 = inlined_call_operand.vmem [shape: bf16[256,128], index: 1, kind: input, shape index: {}]   ;;  %s984_s0 = inlined_call_operand.vmem [shape: bf16[224,256], index: 0, kind: input, shape index: {}]   ;;  %s985_s2 = inlined_call_operand.vmem [shape: f32[1,128], index: 2, kind: input, shape index: {}]   ;;  %s986_s3 = inlined_call_operand.vmem [shape: f32[224,128], index: 3, kind: output, shape index: {}]  }
   0x1   :  { %v656_v0 = vld [vmem:[%s983_s1 + $0x40] sm:$0xff]   ;;  %v658_v2 = vld [vmem:[%s983_s1 + $0x48] sm:$0xff]   ;;  %v660_v4 = vld [vmem:[%s983_s1 + $0x50] sm:$0xff]  }
   0x2   :  { %v657_v1 = vld [vmem:[%s983_s1] sm:$0xff]   ;;  %540 = vmatprep.subr.bf16.mxu0 %v656_v0  ;;  %640 = vmatprep.subr.bf16.mxu1 %v656_v0  ;;  %v659_v3 = vld [vmem:[%s983_s1 + $0x8] sm:$0xff]   ;;  %v661_v5 = vld [vmem:[%s983_s1 + $0x10] sm:$0xff]  }
   0x3   :  { %541 = vmatpush3.bf16.msra.mxu0 %v657_v1  ;;  %648 = vmatpush3.bf16.msra.mxu1 %v657_v1  ;;  %v662_v6 = vld [vmem:[%s983_s1 + $0x58] sm:$0xff]   ;;  %v664_v8 = vld [vmem:[%s983_s1 + $0x60] sm:$0xff]   ;;  %v666_v10 = vld [vmem:[%s983_s1 + $0x68] sm:$0xff]  }
   0x4   :  { %542 = vmatprep.subr.bf16.mxu0 %v658_v2  ;;  %641 = vmatprep.subr.bf16.mxu1 %v658_v2  ;;  %v663_v7 = vld [vmem:[%s983_s1 + $0x18] sm:$0xff]   ;;  %v665_v9 = vld [vmem:[%s983_s1 + $0x20] sm:$0xff]   ;;  %v667_v13 = vld [vmem:[%s983_s1 + $0x28] sm:$0xff]  }
   0x5   :  { %v674_v11 = vld [vmem:[%s984_s0 + $0x4] ss:$8 sps:$4 sm:$0xff]   ;;  %v677_v12 = vld [vmem:[%s984_s0 + $0x74] ss:$8 sps:$4 sm:$0xff]   ;;  %v672_v18 = vld [vmem:[%s984_s0] ss:$8 sps:$4 sm:$0xff]  }
   0x6   :  { %v668_v14 = vld [vmem:[%s983_s1 + $0x70] sm:$0xff]   ;;  %350 = vmatprep.mubr.bf16.mxu0 %v674_v11  ;;  %406 = vmatprep.mubr.bf16.mxu1 %v677_v12  ;;  %v670_v16 = vld [vmem:[%s983_s1 + $0x78] sm:$0xff]   ;;  %v680_v21 = vld [vmem:[%s984_s0 + $0x84] ss:$8 sps:$4 sm:$0xff]  }
   0x7   :  { %543 = vmatpush3.bf16.msra.mxu0 %v659_v3  ;;  %649 = vmatpush3.bf16.msra.mxu1 %v659_v3  ;;  %v669_v15 = vld [vmem:[%s983_s1 + $0x30] sm:$0xff]   ;;  %v671_v17 = vld [vmem:[%s983_s1 + $0x38] sm:$0xff]   ;;  %v683_v23 = vld [vmem:[%s984_s0 + $0x80] ss:$8 sps:$4 sm:$0xff]  }
   0x8   :  { %544 = vmatprep.subr.bf16.mxu0 %v660_v4  ;;  %642 = vmatprep.subr.bf16.mxu1 %v660_v4  ;;  %v675_v19 = vld [vmem:[%s984_s0 + $0x70] ss:$8 sps:$4 sm:$0xff]   ;;  %v678_v20 = vld [vmem:[%s984_s0 + $0x14] ss:$8 sps:$4 sm:$0xff]   ;;  %v684_v24 = vld [vmem:[%s984_s0 + $0x24] ss:$8 sps:$4 sm:$0xff]  }
   0x9   :  { %v682_v22 = vld [vmem:[%s984_s0 + $0x10] ss:$8 sps:$4 sm:$0xff]   ;;  %v686_v25 = vld [vmem:[%s984_s0 + $0x94] ss:$8 sps:$4 sm:$0xff]   ;;  %v688_v26 = vld [vmem:[%s984_s0 + $0x20] ss:$8 sps:$4 sm:$0xff]  }
   0xa   :  { %v689_v27 = vld [vmem:[%s984_s0 + $0x90] ss:$8 sps:$4 sm:$0xff]   ;;  %v690_v28 = vld [vmem:[%s984_s0 + $0x34] ss:$8 sps:$4 sm:$0xff]   ;;  %v692_v29 = vld [vmem:[%s984_s0 + $0xa4] ss:$8 sps:$4 sm:$0xff]  }
   0xb   :  { %545 = vmatpush3.bf16.msra.mxu0 %v661_v5  ;;  %650 = vmatpush3.bf16.msra.mxu1 %v661_v5  ;;  %v694_v30 = vld [vmem:[%s984_s0 + $0x30] ss:$8 sps:$4 sm:$0xff]   ;;  %v695_v31 = vld [vmem:[%s984_s0 + $0xa0] ss:$8 sps:$4 sm:$0xff]   ;;  %v696_v32 = vld [vmem:[%s984_s0 + $0x44] ss:$8 sps:$4 sm:$0xff]  }
   0xc   :  { %546 = vmatprep.subr.bf16.mxu0 %v662_v6  ;;  %643 = vmatprep.subr.bf16.mxu1 %v662_v6  ;;  %v698_v33 = vld [vmem:[%s984_s0 + $0xb4] ss:$8 sps:$4 sm:$0xff]   ;;  %v700_v34 = vld [vmem:[%s984_s0 + $0x40] ss:$8 sps:$4 sm:$0xff]   ;;  %v701_v35 = vld [vmem:[%s984_s0 + $0xb0] ss:$8 sps:$4 sm:$0xff]  }
   0xd   :  { %v702_v36 = vld [vmem:[%s984_s0 + $0x54] ss:$8 sps:$4 sm:$0xff]   ;;  %v704_v37 = vld [vmem:[%s984_s0 + $0xc4] ss:$8 sps:$4 sm:$0xff]   ;;  %v706_v38 = vld [vmem:[%s984_s0 + $0x50] ss:$8 sps:$4 sm:$0xff]  }
   0xe   :  { %v707_v39 = vld [vmem:[%s984_s0 + $0xc0] ss:$8 sps:$4 sm:$0xff]   ;;  %v708_v40 = vld [vmem:[%s984_s0 + $0x64] ss:$8 sps:$4 sm:$0xff]   ;;  %v710_v41 = vld [vmem:[%s984_s0 + $0xd4] ss:$8 sps:$4 sm:$0xff]  }
   0xf   :  { %547 = vmatpush3.bf16.msra.mxu0 %v663_v7  ;;  %651 = vmatpush3.bf16.msra.mxu1 %v663_v7  ;;  %v712_v42 = vld [vmem:[%s984_s0 + $0x60] ss:$8 sps:$4 sm:$0xff]   ;;  %v713_v43 = vld [vmem:[%s984_s0 + $0xd0] ss:$8 sps:$4 sm:$0xff]  }
  0x10   :  { %548 = vmatprep.subr.bf16.mxu0 %v664_v8  ;;  %644 = vmatprep.subr.bf16.mxu1 %v664_v8  ;;  %v869_v46 = vld [vmem:[%s985_s2] ss:$0 sm:$0xff] }
  0x13   :  { %549 = vmatpush3.bf16.msra.mxu0 %v665_v9  ;;  %652 = vmatpush3.bf16.msra.mxu1 %v665_v9 }
  0x14   :  { %550 = vmatprep.subr.bf16.mxu0 %v666_v10  ;;  %645 = vmatprep.subr.bf16.mxu1 %v666_v10 }
  0x17   :  { %551 = vmatpush3.bf16.msra.mxu0 %v667_v13  ;;  %653 = vmatpush3.bf16.msra.mxu1 %v667_v13 }
  0x18   :  { %552 = vmatprep.subr.bf16.mxu0 %v668_v14  ;;  %646 = vmatprep.subr.bf16.mxu1 %v668_v14 }
  0x1b   :  { %553 = vmatpush3.bf16.msra.mxu0 %v669_v15  ;;  %654 = vmatpush3.bf16.msra.mxu1 %v669_v15 }
  0x1c   :  { %554 = vmatprep.subr.bf16.mxu0 %v670_v16  ;;  %647 = vmatprep.subr.bf16.mxu1 %v670_v16 }
  0x1f   :  { %555 = vmatpush3.bf16.msra.mxu0 %v671_v17  ;;  %655 = vmatpush3.bf16.msra.mxu1 %v671_v17 }
  0x22   :  { %351 = vmatmul.mubr.bf16.vlgmr.msra.gmra.mrb[0].mxu0 %v672_v18  ;;  %407 = vmatmul.mubr.bf16.vlgmr.msra.gmra.mrb[0].mxu1 %v675_v19 }
  0x23   :  { %358 = vmatprep.mubr.bf16.mxu0 %v678_v20  ;;  %414 = vmatprep.mubr.bf16.mxu1 %v680_v21 }
  0x2a   :  { %359 = vmatmul.mubr.bf16.gmra.mrb[4].mxu0 %v682_v22  ;;  %415 = vmatmul.mubr.bf16.gmra.mrb[4].mxu1 %v683_v23 }
  0x2b   :  { %366 = vmatprep.mubr.bf16.mxu0 %v684_v24  ;;  %422 = vmatprep.mubr.bf16.mxu1 %v686_v25 }
  0x32   :  { %367 = vmatmul.mubr.bf16.gmra.mrb[8].mxu0 %v688_v26  ;;  %423 = vmatmul.mubr.bf16.gmra.mrb[8].mxu1 %v689_v27 }
  0x33   :  { %374 = vmatprep.mubr.bf16.mxu0 %v690_v28  ;;  %430 = vmatprep.mubr.bf16.mxu1 %v692_v29 }
  0x3a   :  { %375 = vmatmul.mubr.bf16.gmra.mrb[12].mxu0 %v694_v30  ;;  %431 = vmatmul.mubr.bf16.gmra.mrb[12].mxu1 %v695_v31 }
  0x3b   :  { %382 = vmatprep.mubr.bf16.mxu0 %v696_v32  ;;  %438 = vmatprep.mubr.bf16.mxu1 %v698_v33 }
  0x42   :  { %383 = vmatmul.mubr.bf16.gmra.mrb[16].mxu0 %v700_v34  ;;  %439 = vmatmul.mubr.bf16.gmra.mrb[16].mxu1 %v701_v35 }
  0x43   :  { %390 = vmatprep.mubr.bf16.mxu0 %v702_v36  ;;  %446 = vmatprep.mubr.bf16.mxu1 %v704_v37 }
  0x4a   :  { %391 = vmatmul.mubr.bf16.gmra.mrb[20].mxu0 %v706_v38  ;;  %447 = vmatmul.mubr.bf16.gmra.mrb[20].mxu1 %v707_v39 }
  0x4b   :  { %398 = vmatprep.mubr.bf16.mxu0 %v708_v40  ;;  %454 = vmatprep.mubr.bf16.mxu1 %v710_v41 }
  0x52   :  { %399 = vmatmul.mubr.bf16.gmra.mrb[24].mxu0 %v712_v42  ;;  %455 = vmatmul.mubr.bf16.gmra.mrb[24].mxu1 %v713_v43 }
  0xf5   :  { %v556_v44 = vpop.f32.mrb[0].mxu0  ;;  %v598_v45 = vpop.f32.mrb[0].mxu1 }
  0xf6   :  { %v557_v47 = vpop.f32.mrb[1].mxu0  ;;  %v599_v48 = vpop.f32.mrb[1].mxu1 }
  0xf7   :  { %v558_v49 = vadd.f32 %v557_v47, %v556_v44  ;;  %v600_v50 = vadd.f32 %v599_v48, %v598_v45  ;;  %v559_v51 = vpop.f32.mrb[2].mxu0  ;;  %v601_v52 = vpop.f32.mrb[2].mxu1 }
  0xf8   :  { %v560_v53 = vpop.f32.mrb[3].mxu0  ;;  %v602_v54 = vpop.f32.mrb[3].mxu1 }
  0xf9   :  { %v353_v55 = vadd.f32 %v558_v49, %v869_v46  ;;  %v409_v56 = vadd.f32 %v600_v50, %v869_v46  ;;  %v561_v57 = vadd.f32 %v560_v53, %v559_v51  ;;  %v603_v58 = vadd.f32 %v602_v54, %v601_v52 }
  0xfb   :  { %463 = vst [vmem:[%s986_s3] sm:$0xff] %v353_v55  ;;  %477 = vst [vmem:[%s986_s3 + $0x70] sm:$0xff] %v409_v56  ;;  %v356_v59 = vadd.f32 %v561_v57, %v869_v46  ;;  %v412_v60 = vadd.f32 %v603_v58, %v869_v46 }
  0xfd   :  { %464 = vst [vmem:[%s986_s3 + $0x8] sm:$0xff] %v356_v59  ;;  %478 = vst [vmem:[%s986_s3 + $0x78] sm:$0xff] %v412_v60  ;;  %v562_v61 = vpop.f32.mrb[4].mxu0  ;;  %v604_v62 = vpop.f32.mrb[4].mxu1 }
  0xfe   :  { %v563_v63 = vpop.f32.mrb[5].mxu0  ;;  %v605_v0 = vpop.f32.mrb[5].mxu1 }
  0xff   :  { %v564_v1 = vadd.f32 %v563_v63, %v562_v61  ;;  %v606_v2 = vadd.f32 %v605_v0, %v604_v62  ;;  %v565_v3 = vpop.f32.mrb[6].mxu0  ;;  %v607_v4 = vpop.f32.mrb[6].mxu1 }
 0x100   :  { %v566_v5 = vpop.f32.mrb[7].mxu0  ;;  %v608_v6 = vpop.f32.mrb[7].mxu1 }
 0x101   :  { %v361_v7 = vadd.f32 %v564_v1, %v869_v46  ;;  %v417_v8 = vadd.f32 %v606_v2, %v869_v46  ;;  %v567_v9 = vadd.f32 %v566_v5, %v565_v3  ;;  %v609_v10 = vadd.f32 %v608_v6, %v607_v4 }
 0x103   :  { %465 = vst [vmem:[%s986_s3 + $0x10] sm:$0xff] %v361_v7  ;;  %479 = vst [vmem:[%s986_s3 + $0x80] sm:$0xff] %v417_v8  ;;  %v364_v11 = vadd.f32 %v567_v9, %v869_v46  ;;  %v420_v12 = vadd.f32 %v609_v10, %v869_v46 }
 0x105   :  { %466 = vst [vmem:[%s986_s3 + $0x18] sm:$0xff] %v364_v11  ;;  %480 = vst [vmem:[%s986_s3 + $0x88] sm:$0xff] %v420_v12  ;;  %v568_v13 = vpop.f32.mrb[8].mxu0  ;;  %v610_v14 = vpop.f32.mrb[8].mxu1 }
 0x106   :  { %v569_v15 = vpop.f32.mrb[9].mxu0  ;;  %v611_v16 = vpop.f32.mrb[9].mxu1 }
 0x107   :  { %v570_v17 = vadd.f32 %v569_v15, %v568_v13  ;;  %v612_v18 = vadd.f32 %v611_v16, %v610_v14  ;;  %v571_v19 = vpop.f32.mrb[10].mxu0  ;;  %v613_v20 = vpop.f32.mrb[10].mxu1 }
 0x108   :  { %v572_v21 = vpop.f32.mrb[11].mxu0  ;;  %v614_v22 = vpop.f32.mrb[11].mxu1 }
 0x109   :  { %v369_v23 = vadd.f32 %v570_v17, %v869_v46  ;;  %v425_v24 = vadd.f32 %v612_v18, %v869_v46  ;;  %v573_v25 = vadd.f32 %v572_v21, %v571_v19  ;;  %v615_v26 = vadd.f32 %v614_v22, %v613_v20 }
 0x10b   :  { %467 = vst [vmem:[%s986_s3 + $0x20] sm:$0xff] %v369_v23  ;;  %481 = vst [vmem:[%s986_s3 + $0x90] sm:$0xff] %v425_v24  ;;  %v372_v27 = vadd.f32 %v573_v25, %v869_v46  ;;  %v428_v28 = vadd.f32 %v615_v26, %v869_v46 }
 0x10d   :  { %468 = vst [vmem:[%s986_s3 + $0x28] sm:$0xff] %v372_v27  ;;  %482 = vst [vmem:[%s986_s3 + $0x98] sm:$0xff] %v428_v28  ;;  %v574_v29 = vpop.f32.mrb[12].mxu0  ;;  %v616_v30 = vpop.f32.mrb[12].mxu1 }
 0x10e   :  { %v575_v31 = vpop.f32.mrb[13].mxu0  ;;  %v617_v32 = vpop.f32.mrb[13].mxu1 }
 0x10f   :  { %v576_v33 = vadd.f32 %v575_v31, %v574_v29  ;;  %v618_v34 = vadd.f32 %v617_v32, %v616_v30  ;;  %v577_v35 = vpop.f32.mrb[14].mxu0  ;;  %v619_v36 = vpop.f32.mrb[14].mxu1 }
 0x110   :  { %v578_v37 = vpop.f32.mrb[15].mxu0  ;;  %v620_v38 = vpop.f32.mrb[15].mxu1 }
 0x111   :  { %v377_v39 = vadd.f32 %v576_v33, %v869_v46  ;;  %v433_v40 = vadd.f32 %v618_v34, %v869_v46  ;;  %v579_v41 = vadd.f32 %v578_v37, %v577_v35  ;;  %v621_v42 = vadd.f32 %v620_v38, %v619_v36 }
 0x113   :  { %469 = vst [vmem:[%s986_s3 + $0x30] sm:$0xff] %v377_v39  ;;  %483 = vst [vmem:[%s986_s3 + $0xa0] sm:$0xff] %v433_v40  ;;  %v380_v43 = vadd.f32 %v579_v41, %v869_v46  ;;  %v436_v44 = vadd.f32 %v621_v42, %v869_v46 }
 0x115   :  { %470 = vst [vmem:[%s986_s3 + $0x38] sm:$0xff] %v380_v43  ;;  %484 = vst [vmem:[%s986_s3 + $0xa8] sm:$0xff] %v436_v44  ;;  %v580_v45 = vpop.f32.mrb[16].mxu0  ;;  %v622_v47 = vpop.f32.mrb[16].mxu1 }
 0x116   :  { %v581_v48 = vpop.f32.mrb[17].mxu0  ;;  %v623_v49 = vpop.f32.mrb[17].mxu1 }
 0x117   :  { %v582_v50 = vadd.f32 %v581_v48, %v580_v45  ;;  %v624_v51 = vadd.f32 %v623_v49, %v622_v47  ;;  %v583_v52 = vpop.f32.mrb[18].mxu0  ;;  %v625_v53 = vpop.f32.mrb[18].mxu1 }
 0x118   :  { %v584_v54 = vpop.f32.mrb[19].mxu0  ;;  %v626_v55 = vpop.f32.mrb[19].mxu1 }
 0x119   :  { %v385_v56 = vadd.f32 %v582_v50, %v869_v46  ;;  %v441_v57 = vadd.f32 %v624_v51, %v869_v46  ;;  %v585_v58 = vadd.f32 %v584_v54, %v583_v52  ;;  %v627_v59 = vadd.f32 %v626_v55, %v625_v53 }
 0x11b   :  { %471 = vst [vmem:[%s986_s3 + $0x40] sm:$0xff] %v385_v56  ;;  %485 = vst [vmem:[%s986_s3 + $0xb0] sm:$0xff] %v441_v57  ;;  %v388_v60 = vadd.f32 %v585_v58, %v869_v46  ;;  %v444_v61 = vadd.f32 %v627_v59, %v869_v46 }
 0x11d   :  { %472 = vst [vmem:[%s986_s3 + $0x48] sm:$0xff] %v388_v60  ;;  %486 = vst [vmem:[%s986_s3 + $0xb8] sm:$0xff] %v444_v61  ;;  %v586_v62 = vpop.f32.mrb[20].mxu0  ;;  %v628_v63 = vpop.f32.mrb[20].mxu1 }
 0x11e   :  { %v587_v0 = vpop.f32.mrb[21].mxu0  ;;  %v629_v1 = vpop.f32.mrb[21].mxu1 }
 0x11f   :  { %v588_v2 = vadd.f32 %v587_v0, %v586_v62  ;;  %v630_v3 = vadd.f32 %v629_v1, %v628_v63  ;;  %v589_v4 = vpop.f32.mrb[22].mxu0  ;;  %v631_v5 = vpop.f32.mrb[22].mxu1 }
 0x120   :  { %v590_v6 = vpop.f32.mrb[23].mxu0  ;;  %v632_v7 = vpop.f32.mrb[23].mxu1 }
 0x121   :  { %v393_v8 = vadd.f32 %v588_v2, %v869_v46  ;;  %v449_v9 = vadd.f32 %v630_v3, %v869_v46  ;;  %v591_v10 = vadd.f32 %v590_v6, %v589_v4  ;;  %v633_v11 = vadd.f32 %v632_v7, %v631_v5 }
 0x123   :  { %473 = vst [vmem:[%s986_s3 + $0x50] sm:$0xff] %v393_v8  ;;  %487 = vst [vmem:[%s986_s3 + $0xc0] sm:$0xff] %v449_v9  ;;  %v396_v12 = vadd.f32 %v591_v10, %v869_v46  ;;  %v452_v13 = vadd.f32 %v633_v11, %v869_v46 }
 0x125   :  { %474 = vst [vmem:[%s986_s3 + $0x58] sm:$0xff] %v396_v12  ;;  %488 = vst [vmem:[%s986_s3 + $0xc8] sm:$0xff] %v452_v13  ;;  %v592_v14 = vpop.f32.mrb[24].mxu0  ;;  %v634_v15 = vpop.f32.mrb[24].mxu1 }
 0x126   :  { %v593_v16 = vpop.f32.mrb[25].mxu0  ;;  %v635_v17 = vpop.f32.mrb[25].mxu1 }
 0x127   :  { %v594_v18 = vadd.f32 %v593_v16, %v592_v14  ;;  %v636_v19 = vadd.f32 %v635_v17, %v634_v15  ;;  %v595_v20 = vpop.f32.mrb[26].mxu0  ;;  %v637_v21 = vpop.f32.mrb[26].mxu1 }
 0x128   :  { %v596_v22 = vpop.f32.mrb[27].mxu0  ;;  %v638_v23 = vpop.f32.mrb[27].mxu1 }
 0x129   :  { %v401_v24 = vadd.f32 %v594_v18, %v869_v46  ;;  %v457_v25 = vadd.f32 %v636_v19, %v869_v46  ;;  %v597_v26 = vadd.f32 %v596_v22, %v595_v20  ;;  %v639_v27 = vadd.f32 %v638_v23, %v637_v21 }
 0x12b   :  { %475 = vst [vmem:[%s986_s3 + $0x60] sm:$0xff] %v401_v24  ;;  %489 = vst [vmem:[%s986_s3 + $0xd0] sm:$0xff] %v457_v25  ;;  %v404_v28 = vadd.f32 %v597_v26, %v869_v46  ;;  %v460_v29 = vadd.f32 %v639_v27, %v869_v46 }
 0x12d   :  { %476 = vst [vmem:[%s986_s3 + $0x68] sm:$0xff] %v404_v28  ;;  %490 = vst [vmem:[%s986_s3 + $0xd8] sm:$0xff] %v460_v29 }

// kernel: _vision_forward_impl.5
= control target key start
LH: loop header
LB: loop body
LE: loop exit
PB: predicated region body
PF: predicated region fallthrough
CT: control target
= control target key end

     0   :  { %s902_s1 = inlined_call_operand.vmem [shape: bf16[512,128], index: 1, kind: input, shape index: {}]   ;;  %s903_s0 = inlined_call_operand.vmem [shape: bf16[64,512], index: 0, kind: input, shape index: {}]   ;;  %s904_s2 = inlined_call_operand.vmem [shape: f32[1,128], index: 2, kind: input, shape index: {}]   ;;  %s905_s3 = inlined_call_operand.vmem [shape: f32[64,128], index: 3, kind: output, shape index: {}]  }
   0x1   :  { %v645_v0 = vld [vmem:[%s902_s1 + $0x40] sm:$0xff]   ;;  %v649_v4 = vld [vmem:[%s902_s1 + $0x48] sm:$0xff]   ;;  %v653_v8 = vld [vmem:[%s902_s1 + $0x50] sm:$0xff]  }
   0x2   :  { %v646_v1 = vld [vmem:[%s902_s1 + $0xc0] sm:$0xff]   ;;  %565 = vmatprep.subr.bf16.mxu0 %v645_v0  ;;  %v650_v5 = vld [vmem:[%s902_s1 + $0xc8] sm:$0xff]   ;;  %v654_v9 = vld [vmem:[%s902_s1 + $0xd0] sm:$0xff]  }
   0x3   :  { %v647_v2 = vld [vmem:[%s902_s1] sm:$0xff]   ;;  %605 = vmatprep.subr.bf16.mxu1 %v646_v1  ;;  %v651_v6 = vld [vmem:[%s902_s1 + $0x8] sm:$0xff]   ;;  %v655_v10 = vld [vmem:[%s902_s1 + $0x10] sm:$0xff]  }
   0x4   :  { %v648_v3 = vld [vmem:[%s902_s1 + $0x80] sm:$0xff]   ;;  %566 = vmatpush3.bf16.msra.mxu0 %v647_v2  ;;  %v652_v7 = vld [vmem:[%s902_s1 + $0x88] sm:$0xff]   ;;  %v656_v11 = vld [vmem:[%s902_s1 + $0x90] sm:$0xff]  }
   0x5   :  { %606 = vmatpush3.bf16.msra.mxu1 %v648_v3  ;;  %567 = vmatprep.subr.bf16.mxu0 %v649_v4  ;;  %v657_v12 = vld [vmem:[%s902_s1 + $0x58] sm:$0xff]   ;;  %v661_v16 = vld [vmem:[%s902_s1 + $0x60] sm:$0xff]   ;;  %v665_v20 = vld [vmem:[%s902_s1 + $0x68] sm:$0xff]  }
   0x6   :  { %607 = vmatprep.subr.bf16.mxu1 %v650_v5  ;;  %v658_v13 = vld [vmem:[%s902_s1 + $0xd8] sm:$0xff]   ;;  %v662_v17 = vld [vmem:[%s902_s1 + $0xe0] sm:$0xff]   ;;  %v666_v21 = vld [vmem:[%s902_s1 + $0xe8] sm:$0xff]  }
   0x7   :  { %v659_v14 = vld [vmem:[%s902_s1 + $0x18] sm:$0xff]   ;;  %v663_v18 = vld [vmem:[%s902_s1 + $0x20] sm:$0xff]   ;;  %v667_v22 = vld [vmem:[%s902_s1 + $0x28] sm:$0xff]  }
   0x8   :  { %568 = vmatpush3.bf16.msra.mxu0 %v651_v6  ;;  %v660_v15 = vld [vmem:[%s902_s1 + $0x98] sm:$0xff]   ;;  %v664_v19 = vld [vmem:[%s902_s1 + $0xa0] sm:$0xff]   ;;  %v668_v23 = vld [vmem:[%s902_s1 + $0xa8] sm:$0xff]  }
   0x9   :  { %608 = vmatpush3.bf16.msra.mxu1 %v652_v7  ;;  %569 = vmatprep.subr.bf16.mxu0 %v653_v8  ;;  %v669_v24 = vld [vmem:[%s902_s1 + $0x70] sm:$0xff]   ;;  %v673_v28 = vld [vmem:[%s902_s1 + $0x78] sm:$0xff]   ;;  %v868_v50 = vld [vmem:[%s904_s2] ss:$0 sm:$0xff] }
   0xa   :  { %609 = vmatprep.subr.bf16.mxu1 %v654_v9  ;;  %v670_v25 = vld [vmem:[%s902_s1 + $0xf0] sm:$0xff]   ;;  %v674_v29 = vld [vmem:[%s902_s1 + $0xf8] sm:$0xff]  }
   0xb   :  { %v671_v26 = vld [vmem:[%s902_s1 + $0x30] sm:$0xff]   ;;  %v675_v30 = vld [vmem:[%s902_s1 + $0x38] sm:$0xff]  }
   0xc   :  { %570 = vmatpush3.bf16.msra.mxu0 %v655_v10  ;;  %v672_v27 = vld [vmem:[%s902_s1 + $0xb0] sm:$0xff]   ;;  %v676_v31 = vld [vmem:[%s902_s1 + $0xb8] sm:$0xff]  }
   0xd   :  { %610 = vmatpush3.bf16.msra.mxu1 %v656_v11  ;;  %571 = vmatprep.subr.bf16.mxu0 %v657_v12  ;;  %v677_v32 = vld [vmem:[%s903_s0] ss:$16 sps:$4 sm:$0xff]   ;;  %v679_v33 = vld [vmem:[%s903_s0 + $0x4] ss:$16 sps:$4 sm:$0xff]   ;;  %v680_v34 = vld [vmem:[%s903_s0 + $0x8] ss:$16 sps:$4 sm:$0xff]  }
   0xe   :  { %611 = vmatprep.subr.bf16.mxu1 %v658_v13  ;;  %v682_v35 = vld [vmem:[%s903_s0 + $0xc] ss:$16 sps:$4 sm:$0xff]   ;;  %406 = vmatprep.mubr.bf16.mxu0 %v679_v33  ;;  %v683_v36 = vld [vmem:[%s903_s0 + $0x24] ss:$16 sps:$4 sm:$0xff]   ;;  %v687_v38 = vld [vmem:[%s903_s0 + $0x20] ss:$16 sps:$4 sm:$0xff]  }
   0xf   :  { %471 = vmatprep.mubr.bf16.mxu1 %v682_v35  ;;  %v685_v37 = vld [vmem:[%s903_s0 + $0x2c] ss:$16 sps:$4 sm:$0xff]   ;;  %v688_v39 = vld [vmem:[%s903_s0 + $0x28] ss:$16 sps:$4 sm:$0xff]   ;;  %v689_v40 = vld [vmem:[%s903_s0 + $0x44] ss:$16 sps:$4 sm:$0xff]  }
  0x10   :  { %572 = vmatpush3.bf16.msra.mxu0 %v659_v14  ;;  %v691_v41 = vld [vmem:[%s903_s0 + $0x4c] ss:$16 sps:$4 sm:$0xff]   ;;  %v693_v42 = vld [vmem:[%s903_s0 + $0x40] ss:$16 sps:$4 sm:$0xff]   ;;  %v694_v43 = vld [vmem:[%s903_s0 + $0x48] ss:$16 sps:$4 sm:$0xff]  }
  0x11   :  { %612 = vmatpush3.bf16.msra.mxu1 %v660_v15  ;;  %573 = vmatprep.subr.bf16.mxu0 %v661_v16  ;;  %v695_v44 = vld [vmem:[%s903_s0 + $0x64] ss:$16 sps:$4 sm:$0xff]   ;;  %v697_v45 = vld [vmem:[%s903_s0 + $0x6c] ss:$16 sps:$4 sm:$0xff]   ;;  %v699_v46 = vld [vmem:[%s903_s0 + $0x60] ss:$16 sps:$4 sm:$0xff]  }
  0x12   :  { %613 = vmatprep.subr.bf16.mxu1 %v662_v17  ;;  %v700_v47 = vld [vmem:[%s903_s0 + $0x68] ss:$16 sps:$4 sm:$0xff]  }
  0x14   :  { %574 = vmatpush3.bf16.msra.mxu0 %v663_v18 }
  0x15   :  { %614 = vmatpush3.bf16.msra.mxu1 %v664_v19  ;;  %575 = vmatprep.subr.bf16.mxu0 %v665_v20 }
  0x16   :  { %615 = vmatprep.subr.bf16.mxu1 %v666_v21 }
  0x18   :  { %576 = vmatpush3.bf16.msra.mxu0 %v667_v22 }
  0x19   :  { %616 = vmatpush3.bf16.msra.mxu1 %v668_v23  ;;  %577 = vmatprep.subr.bf16.mxu0 %v669_v24 }
  0x1a   :  { %617 = vmatprep.subr.bf16.mxu1 %v670_v25 }
  0x1c   :  { %578 = vmatpush3.bf16.msra.mxu0 %v671_v26 }
  0x1d   :  { %618 = vmatpush3.bf16.msra.mxu1 %v672_v27  ;;  %579 = vmatprep.subr.bf16.mxu0 %v673_v28 }
  0x1e   :  { %619 = vmatprep.subr.bf16.mxu1 %v674_v29 }
  0x20   :  { %580 = vmatpush3.bf16.msra.mxu0 %v675_v30 }
  0x21   :  { %620 = vmatpush3.bf16.msra.mxu1 %v676_v31 }
  0x23   :  { %407 = vmatmul.mubr.bf16.vlgmr.msra.gmra.mrb[0].mxu0 %v677_v32 }
  0x24   :  { %472 = vmatmul.mubr.bf16.vlgmr.msra.gmra.mrb[0].mxu1 %v680_v34  ;;  %414 = vmatprep.mubr.bf16.mxu0 %v683_v36 }
  0x25   :  { %479 = vmatprep.mubr.bf16.mxu1 %v685_v37 }
  0x2b   :  { %415 = vmatmul.mubr.bf16.gmra.mrb[4].mxu0 %v687_v38 }
  0x2c   :  { %480 = vmatmul.mubr.bf16.gmra.mrb[4].mxu1 %v688_v39  ;;  %422 = vmatprep.mubr.bf16.mxu0 %v689_v40 }
  0x2d   :  { %487 = vmatprep.mubr.bf16.mxu1 %v691_v41 }
  0x33   :  { %423 = vmatmul.mubr.bf16.gmra.mrb[8].mxu0 %v693_v42 }
  0x34   :  { %488 = vmatmul.mubr.bf16.gmra.mrb[8].mxu1 %v694_v43  ;;  %430 = vmatprep.mubr.bf16.mxu0 %v695_v44 }
  0x35   :  { %495 = vmatprep.mubr.bf16.mxu1 %v697_v45 }
  0x3b   :  { %431 = vmatmul.mubr.bf16.gmra.mrb[12].mxu0 %v699_v46 }
  0x3c   :  { %496 = vmatmul.mubr.bf16.gmra.mrb[12].mxu1 %v700_v47 }
  0xf6   :  { %v581_v48 = vpop.f32.mrb[0].mxu0 }
  0xf7   :  { %v621_v49 = vpop.f32.mrb[0].mxu1  ;;  %v582_v51 = vpop.f32.mrb[1].mxu0 }
  0xf8   :  { %v583_v52 = vadd.f32 %v582_v51, %v581_v48  ;;  %v622_v53 = vpop.f32.mrb[1].mxu1  ;;  %v584_v54 = vpop.f32.mrb[2].mxu0 }
  0xf9   :  { %v623_v55 = vadd.f32 %v622_v53, %v621_v49  ;;  %v624_v56 = vpop.f32.mrb[2].mxu1  ;;  %v585_v57 = vpop.f32.mrb[3].mxu0 }
  0xfa   :  { %v409_v58 = vadd.f32 %v583_v52, %v868_v50  ;;  %v586_v59 = vadd.f32 %v585_v57, %v584_v54  ;;  %v625_v60 = vpop.f32.mrb[3].mxu1 }
  0xfb   :  { %v626_v61 = vadd.f32 %v625_v60, %v624_v56 }
  0xfc   :  { %v474_v62 = vadd.f32 %v623_v55, %v409_v58  ;;  %v412_v63 = vadd.f32 %v586_v59, %v868_v50 }
  0xfe   :  { %504 = vst [vmem:[%s905_s3] sm:$0xff] %v474_v62  ;;  %v477_v0 = vadd.f32 %v626_v61, %v412_v63  ;;  %v587_v1 = vpop.f32.mrb[4].mxu0 }
  0xff   :  { %v627_v2 = vpop.f32.mrb[4].mxu1  ;;  %v588_v3 = vpop.f32.mrb[5].mxu0 }
 0x100   :  { %505 = vst [vmem:[%s905_s3 + $0x8] sm:$0xff] %v477_v0  ;;  %v589_v4 = vadd.f32 %v588_v3, %v587_v1  ;;  %v628_v5 = vpop.f32.mrb[5].mxu1  ;;  %v590_v6 = vpop.f32.mrb[6].mxu0 }
 0x101   :  { %v629_v7 = vadd.f32 %v628_v5, %v627_v2  ;;  %v630_v8 = vpop.f32.mrb[6].mxu1  ;;  %v591_v9 = vpop.f32.mrb[7].mxu0 }
 0x102   :  { %v417_v10 = vadd.f32 %v589_v4, %v868_v50  ;;  %v592_v11 = vadd.f32 %v591_v9, %v590_v6  ;;  %v631_v12 = vpop.f32.mrb[7].mxu1 }
 0x103   :  { %v632_v13 = vadd.f32 %v631_v12, %v630_v8 }
 0x104   :  { %v482_v14 = vadd.f32 %v629_v7, %v417_v10  ;;  %v420_v15 = vadd.f32 %v592_v11, %v868_v50 }
 0x106   :  { %506 = vst [vmem:[%s905_s3 + $0x10] sm:$0xff] %v482_v14  ;;  %v485_v16 = vadd.f32 %v632_v13, %v420_v15  ;;  %v593_v17 = vpop.f32.mrb[8].mxu0 }
 0x107   :  { %v633_v18 = vpop.f32.mrb[8].mxu1  ;;  %v594_v19 = vpop.f32.mrb[9].mxu0 }
 0x108   :  { %507 = vst [vmem:[%s905_s3 + $0x18] sm:$0xff] %v485_v16  ;;  %v595_v20 = vadd.f32 %v594_v19, %v593_v17  ;;  %v634_v21 = vpop.f32.mrb[9].mxu1  ;;  %v596_v22 = vpop.f32.mrb[10].mxu0 }
 0x109   :  { %v635_v23 = vadd.f32 %v634_v21, %v633_v18  ;;  %v636_v24 = vpop.f32.mrb[10].mxu1  ;;  %v597_v25 = vpop.f32.mrb[11].mxu0 }
 0x10a   :  { %v425_v26 = vadd.f32 %v595_v20, %v868_v50  ;;  %v598_v27 = vadd.f32 %v597_v25, %v596_v22  ;;  %v637_v28 = vpop.f32.mrb[11].mxu1 }
 0x10b   :  { %v638_v29 = vadd.f32 %v637_v28, %v636_v24 }
 0x10c   :  { %v490_v30 = vadd.f32 %v635_v23, %v425_v26  ;;  %v428_v31 = vadd.f32 %v598_v27, %v868_v50 }
 0x10e   :  { %508 = vst [vmem:[%s905_s3 + $0x20] sm:$0xff] %v490_v30  ;;  %v493_v32 = vadd.f32 %v638_v29, %v428_v31  ;;  %v599_v33 = vpop.f32.mrb[12].mxu0 }
 0x10f   :  { %v639_v34 = vpop.f32.mrb[12].mxu1  ;;  %v600_v35 = vpop.f32.mrb[13].mxu0 }
 0x110   :  { %509 = vst [vmem:[%s905_s3 + $0x28] sm:$0xff] %v493_v32  ;;  %v601_v36 = vadd.f32 %v600_v35, %v599_v33  ;;  %v640_v37 = vpop.f32.mrb[13].mxu1  ;;  %v602_v38 = vpop.f32.mrb[14].mxu0 }
 0x111   :  { %v641_v39 = vadd.f32 %v640_v37, %v639_v34  ;;  %v642_v40 = vpop.f32.mrb[14].mxu1  ;;  %v603_v41 = vpop.f32.mrb[15].mxu0 }
 0x112   :  { %v433_v42 = vadd.f32 %v601_v36, %v868_v50  ;;  %v604_v43 = vadd.f32 %v603_v41, %v602_v38  ;;  %v643_v44 = vpop.f32.mrb[15].mxu1 }
 0x113   :  { %v644_v45 = vadd.f32 %v643_v44, %v642_v40 }
 0x114   :  { %v498_v46 = vadd.f32 %v641_v39, %v433_v42  ;;  %v436_v47 = vadd.f32 %v604_v43, %v868_v50 }
 0x116   :  { %510 = vst [vmem:[%s905_s3 + $0x30] sm:$0xff] %v498_v46  ;;  %v501_v48 = vadd.f32 %v644_v45, %v436_v47 }
 0x118   :  { %511 = vst [vmem:[%s905_s3 + $0x38] sm:$0xff] %v501_v48 }

// kernel: _vision_forward_impl.6
= control target key start
LH: loop header
LB: loop body
LE: loop exit
PB: predicated region body
PF: predicated region fallthrough
CT: control target
= control target key end

     0   :  { %s2018_s12 = smov 0   ;;  %s2020_s13 = smov 0   ;;  %s2470_s0 = inlined_call_operand.vmem [shape: bf16[64,640], index: 0, kind: input, shape index: {}]   ;;  %s2471_s1 = inlined_call_operand.vmem [shape: bf16[640,512], index: 1, kind: input, shape index: {}]   ;;  %s2472_s2 = inlined_call_operand.vmem [shape: f32[1,512], index: 2, kind: input, shape index: {}]   ;;  %s2473_s3 = inlined_call_operand.vmem [shape: f32[64,512], index: 3, kind: output, shape index: {}]  }
   0x1   :  { %s2022_s14 = smov 0   ;;  %s2024_s15 = smov 0  }
   0x2   :  { %s2026_s16 = smov 0  }
   0x3 LB: > { %s22_s17 = sadd.s32 1, %s1991_s15  ;;  %s1585_s18 = sadd.s32 4294967295, %s1995_s16   ;;  %s1995_s16 = sphi %s2026_s16, %s13_s16   ;;  %s1991_s15 = sphi %s2024_s15, %s2478_s15   ;;  %s1987_s14 = sphi %s2022_s14, %s2477_s14   ;;  %s1983_s13 = sphi %s2020_s13, %s2476_s13   ;;  %s1979_s12 = sphi %s2018_s12, %s2475_s12  }
   0x4   : > { %p23_p0 = scmp.ge.s32.totalorder %s22_s17, 2  ;;  %p65_p1 = scmp.ne.s32.totalorder %s1983_s13, %s1979_s12 }
   0x5   : > { %p66_p2 = scmp.eq.s32.totalorder %s1995_s16, 0  ;;  %p123_p4 = scmp.eq.s32.totalorder %s1585_s18, 1 }
   0x6   : > { %s2480_s17 = smov (%p23_p0, %s22_s17), 0  ;;  %s58_s20 = sadd.s32 1, %s1983_s13 }
   0x7   : > { %p67_p3 = por %p66_p2, %p65_p1  ;;  %s55_s19 = ssub.s32 %s1991_s15, %s2480_s17 }
   0x8   : > { %p56_p5 = scmp.eq.s32.totalorder %s55_s19, 0  ;;  %p2053_p6 = por %p123_p4, %p65_p1 }
   0x9   : > { %p1589_p7 = scmp.ge.s32.totalorder %s1995_s16, 2 }
   0xa   : > { %s2058_s22 = scalar_select %p56_p5, %s1983_s13, %s58_s20  }
   0xb   : > { %155 = sbr.rel (%p1589_p7) target bundleno = 62 (0x3e), region = 20 }
  0x12   : > { %158 = sbr.rel (!%p67_p3) target bundleno = 62 (0x3e), region = 24  ;;  %s160_s23 = sand.u32 (%p67_p3), 1, %s1983_s13  }
  0x13   : > { %s1700_s24 = sshll.u32 (%p67_p3), %s1991_s15, 3  ;;  %s1766_s25 = smul.u32 (%p67_p3), 640, %s160_s23 }
  0x14   : > { %s2066_s28 = scalar_lea.vmem (%p67_p3), %s2471_s1, %s1700_s24 }
  0x15   : > { %v351_v0 = vld [vmem:[%s2066_s28] sm:$0xff] (%p67_p3)  ;;  %v353_v1 = vld [vmem:[%s2066_s28 + $0x10] sm:$0xff] (%p67_p3)  ;;  %s2074_s29 = scalar_lea.vmem (%p67_p3), [#allocation2], %s1766_s25 }
  0x16   : > { %v355_v2 = vld [vmem:[%s2066_s28 + $0x20] sm:$0xff] (%p67_p3)  ;;  %v357_v3 = vld [vmem:[%s2066_s28 + $0x30] sm:$0xff] (%p67_p3)  ;;  %352 = vst [vmem:[%s2074_s29] sm:$0xff] (%p67_p3), %v351_v0  ;;  %354 = vst [vmem:[%s2074_s29 + $0x8] sm:$0xff] (%p67_p3), %v353_v1 }
  0x17   : > { %v359_v4 = vld [vmem:[%s2066_s28 + $0x40] sm:$0xff] (%p67_p3)  ;;  %v361_v5 = vld [vmem:[%s2066_s28 + $0x50] sm:$0xff] (%p67_p3)  ;;  %356 = vst [vmem:[%s2074_s29 + $0x10] sm:$0xff] (%p67_p3), %v355_v2  ;;  %358 = vst [vmem:[%s2074_s29 + $0x18] sm:$0xff] (%p67_p3), %v357_v3 }
  0x18   : > { %360 = vst [vmem:[%s2074_s29 + $0x20] sm:$0xff] (%p67_p3), %v359_v4  ;;  %362 = vst [vmem:[%s2074_s29 + $0x28] sm:$0xff] (%p67_p3), %v361_v5  ;;  %v363_v6 = vld [vmem:[%s2066_s28 + $0x60] sm:$0xff] (%p67_p3)  ;;  %v365_v7 = vld [vmem:[%s2066_s28 + $0x70] sm:$0xff] (%p67_p3) }
  0x19   : > { %v367_v8 = vld [vmem:[%s2066_s28 + $0x80] sm:$0xff]  ;;  %364 = vst [vmem:[%s2074_s29 + $0x30] sm:$0xff] %v363_v6  ;;  %366 = vst [vmem:[%s2074_s29 + $0x38] sm:$0xff] %v365_v7  ;;  %v369_v9 = vld [vmem:[%s2066_s28 + $0x90] sm:$0xff] }
  0x1a   : > { %368 = vst [vmem:[%s2074_s29 + $0x40] sm:$0xff] %v367_v8  ;;  %v371_v10 = vld [vmem:[%s2066_s28 + $0xa0] sm:$0xff]  ;;  %v373_v11 = vld [vmem:[%s2066_s28 + $0xb0] sm:$0xff]  ;;  %370 = vst [vmem:[%s2074_s29 + $0x48] sm:$0xff] %v369_v9 }
  0x1b   : > { %372 = vst [vmem:[%s2074_s29 + $0x50] sm:$0xff] %v371_v10  ;;  %374 = vst [vmem:[%s2074_s29 + $0x58] sm:$0xff] %v373_v11  ;;  %v375_v12 = vld [vmem:[%s2066_s28 + $0xc0] sm:$0xff]  ;;  %v377_v13 = vld [vmem:[%s2066_s28 + $0xd0] sm:$0xff] }
  0x1c   : > { %v379_v14 = vld [vmem:[%s2066_s28 + $0xe0] sm:$0xff]  ;;  %376 = vst [vmem:[%s2074_s29 + $0x60] sm:$0xff] %v375_v12  ;;  %378 = vst [vmem:[%s2074_s29 + $0x68] sm:$0xff] %v377_v13  ;;  %v381_v15 = vld [vmem:[%s2066_s28 + $0xf0] sm:$0xff] }
  0x1d   : > { %380 = vst [vmem:[%s2074_s29 + $0x70] sm:$0xff] %v379_v14  ;;  %v383_v16 = vld [vmem:[%s2066_s28 + $0x100] sm:$0xff]  ;;  %v385_v17 = vld [vmem:[%s2066_s28 + $0x110] sm:$0xff]  ;;  %382 = vst [vmem:[%s2074_s29 + $0x78] sm:$0xff] %v381_v15 }
  0x1e   : > { %384 = vst [vmem:[%s2074_s29 + $0x80] sm:$0xff] %v383_v16  ;;  %386 = vst [vmem:[%s2074_s29 + $0x88] sm:$0xff] %v385_v17  ;;  %v387_v18 = vld [vmem:[%s2066_s28 + $0x120] sm:$0xff]  ;;  %v389_v19 = vld [vmem:[%s2066_s28 + $0x130] sm:$0xff] }
  0x1f   : > { %v391_v20 = vld [vmem:[%s2066_s28 + $0x140] sm:$0xff]  ;;  %388 = vst [vmem:[%s2074_s29 + $0x90] sm:$0xff] %v387_v18  ;;  %390 = vst [vmem:[%s2074_s29 + $0x98] sm:$0xff] %v389_v19  ;;  %v393_v21 = vld [vmem:[%s2066_s28 + $0x150] sm:$0xff] }
  0x20   : > { %392 = vst [vmem:[%s2074_s29 + $0xa0] sm:$0xff] %v391_v20  ;;  %v395_v22 = vld [vmem:[%s2066_s28 + $0x160] sm:$0xff]  ;;  %v397_v23 = vld [vmem:[%s2066_s28 + $0x170] sm:$0xff]  ;;  %394 = vst [vmem:[%s2074_s29 + $0xa8] sm:$0xff] %v393_v21 }
  0x21   : > { %396 = vst [vmem:[%s2074_s29 + $0xb0] sm:$0xff] %v395_v22  ;;  %398 = vst [vmem:[%s2074_s29 + $0xb8] sm:$0xff] %v397_v23  ;;  %v399_v24 = vld [vmem:[%s2066_s28 + $0x180] sm:$0xff]  ;;  %v401_v25 = vld [vmem:[%s2066_s28 + $0x190] sm:$0xff] }
  0x22   : > { %v403_v26 = vld [vmem:[%s2066_s28 + $0x1a0] sm:$0xff]  ;;  %400 = vst [vmem:[%s2074_s29 + $0xc0] sm:$0xff] %v399_v24  ;;  %402 = vst [vmem:[%s2074_s29 + $0xc8] sm:$0xff] %v401_v25  ;;  %v405_v27 = vld [vmem:[%s2066_s28 + $0x1b0] sm:$0xff] }
  0x23   : > { %404 = vst [vmem:[%s2074_s29 + $0xd0] sm:$0xff] %v403_v26  ;;  %v407_v28 = vld [vmem:[%s2066_s28 + $0x1c0] sm:$0xff]  ;;  %v409_v29 = vld [vmem:[%s2066_s28 + $0x1d0] sm:$0xff]  ;;  %406 = vst [vmem:[%s2074_s29 + $0xd8] sm:$0xff] %v405_v27 }
  0x24   : > { %408 = vst [vmem:[%s2074_s29 + $0xe0] sm:$0xff] %v407_v28  ;;  %410 = vst [vmem:[%s2074_s29 + $0xe8] sm:$0xff] %v409_v29  ;;  %v411_v30 = vld [vmem:[%s2066_s28 + $0x1e0] sm:$0xff]  ;;  %v413_v31 = vld [vmem:[%s2066_s28 + $0x1f0] sm:$0xff] }
  0x25   : > { %v415_v32 = vld [vmem:[%s2066_s28 + $0x200] sm:$0xff]  ;;  %412 = vst [vmem:[%s2074_s29 + $0xf0] sm:$0xff] %v411_v30  ;;  %414 = vst [vmem:[%s2074_s29 + $0xf8] sm:$0xff] %v413_v31  ;;  %v417_v33 = vld [vmem:[%s2066_s28 + $0x210] sm:$0xff] }
  0x26   : > { %416 = vst [vmem:[%s2074_s29 + $0x100] sm:$0xff] %v415_v32  ;;  %v419_v34 = vld [vmem:[%s2066_s28 + $0x220] sm:$0xff]  ;;  %v421_v35 = vld [vmem:[%s2066_s28 + $0x230] sm:$0xff]  ;;  %418 = vst [vmem:[%s2074_s29 + $0x108] sm:$0xff] %v417_v33 }
  0x27   : > { %420 = vst [vmem:[%s2074_s29 + $0x110] sm:$0xff] %v419_v34  ;;  %422 = vst [vmem:[%s2074_s29 + $0x118] sm:$0xff] %v421_v35  ;;  %v423_v36 = vld [vmem:[%s2066_s28 + $0x240] sm:$0xff]  ;;  %v425_v37 = vld [vmem:[%s2066_s28 + $0x250] sm:$0xff] }
  0x28   : > { %v427_v38 = vld [vmem:[%s2066_s28 + $0x260] sm:$0xff]  ;;  %424 = vst [vmem:[%s2074_s29 + $0x120] sm:$0xff] %v423_v36  ;;  %426 = vst [vmem:[%s2074_s29 + $0x128] sm:$0xff] %v425_v37  ;;  %v429_v39 = vld [vmem:[%s2066_s28 + $0x270] sm:$0xff] }
  0x29   : > { %428 = vst [vmem:[%s2074_s29 + $0x130] sm:$0xff] %v427_v38  ;;  %v431_v40 = vld [vmem:[%s2066_s28 + $0x280] sm:$0xff]  ;;  %v433_v41 = vld [vmem:[%s2066_s28 + $0x290] sm:$0xff]  ;;  %430 = vst [vmem:[%s2074_s29 + $0x138] sm:$0xff] %v429_v39 }
  0x2a   : > { %432 = vst [vmem:[%s2074_s29 + $0x140] sm:$0xff] %v431_v40  ;;  %434 = vst [vmem:[%s2074_s29 + $0x148] sm:$0xff] %v433_v41  ;;  %v435_v42 = vld [vmem:[%s2066_s28 + $0x2a0] sm:$0xff]  ;;  %v437_v43 = vld [vmem:[%s2066_s28 + $0x2b0] sm:$0xff] }
  0x2b   : > { %v439_v44 = vld [vmem:[%s2066_s28 + $0x2c0] sm:$0xff]  ;;  %436 = vst [vmem:[%s2074_s29 + $0x150] sm:$0xff] %v435_v42  ;;  %438 = vst [vmem:[%s2074_s29 + $0x158] sm:$0xff] %v437_v43  ;;  %v441_v45 = vld [vmem:[%s2066_s28 + $0x2d0] sm:$0xff] }
  0x2c   : > { %440 = vst [vmem:[%s2074_s29 + $0x160] sm:$0xff] %v439_v44  ;;  %v443_v46 = vld [vmem:[%s2066_s28 + $0x2e0] sm:$0xff]  ;;  %v445_v47 = vld [vmem:[%s2066_s28 + $0x2f0] sm:$0xff]  ;;  %442 = vst [vmem:[%s2074_s29 + $0x168] sm:$0xff] %v441_v45 }
  0x2d   : > { %444 = vst [vmem:[%s2074_s29 + $0x170] sm:$0xff] %v443_v46  ;;  %446 = vst [vmem:[%s2074_s29 + $0x178] sm:$0xff] %v445_v47  ;;  %v447_v48 = vld [vmem:[%s2066_s28 + $0x300] sm:$0xff]  ;;  %v449_v49 = vld [vmem:[%s2066_s28 + $0x310] sm:$0xff] }
  0x2e   : > { %v451_v50 = vld [vmem:[%s2066_s28 + $0x320] sm:$0xff]  ;;  %448 = vst [vmem:[%s2074_s29 + $0x180] sm:$0xff] %v447_v48  ;;  %450 = vst [vmem:[%s2074_s29 + $0x188] sm:$0xff] %v449_v49  ;;  %v453_v51 = vld [vmem:[%s2066_s28 + $0x330] sm:$0xff] }
  0x2f   : > { %452 = vst [vmem:[%s2074_s29 + $0x190] sm:$0xff] %v451_v50  ;;  %v455_v52 = vld [vmem:[%s2066_s28 + $0x340] sm:$0xff]  ;;  %v457_v53 = vld [vmem:[%s2066_s28 + $0x350] sm:$0xff]  ;;  %454 = vst [vmem:[%s2074_s29 + $0x198] sm:$0xff] %v453_v51 }
  0x30   : > { %456 = vst [vmem:[%s2074_s29 + $0x1a0] sm:$0xff] %v455_v52  ;;  %458 = vst [vmem:[%s2074_s29 + $0x1a8] sm:$0xff] %v457_v53  ;;  %v459_v54 = vld [vmem:[%s2066_s28 + $0x360] sm:$0xff]  ;;  %v461_v55 = vld [vmem:[%s2066_s28 + $0x370] sm:$0xff] }
  0x31   : > { %v463_v56 = vld [vmem:[%s2066_s28 + $0x380] sm:$0xff]  ;;  %460 = vst [vmem:[%s2074_s29 + $0x1b0] sm:$0xff] %v459_v54  ;;  %462 = vst [vmem:[%s2074_s29 + $0x1b8] sm:$0xff] %v461_v55  ;;  %v465_v57 = vld [vmem:[%s2066_s28 + $0x390] sm:$0xff] }
  0x32   : > { %464 = vst [vmem:[%s2074_s29 + $0x1c0] sm:$0xff] %v463_v56  ;;  %v467_v58 = vld [vmem:[%s2066_s28 + $0x3a0] sm:$0xff]  ;;  %v469_v59 = vld [vmem:[%s2066_s28 + $0x3b0] sm:$0xff]  ;;  %466 = vst [vmem:[%s2074_s29 + $0x1c8] sm:$0xff] %v465_v57 }
  0x33   : > { %468 = vst [vmem:[%s2074_s29 + $0x1d0] sm:$0xff] %v467_v58  ;;  %470 = vst [vmem:[%s2074_s29 + $0x1d8] sm:$0xff] %v469_v59  ;;  %v471_v60 = vld [vmem:[%s2066_s28 + $0x3c0] sm:$0xff]  ;;  %v473_v61 = vld [vmem:[%s2066_s28 + $0x3d0] sm:$0xff] }
  0x34   : > { %v475_v62 = vld [vmem:[%s2066_s28 + $0x3e0] sm:$0xff]  ;;  %472 = vst [vmem:[%s2074_s29 + $0x1e0] sm:$0xff] %v471_v60  ;;  %474 = vst [vmem:[%s2074_s29 + $0x1e8] sm:$0xff] %v473_v61  ;;  %v477_v63 = vld [vmem:[%s2066_s28 + $0x3f0] sm:$0xff] }
  0x35   : > { %476 = vst [vmem:[%s2074_s29 + $0x1f0] sm:$0xff] %v475_v62  ;;  %v479_v0 = vld [vmem:[%s2066_s28 + $0x400] sm:$0xff]  ;;  %v481_v1 = vld [vmem:[%s2066_s28 + $0x410] sm:$0xff]  ;;  %478 = vst [vmem:[%s2074_s29 + $0x1f8] sm:$0xff] %v477_v63 }
  0x36   : > { %480 = vst [vmem:[%s2074_s29 + $0x200] sm:$0xff] %v479_v0  ;;  %482 = vst [vmem:[%s2074_s29 + $0x208] sm:$0xff] %v481_v1  ;;  %v483_v2 = vld [vmem:[%s2066_s28 + $0x420] sm:$0xff]  ;;  %v485_v3 = vld [vmem:[%s2066_s28 + $0x430] sm:$0xff] }
  0x37   : > { %v487_v4 = vld [vmem:[%s2066_s28 + $0x440] sm:$0xff]  ;;  %484 = vst [vmem:[%s2074_s29 + $0x210] sm:$0xff] %v483_v2  ;;  %486 = vst [vmem:[%s2074_s29 + $0x218] sm:$0xff] %v485_v3  ;;  %v489_v5 = vld [vmem:[%s2066_s28 + $0x450] sm:$0xff] }
  0x38   : > { %488 = vst [vmem:[%s2074_s29 + $0x220] sm:$0xff] %v487_v4  ;;  %v491_v6 = vld [vmem:[%s2066_s28 + $0x460] sm:$0xff]  ;;  %v493_v7 = vld [vmem:[%s2066_s28 + $0x470] sm:$0xff]  ;;  %490 = vst [vmem:[%s2074_s29 + $0x228] sm:$0xff] %v489_v5 }
  0x39   : > { %492 = vst [vmem:[%s2074_s29 + $0x230] sm:$0xff] %v491_v6  ;;  %494 = vst [vmem:[%s2074_s29 + $0x238] sm:$0xff] %v493_v7  ;;  %v495_v8 = vld [vmem:[%s2066_s28 + $0x480] sm:$0xff]  ;;  %v497_v9 = vld [vmem:[%s2066_s28 + $0x490] sm:$0xff] }
  0x3a   : > { %v499_v10 = vld [vmem:[%s2066_s28 + $0x4a0] sm:$0xff]  ;;  %496 = vst [vmem:[%s2074_s29 + $0x240] sm:$0xff] %v495_v8  ;;  %498 = vst [vmem:[%s2074_s29 + $0x248] sm:$0xff] %v497_v9  ;;  %v501_v11 = vld [vmem:[%s2066_s28 + $0x4b0] sm:$0xff] }
  0x3b   : > { %500 = vst [vmem:[%s2074_s29 + $0x250] sm:$0xff] %v499_v10  ;;  %v503_v12 = vld [vmem:[%s2066_s28 + $0x4c0] sm:$0xff]  ;;  %v505_v13 = vld [vmem:[%s2066_s28 + $0x4d0] sm:$0xff]  ;;  %502 = vst [vmem:[%s2074_s29 + $0x258] sm:$0xff] %v501_v11 }
  0x3c   : > { %504 = vst [vmem:[%s2074_s29 + $0x260] sm:$0xff] %v503_v12  ;;  %506 = vst [vmem:[%s2074_s29 + $0x268] sm:$0xff] %v505_v13  ;;  %v507_v14 = vld [vmem:[%s2066_s28 + $0x4e0] sm:$0xff]  ;;  %v509_v15 = vld [vmem:[%s2066_s28 + $0x4f0] sm:$0xff] }
  0x3d   : > { %508 = vst [vmem:[%s2074_s29 + $0x270] sm:$0xff] %v507_v14  ;;  %510 = vst [vmem:[%s2074_s29 + $0x278] sm:$0xff] %v509_v15 }
  0x3e PF: > { %p1592_p8 = scmp.ge.s32.totalorder %s1995_s16, 1  ;;  %p523_p9 = scmp.lt.s32.totalorder %s1995_s16, 3 }
  0x40   : > { %p524_p10 = pnand %p1592_p8, %p523_p9 }
  0x41   : > { %s530_s30 = sand.u32 (!%p524_p10), 1, %s1979_s12   ;;  %v1907_v16 = vld [vmem:[%s2470_s0 + $0x4] ss:$20 sps:$4 sm:$0xff] (!%p524_p10)   ;;  %v1910_v17 = vld [vmem:[%s2470_s0 + $0xc] ss:$20 sps:$4 sm:$0xff] (!%p524_p10)   ;;  %s1594_s11 = sshll.u32 (!%p524_p10), %s1987_s14, 1 }
  0x42   : > { %527 = sbr.rel (%p524_p10) target bundleno = 402 (0x192), region = 66  ;;  %1230 = vmatprep.mubr.bf16.mxu1 (!%p524_p10), %v1907_v16  ;;  %1303 = vmatprep.mubr.bf16.mxu0 (!%p524_p10), %v1910_v17  ;;  %p571_p11 = scmp.lt.s32.totalorder (!%p524_p10), %s1594_s11, 3 }
  0x43   : > { %s1767_s4 = smul.u32 (!%p524_p10), 640, %s530_s30  ;;  %s1593_s23 = sshll.u32 (!%p524_p10), %s530_s30, 7 }
  0x44   : > { %s2407_s12 = scalar_lea.vmem (!%p524_p10), [#allocation3], %s1593_s23 }
  0x45   : > { %s2241_s9 = scalar_lea.vmem (!%p524_p10), [#allocation2], %s1767_s4 }
  0x46   : > { %v1809_v18 = vld [vmem:[%s2241_s9 + $0x4] ss:$8 sps:$4 sm:$0xff] (!%p524_p10)   ;;  %v1813_v20 = vld [vmem:[%s2241_s9] ss:$8 sps:$4 sm:$0xff] (!%p524_p10)   ;;  %v1815_v22 = vld [vmem:[%s2241_s9 + $0x14] ss:$8 sps:$4 sm:$0xff] (!%p524_p10)  }
  0x47   : > { %v1811_v19 = vld [vmem:[%s2241_s9 + $0x104] ss:$8 sps:$4 sm:$0xff] (!%p524_p10)   ;;  %1198 = vmatprep.subr.bf16.mxu1 (!%p524_p10), %v1809_v18  ;;  %v1814_v21 = vld [vmem:[%s2241_s9 + $0x100] ss:$8 sps:$4 sm:$0xff] (!%p524_p10)   ;;  %v1817_v23 = vld [vmem:[%s2241_s9 + $0x114] ss:$8 sps:$4 sm:$0xff] (!%p524_p10)  }
  0x48   : > { %1271 = vmatprep.subr.bf16.mxu0 (!%p524_p10), %v1811_v19  ;;  %1199 = vmatpush1.bf16.msra.mxu1 (!%p524_p10), %v1813_v20  ;;  %v1819_v24 = vld [vmem:[%s2241_s9 + $0x10] ss:$8 sps:$4 sm:$0xff] (!%p524_p10)   ;;  %v1821_v26 = vld [vmem:[%s2241_s9 + $0x24] ss:$8 sps:$4 sm:$0xff] (!%p524_p10)   ;;  %v1825_v28 = vld [vmem:[%s2241_s9 + $0x20] ss:$8 sps:$4 sm:$0xff] (!%p524_p10)  }
  0x49   : > { %1272 = vmatpush1.bf16.msra.mxu0 %v1814_v21  ;;  %1200 = vmatprep.subr.bf16.mxu1 %v1815_v22  ;;  %v1820_v25 = vld [vmem:[%s2241_s9 + $0x110] ss:$8 sps:$4 sm:$0xff]   ;;  %v1823_v27 = vld [vmem:[%s2241_s9 + $0x124] ss:$8 sps:$4 sm:$0xff]   ;;  %v1826_v29 = vld [vmem:[%s2241_s9 + $0x120] ss:$8 sps:$4 sm:$0xff]  }
  0x4a   : > { %1273 = vmatprep.subr.bf16.mxu0 %v1817_v23  ;;  %v1827_v30 = vld [vmem:[%s2241_s9 + $0x34] ss:$8 sps:$4 sm:$0xff]   ;;  %v1831_v32 = vld [vmem:[%s2241_s9 + $0x30] ss:$8 sps:$4 sm:$0xff]   ;;  %v1833_v34 = vld [vmem:[%s2241_s9 + $0x44] ss:$8 sps:$4 sm:$0xff]  }
  0x4b   : > { %v1829_v31 = vld [vmem:[%s2241_s9 + $0x134] ss:$8 sps:$4 sm:$0xff]   ;;  %v1832_v33 = vld [vmem:[%s2241_s9 + $0x130] ss:$8 sps:$4 sm:$0xff]   ;;  %v1835_v35 = vld [vmem:[%s2241_s9 + $0x144] ss:$8 sps:$4 sm:$0xff]  }
  0x4c   : > { %1201 = vmatpush1.bf16.msra.mxu1 %v1819_v24  ;;  %v1837_v36 = vld [vmem:[%s2241_s9 + $0x40] ss:$8 sps:$4 sm:$0xff]   ;;  %v1839_v38 = vld [vmem:[%s2241_s9 + $0x54] ss:$8 sps:$4 sm:$0xff]   ;;  %v1843_v40 = vld [vmem:[%s2241_s9 + $0x50] ss:$8 sps:$4 sm:$0xff]  }
  0x4d   : > { %1274 = vmatpush1.bf16.msra.mxu0 %v1820_v25  ;;  %1202 = vmatprep.subr.bf16.mxu1 %v1821_v26  ;;  %v1838_v37 = vld [vmem:[%s2241_s9 + $0x140] ss:$8 sps:$4 sm:$0xff]   ;;  %v1841_v39 = vld [vmem:[%s2241_s9 + $0x154] ss:$8 sps:$4 sm:$0xff]   ;;  %v1844_v41 = vld [vmem:[%s2241_s9 + $0x150] ss:$8 sps:$4 sm:$0xff]  }
  0x4e   : > { %1275 = vmatprep.subr.bf16.mxu0 %v1823_v27  ;;  %v1845_v42 = vld [vmem:[%s2241_s9 + $0x64] ss:$8 sps:$4 sm:$0xff]   ;;  %v1849_v44 = vld [vmem:[%s2241_s9 + $0x60] ss:$8 sps:$4 sm:$0xff]   ;;  %v1851_v46 = vld [vmem:[%s2241_s9 + $0x74] ss:$8 sps:$4 sm:$0xff]  }
  0x4f   : > { %v1847_v43 = vld [vmem:[%s2241_s9 + $0x164] ss:$8 sps:$4 sm:$0xff]   ;;  %v1850_v45 = vld [vmem:[%s2241_s9 + $0x160] ss:$8 sps:$4 sm:$0xff]   ;;  %v1853_v47 = vld [vmem:[%s2241_s9 + $0x174] ss:$8 sps:$4 sm:$0xff]  }
  0x50   : > { %1203 = vmatpush1.bf16.msra.mxu1 %v1825_v28  ;;  %v1855_v48 = vld [vmem:[%s2241_s9 + $0x70] ss:$8 sps:$4 sm:$0xff]   ;;  %v1857_v50 = vld [vmem:[%s2241_s9 + $0x84] ss:$8 sps:$4 sm:$0xff]   ;;  %v1861_v52 = vld [vmem:[%s2241_s9 + $0x80] ss:$8 sps:$4 sm:$0xff]  }
  0x51   : > { %1276 = vmatpush1.bf16.msra.mxu0 %v1826_v29  ;;  %1204 = vmatprep.subr.bf16.mxu1 %v1827_v30  ;;  %v1856_v49 = vld [vmem:[%s2241_s9 + $0x170] ss:$8 sps:$4 sm:$0xff]   ;;  %v1859_v51 = vld [vmem:[%s2241_s9 + $0x184] ss:$8 sps:$4 sm:$0xff]   ;;  %v1862_v53 = vld [vmem:[%s2241_s9 + $0x180] ss:$8 sps:$4 sm:$0xff]  }
  0x52   : > { %1277 = vmatprep.subr.bf16.mxu0 %v1829_v31  ;;  %v1863_v54 = vld [vmem:[%s2241_s9 + $0x94] ss:$8 sps:$4 sm:$0xff]   ;;  %v1867_v56 = vld [vmem:[%s2241_s9 + $0x90] ss:$8 sps:$4 sm:$0xff]   ;;  %v1869_v58 = vld [vmem:[%s2241_s9 + $0xa4] ss:$8 sps:$4 sm:$0xff]  }
  0x53   : > { %v1865_v55 = vld [vmem:[%s2241_s9 + $0x194] ss:$8 sps:$4 sm:$0xff]   ;;  %v1868_v57 = vld [vmem:[%s2241_s9 + $0x190] ss:$8 sps:$4 sm:$0xff]   ;;  %v1871_v59 = vld [vmem:[%s2241_s9 + $0x1a4] ss:$8 sps:$4 sm:$0xff]  }
  0x54   : > { %1205 = vmatpush1.bf16.msra.mxu1 %v1831_v32  ;;  %v1873_v60 = vld [vmem:[%s2241_s9 + $0xa0] ss:$8 sps:$4 sm:$0xff]   ;;  %v1875_v62 = vld [vmem:[%s2241_s9 + $0xb4] ss:$8 sps:$4 sm:$0xff]   ;;  %v1879_v0 = vld [vmem:[%s2241_s9 + $0xb0] ss:$8 sps:$4 sm:$0xff]  }
  0x55   : > { %1278 = vmatpush1.bf16.msra.mxu0 %v1832_v33  ;;  %1206 = vmatprep.subr.bf16.mxu1 %v1833_v34  ;;  %v1874_v61 = vld [vmem:[%s2241_s9 + $0x1a0] ss:$8 sps:$4 sm:$0xff]   ;;  %v1877_v63 = vld [vmem:[%s2241_s9 + $0x1b4] ss:$8 sps:$4 sm:$0xff]   ;;  %v1880_v1 = vld [vmem:[%s2241_s9 + $0x1b0] ss:$8 sps:$4 sm:$0xff]  }
  0x56   : > { %1279 = vmatprep.subr.bf16.mxu0 %v1835_v35  ;;  %v1881_v2 = vld [vmem:[%s2241_s9 + $0xc4] ss:$8 sps:$4 sm:$0xff]   ;;  %v1885_v4 = vld [vmem:[%s2241_s9 + $0xc0] ss:$8 sps:$4 sm:$0xff]   ;;  %v1887_v6 = vld [vmem:[%s2241_s9 + $0xd4] ss:$8 sps:$4 sm:$0xff]  }
  0x57   : > { %v1883_v3 = vld [vmem:[%s2241_s9 + $0x1c4] ss:$8 sps:$4 sm:$0xff]   ;;  %v1886_v5 = vld [vmem:[%s2241_s9 + $0x1c0] ss:$8 sps:$4 sm:$0xff]   ;;  %v1889_v7 = vld [vmem:[%s2241_s9 + $0x1d4] ss:$8 sps:$4 sm:$0xff]  }
  0x58   : > { %1207 = vmatpush1.bf16.msra.mxu1 %v1837_v36  ;;  %v1891_v8 = vld [vmem:[%s2241_s9 + $0xd0] ss:$8 sps:$4 sm:$0xff]   ;;  %v1893_v10 = vld [vmem:[%s2241_s9 + $0xe4] ss:$8 sps:$4 sm:$0xff]   ;;  %v1897_v12 = vld [vmem:[%s2241_s9 + $0xe0] ss:$8 sps:$4 sm:$0xff]  }
  0x59   : > { %1280 = vmatpush1.bf16.msra.mxu0 %v1838_v37  ;;  %1208 = vmatprep.subr.bf16.mxu1 %v1839_v38  ;;  %v1892_v9 = vld [vmem:[%s2241_s9 + $0x1d0] ss:$8 sps:$4 sm:$0xff]   ;;  %v1895_v11 = vld [vmem:[%s2241_s9 + $0x1e4] ss:$8 sps:$4 sm:$0xff]   ;;  %v1898_v13 = vld [vmem:[%s2241_s9 + $0x1e0] ss:$8 sps:$4 sm:$0xff]  }
  0x5a   : > { %1281 = vmatprep.subr.bf16.mxu0 %v1841_v39  ;;  %v1899_v14 = vld [vmem:[%s2241_s9 + $0xf4] ss:$8 sps:$4 sm:$0xff]   ;;  %v1903_v16 = vld [vmem:[%s2241_s9 + $0xf0] ss:$8 sps:$4 sm:$0xff]   ;;  %v1913_v18 = vld [vmem:[%s2241_s9 + $0x204] ss:$8 sps:$4 sm:$0xff]  }
  0x5b   : > { %v1901_v15 = vld [vmem:[%s2241_s9 + $0x1f4] ss:$8 sps:$4 sm:$0xff]   ;;  %v1904_v17 = vld [vmem:[%s2241_s9 + $0x1f0] ss:$8 sps:$4 sm:$0xff]   ;;  %v1911_v21 = vld [vmem:[%s2241_s9 + $0x200] ss:$8 sps:$4 sm:$0xff]  }
  0x5c   : > { %1209 = vmatpush1.bf16.msra.mxu1 %v1843_v40  ;;  %v1905_v19 = vld [vmem:[%s2470_s0] ss:$20 sps:$4 sm:$0xff]   ;;  %v1908_v20 = vld [vmem:[%s2470_s0 + $0x8] ss:$20 sps:$4 sm:$0xff]   ;;  %v1914_v25 = vld [vmem:[%s2241_s9 + $0x210] ss:$8 sps:$4 sm:$0xff]  }
  0x5d   : > { %1282 = vmatpush1.bf16.msra.mxu0 %v1844_v41  ;;  %1210 = vmatprep.subr.bf16.mxu1 %v1845_v42  ;;  %v1916_v22 = vld [vmem:[%s2241_s9 + $0x214] ss:$8 sps:$4 sm:$0xff]   ;;  %v1917_v23 = vld [vmem:[%s2470_s0 + $0x2c] ss:$20 sps:$4 sm:$0xff]   ;;  %v1922_v28 = vld [vmem:[%s2470_s0 + $0x30] ss:$20 sps:$4 sm:$0xff]  }
  0x5e   : > { %1283 = vmatprep.subr.bf16.mxu0 %v1847_v43  ;;  %v1919_v24 = vld [vmem:[%s2470_s0 + $0x34] ss:$20 sps:$4 sm:$0xff]   ;;  %v1925_v26 = vld [vmem:[%s2241_s9 + $0x224] ss:$8 sps:$4 sm:$0xff]   ;;  %v1931_v32 = vld [vmem:[%s2470_s0 + $0x5c] ss:$20 sps:$4 sm:$0xff]  }
  0x5f   : > { %v1921_v27 = vld [vmem:[%s2470_s0 + $0x28] ss:$20 sps:$4 sm:$0xff]   ;;  %v1926_v33 = vld [vmem:[%s2241_s9 + $0x230] ss:$8 sps:$4 sm:$0xff]   ;;  %v1937_v34 = vld [vmem:[%s2241_s9 + $0x244] ss:$8 sps:$4 sm:$0xff]  }
  0x60   : > { %1211 = vmatpush1.bf16.msra.mxu1 %v1849_v44  ;;  %v1923_v29 = vld [vmem:[%s2241_s9 + $0x220] ss:$8 sps:$4 sm:$0xff]   ;;  %v1928_v30 = vld [vmem:[%s2241_s9 + $0x234] ss:$8 sps:$4 sm:$0xff]   ;;  %v1933_v35 = vld [vmem:[%s2470_s0 + $0x50] ss:$20 sps:$4 sm:$0xff]  }
  0x61   : > { %1284 = vmatpush1.bf16.msra.mxu0 %v1850_v45  ;;  %1212 = vmatprep.subr.bf16.mxu1 %v1851_v46  ;;  %v1929_v31 = vld [vmem:[%s2470_s0 + $0x54] ss:$20 sps:$4 sm:$0xff]   ;;  %v1934_v36 = vld [vmem:[%s2470_s0 + $0x58] ss:$20 sps:$4 sm:$0xff]   ;;  %v1941_v39 = vld [vmem:[%s2470_s0 + $0x7c] ss:$20 sps:$4 sm:$0xff]  }
  0x62   : > { %1285 = vmatprep.subr.bf16.mxu0 %v1853_v47  ;;  %v1935_v37 = vld [vmem:[%s2241_s9 + $0x240] ss:$8 sps:$4 sm:$0xff]   ;;  %v1940_v38 = vld [vmem:[%s2241_s9 + $0x254] ss:$8 sps:$4 sm:$0xff]   ;;  %v1943_v40 = vld [vmem:[%s2470_s0 + $0x84] ss:$20 sps:$4 sm:$0xff]  }
  0x63   : > { %v1938_v41 = vld [vmem:[%s2241_s9 + $0x250] ss:$8 sps:$4 sm:$0xff]   ;;  %v1949_v42 = vld [vmem:[%s2241_s9 + $0x264] ss:$8 sps:$4 sm:$0xff]   ;;  %v1946_v44 = vld [vmem:[%s2470_s0 + $0x80] ss:$20 sps:$4 sm:$0xff]  }
  0x64   : > { %1213 = vmatpush1.bf16.msra.mxu1 %v1855_v48  ;;  %v1945_v43 = vld [vmem:[%s2470_s0 + $0x78] ss:$20 sps:$4 sm:$0xff]   ;;  %v1947_v45 = vld [vmem:[%s2241_s9 + $0x260] ss:$8 sps:$4 sm:$0xff]   ;;  %v1952_v46 = vld [vmem:[%s2241_s9 + $0x274] ss:$8 sps:$4 sm:$0xff]  }
  0x65   : > { %1286 = vmatpush1.bf16.msra.mxu0 %v1856_v49  ;;  %1214 = vmatprep.subr.bf16.mxu1 %v1857_v50  ;;  %v1950_v47 = vld [vmem:[%s2241_s9 + $0x270] ss:$8 sps:$4 sm:$0xff]   ;;  %v1997_v48 = vmov 0   ;;  %v1954_v50 = vld [vmem:[%s2470_s0 + $0x60] ss:$20 sps:$4 sm:$0xff]   ;;  %s2482_s11 = smov (!%p571_p11, %s1594_s11), 3 }
  0x66   : > { %1287 = vmatprep.subr.bf16.mxu0 %v1859_v51  ;;  %v1953_v49 = vld [vmem:[%s2470_s0 + $0x10] ss:$20 sps:$4 sm:$0xff]   ;;  %v1955_v51 = vld [vmem:[%s2470_s0 + $0x38] ss:$20 sps:$4 sm:$0xff]   ;;  %s573_s20 = scalar_lea.vmem %s2472_s2, %s2482_s11  ;;  %s1701_s30 = sshll.u32 (%p2053_p6), %s1987_s14, 4 }
  0x67   : > { %s1445_s26 = scalar_lea.vmem (%p2053_p6), %s2473_s3, %s1701_s30 }
  0x68   : > { %1215 = vmatpush1.bf16.msra.mxu1 %v1861_v52  ;;  %v1956_v52 = vld [vmem:[%s2470_s0 + $0x88] ss:$20 sps:$4 sm:$0xff]  }
  0x69   : > { %1288 = vmatpush1.bf16.msra.mxu0 %v1862_v53  ;;  %1216 = vmatprep.subr.bf16.mxu1 %v1863_v54 }
  0x6a   : > { %1289 = vmatprep.subr.bf16.mxu0 %v1865_v55 }
  0x6c   : > { %1217 = vmatpush1.bf16.msra.mxu1 %v1867_v56  ;;  %v684_v56 = vlaneseq }
  0x6d   : > { %1290 = vmatpush1.bf16.msra.mxu0 %v1868_v57  ;;  %1218 = vmatprep.subr.bf16.mxu1 %v1869_v58 }
  0x6e   : > { %1291 = vmatprep.subr.bf16.mxu0 %v1871_v59  ;;  %v685_v58 = vshrl.u32 %v684_v56, 7 }
  0x70   : > { %1219 = vmatpush1.bf16.msra.mxu1 %v1873_v60 }
  0x71   : > { %1292 = vmatpush1.bf16.msra.mxu0 %v1874_v61  ;;  %1220 = vmatprep.subr.bf16.mxu1 %v1875_v62  ;;  %v686_v62 = vsub.s32 0, %v685_v58 }
  0x72   : > { %1293 = vmatprep.subr.bf16.mxu0 %v1877_v63 }
  0x74   : > { %1221 = vmatpush1.bf16.msra.mxu1 %v1879_v0  ;;  %v682_v0 = vld [vmem:[%s573_s20] sm:$0x3] }
  0x75   : > { %1294 = vmatpush1.bf16.msra.mxu0 %v1880_v1  ;;  %1222 = vmatprep.subr.bf16.mxu1 %v1881_v2  ;;  %v690_v1 = vsub.s32 1, %v685_v58  ;;  %v2389_v2 = vrot.slane %v682_v0, %v686_v62 }
  0x76   : > { %1295 = vmatprep.subr.bf16.mxu0 %v1883_v3 }
  0x77   : > { %v2391_v3 = vrot.slane %v682_v0, %v690_v1 }
  0x78   : > { %1223 = vmatpush1.bf16.msra.mxu1 %v1885_v4 }
  0x79   : > { %1296 = vmatpush1.bf16.msra.mxu0 %v1886_v5  ;;  %1224 = vmatprep.subr.bf16.mxu1 %v1887_v6 }
  0x7a   : > { %1297 = vmatprep.subr.bf16.mxu0 %v1889_v7 }
  0x7c   : > { %1225 = vmatpush1.bf16.msra.mxu1 %v1891_v8 }
  0x7d   : > { %1298 = vmatpush1.bf16.msra.mxu0 %v1892_v9  ;;  %1226 = vmatprep.subr.bf16.mxu1 %v1893_v10 }
  0x7e   : > { %1299 = vmatprep.subr.bf16.mxu0 %v1895_v11 }
  0x80   : > { %1227 = vmatpush1.bf16.msra.mxu1 %v1897_v12 }
  0x81   : > { %1300 = vmatpush1.bf16.msra.mxu0 %v1898_v13  ;;  %1228 = vmatprep.subr.bf16.mxu1 %v1899_v14 }
  0x82   : > { %1301 = vmatprep.subr.bf16.mxu0 %v1901_v15 }
  0x84   : > { %1229 = vmatpush1.bf16.msra.mxu1 %v1903_v16 }
  0x85   : > { %1302 = vmatpush1.bf16.msra.mxu0 %v1904_v17  ;;  %1702 = vmatprep.subr.bf16.mxu1 %v1913_v18 }
  0x86   : > { %1344 = vmatprep.subr.bf16.mxu0 %v1913_v18 }
  0x87   : > { %1231 = vmatmul.mubr.bf16.vlgmr.msra.gmra.mrb[0].mxu1 %v1905_v19 }
  0x88   : > { %1304 = vmatmul.mubr.bf16.vlgmr.msra.gmra.mrb[0].mxu0 %v1908_v20  ;;  %1710 = vmatpush1.bf16.msra.mxu1 %v1911_v21 }
  0x89   : > { %1345 = vmatpush1.bf16.msra.mxu0 %v1911_v21  ;;  %1703 = vmatprep.subr.bf16.mxu1 %v1916_v22 }
  0x8a   : > { %1346 = vmatprep.subr.bf16.mxu0 %v1916_v22  ;;  %1240 = vmatprep.mubr.bf16.mxu1 %v1917_v23 }
  0x8b   : > { %1313 = vmatprep.mubr.bf16.mxu0 %v1919_v24 }
  0x8c   : > { %1711 = vmatpush1.bf16.msra.mxu1 %v1914_v25 }
  0x8d   : > { %1347 = vmatpush1.bf16.msra.mxu0 %v1914_v25  ;;  %1704 = vmatprep.subr.bf16.mxu1 %v1925_v26 }
  0x8e   : > { %1348 = vmatprep.subr.bf16.mxu0 %v1925_v26 }
  0x8f   : > { %1241 = vmatmul.mubr.bf16.gmra.mrb[4].mxu1 %v1921_v27 }
  0x90   : > { %1314 = vmatmul.mubr.bf16.gmra.mrb[4].mxu0 %v1922_v28  ;;  %1712 = vmatpush1.bf16.msra.mxu1 %v1923_v29 }
  0x91   : > { %1349 = vmatpush1.bf16.msra.mxu0 %v1923_v29  ;;  %1705 = vmatprep.subr.bf16.mxu1 %v1928_v30 }
  0x92   : > { %1350 = vmatprep.subr.bf16.mxu0 %v1928_v30  ;;  %1250 = vmatprep.mubr.bf16.mxu1 %v1929_v31 }
  0x93   : > { %1323 = vmatprep.mubr.bf16.mxu0 %v1931_v32 }
  0x94   : > { %1713 = vmatpush1.bf16.msra.mxu1 %v1926_v33 }
  0x95   : > { %1351 = vmatpush1.bf16.msra.mxu0 %v1926_v33  ;;  %1706 = vmatprep.subr.bf16.mxu1 %v1937_v34 }
  0x96   : > { %1352 = vmatprep.subr.bf16.mxu0 %v1937_v34 }
  0x97   : > { %1251 = vmatmul.mubr.bf16.gmra.mrb[8].mxu1 %v1933_v35 }
  0x98   : > { %1324 = vmatmul.mubr.bf16.gmra.mrb[8].mxu0 %v1934_v36  ;;  %1714 = vmatpush1.bf16.msra.mxu1 %v1935_v37 }
  0x99   : > { %1353 = vmatpush1.bf16.msra.mxu0 %v1935_v37  ;;  %1707 = vmatprep.subr.bf16.mxu1 %v1940_v38 }
  0x9a   : > { %1354 = vmatprep.subr.bf16.mxu0 %v1940_v38  ;;  %1260 = vmatprep.mubr.bf16.mxu1 %v1941_v39 }
  0x9b   : > { %1333 = vmatprep.mubr.bf16.mxu0 %v1943_v40 }
  0x9c   : > { %1715 = vmatpush1.bf16.msra.mxu1 %v1938_v41 }
  0x9d   : > { %1355 = vmatpush1.bf16.msra.mxu0 %v1938_v41  ;;  %1708 = vmatprep.subr.bf16.mxu1 %v1949_v42 }
  0x9e   : > { %1356 = vmatprep.subr.bf16.mxu0 %v1949_v42 }
  0x9f   : > { %1261 = vmatmul.mubr.bf16.gmra.mrb[12].mxu1 %v1945_v43 }
  0xa0   : > { %1334 = vmatmul.mubr.bf16.gmra.mrb[12].mxu0 %v1946_v44  ;;  %1716 = vmatpush1.bf16.msra.mxu1 %v1947_v45 }
  0xa1   : > { %1357 = vmatpush1.bf16.msra.mxu0 %v1947_v45  ;;  %1709 = vmatprep.subr.bf16.mxu1 %v1952_v46 }
  0xa2   : > { %1358 = vmatprep.subr.bf16.mxu0 %v1952_v46  ;;  %1376 = vmatprep.mubr.bf16.mxu0 %v1997_v48 }
  0xa3   : > { %1396 = vmatprep.mubr.bf16.mxu1 %v1997_v48 }
  0xa4   : > { %1717 = vmatpush1.bf16.msra.mxu1 %v1950_v47 }
  0xa5   : > { %1359 = vmatpush1.bf16.msra.mxu0 %v1950_v47 }
  0xa7   : > { %1397 = vmatmul.mubr.bf16.vlgmr.msra.gmra.mrb[16].mxu1 %v1954_v50 }
  0xa8   : > { %1377 = vmatmul.mubr.bf16.vlgmr.msra.gmra.mrb[0].mxu0 %v1953_v49  ;;  %1406 = vmatprep.mubr.bf16.mxu1 %v1997_v48 }
  0xa9   : > { %1386 = vmatprep.mubr.bf16.mxu0 %v1997_v48 }
  0xaf   : > { %1407 = vmatmul.mubr.bf16.gmra.mrb[20].mxu1 %v1956_v52 }
  0xb0   : > { %1387 = vmatmul.mubr.bf16.gmra.mrb[4].mxu0 %v1955_v51 }
 0x15a   : > { %v1232_v53 = vpop.f32.mrb[0].mxu1 }
 0x15b   : > { %v1234_v54 = vpop.f32.mrb[1].mxu1  ;;  %v1233_v36 = vadd.f32 %v1232_v53, %v2389_v2 }
 0x15c   : > { %v1236_v55 = vpop.f32.mrb[2].mxu1  ;;  %v1235_v37 = vadd.f32 %v1234_v54, %v2391_v3 }
 0x15d   : > { %v1238_v57 = vpop.f32.mrb[3].mxu1  ;;  %v1237_v40 = vadd.f32 %v1236_v55, %v2389_v2 }
 0x15e   : > { %v1239_v45 = vadd.f32 %v1238_v57, %v2391_v3 }
 0x162   : > { %v2378_v59 = vpop.f32.mrb[4].mxu1 }
 0x163   : > { %v2383_v60 = vpop.f32.mrb[5].mxu1  ;;  %v1243_v56 = vadd.f32 %v2378_v59, %v2389_v2 }
 0x164   : > { %v2385_v61 = vpop.f32.mrb[6].mxu1  ;;  %v1245_v57 = vadd.f32 %v2383_v60, %v2391_v3 }
 0x165   : > { %v2387_v63 = vpop.f32.mrb[7].mxu1  ;;  %v1247_v0 = vadd.f32 %v2385_v61, %v2389_v2 }
 0x16a   : > { %v1252_v4 = vpop.f32.mrb[8].mxu1 }
 0x16b   : > { %v1325_v5 = vpop.f32.mrb[8].mxu0  ;;  %v1253_v6 = vadd.f32 %v1252_v4, %v2389_v2  ;;  %v1254_v7 = vpop.f32.mrb[9].mxu1 }
 0x16c   : > { %v1327_v8 = vpop.f32.mrb[9].mxu0  ;;  %v1255_v9 = vadd.f32 %v1254_v7, %v2391_v3  ;;  %v1256_v10 = vpop.f32.mrb[10].mxu1  ;;  %v1249_v7 = vadd.f32 %v2387_v63, %v2391_v3 }
 0x16d   : > { %v1329_v11 = vpop.f32.mrb[10].mxu0  ;;  %v1326_v12 = vadd.f32 %v1325_v5, %v1253_v6  ;;  %v1257_v13 = vadd.f32 %v1256_v10, %v2389_v2  ;;  %v1258_v14 = vpop.f32.mrb[11].mxu1 }
 0x16e   : > { %v1331_v15 = vpop.f32.mrb[11].mxu0  ;;  %v1328_v16 = vadd.f32 %v1327_v8, %v1255_v9  ;;  %v1259_v17 = vadd.f32 %v1258_v14, %v2391_v3 }
 0x16f   : > { %v1330_v18 = vadd.f32 %v1329_v11, %v1257_v13 }
 0x170   : > { %v1332_v19 = vadd.f32 %v1331_v15, %v1259_v17 }
 0x172   : > { %v1262_v20 = vpop.f32.mrb[12].mxu1 }
 0x173   : > { %v1335_v21 = vpop.f32.mrb[12].mxu0  ;;  %v1263_v22 = vadd.f32 %v1262_v20, %v2389_v2  ;;  %v1264_v23 = vpop.f32.mrb[13].mxu1 }
 0x174   : > { %v1337_v24 = vpop.f32.mrb[13].mxu0  ;;  %v1265_v25 = vadd.f32 %v1264_v23, %v2391_v3  ;;  %v1266_v26 = vpop.f32.mrb[14].mxu1 }
 0x175   : > { %v1339_v27 = vpop.f32.mrb[14].mxu0  ;;  %v1336_v28 = vadd.f32 %v1335_v21, %v1263_v22  ;;  %v1267_v29 = vadd.f32 %v1266_v26, %v2389_v2  ;;  %v1268_v30 = vpop.f32.mrb[15].mxu1 }
 0x176   : > { %v1341_v31 = vpop.f32.mrb[15].mxu0  ;;  %v1338_v32 = vadd.f32 %v1337_v24, %v1265_v25  ;;  %v1269_v33 = vadd.f32 %v1268_v30, %v2391_v3 }
 0x177   : > { %v1340_v34 = vadd.f32 %v1339_v27, %v1267_v29 }
 0x178   : > { %v1342_v35 = vadd.f32 %v1341_v31, %v1269_v33 }
 0x17a   : > { %v1398_v39 = vpop.f32.mrb[16].mxu1 }
 0x17b   : > { %v1378_v38 = vpop.f32.mrb[0].mxu0  ;;  %v1399_v42 = vadd.f32 %v1398_v39, %v1326_v12  ;;  %v1400_v44 = vpop.f32.mrb[17].mxu1 }
 0x17c   : > { %v1719_v41 = vadd.f32 %v1378_v38, %v1233_v36  ;;  %v1380_v43 = vpop.f32.mrb[1].mxu0  ;;  %v1401_v47 = vadd.f32 %v1400_v44, %v1328_v16  ;;  %v1402_v49 = vpop.f32.mrb[18].mxu1 }
 0x17d   : > { %v1721_v46 = vadd.f32 %v1380_v43, %v1235_v37  ;;  %v1382_v48 = vpop.f32.mrb[2].mxu0  ;;  %1425 = vst [vmem:[%s2407_s12 + $0x40] sm:$0xff] %v1399_v42  ;;  %v1403_v51 = vadd.f32 %v1402_v49, %v1330_v18  ;;  %v1404_v53 = vpop.f32.mrb[19].mxu1 }
 0x17e   : > { %1417 = vst [vmem:[%s2407_s12] sm:$0xff] %v1719_v41  ;;  %v1723_v50 = vadd.f32 %v1382_v48, %v1237_v40  ;;  %v1384_v52 = vpop.f32.mrb[3].mxu0  ;;  %1426 = vst [vmem:[%s2407_s12 + $0x48] sm:$0xff] %v1401_v47  ;;  %v1405_v55 = vadd.f32 %v1404_v53, %v1332_v19 }
 0x17f   : > { %1418 = vst [vmem:[%s2407_s12 + $0x8] sm:$0xff] %v1721_v46  ;;  %v1725_v54 = vadd.f32 %v1384_v52, %v1239_v45  ;;  %1427 = vst [vmem:[%s2407_s12 + $0x50] sm:$0xff] %v1403_v51 }
 0x180   : > { %1419 = vst [vmem:[%s2407_s12 + $0x10] sm:$0xff] %v1723_v50  ;;  %1428 = vst [vmem:[%s2407_s12 + $0x58] sm:$0xff] %v1405_v55 }
 0x181   : > { %1420 = vst [vmem:[%s2407_s12 + $0x18] sm:$0xff] %v1725_v54 }
 0x182   : > { %v1408_v62 = vpop.f32.mrb[20].mxu1 }
 0x183   : > { %v1388_v58 = vpop.f32.mrb[4].mxu0  ;;  %v1409_v4 = vadd.f32 %v1408_v62, %v1336_v28  ;;  %v1410_v6 = vpop.f32.mrb[21].mxu1  ;;  %1439 = sbr.rel (!%p2053_p6) target bundleno = 402 (0x192), region = 74 }
 0x184   : > { %v1727_v1 = vadd.f32 %v1388_v58, %v1243_v56  ;;  %v1390_v5 = vpop.f32.mrb[5].mxu0  ;;  %v1411_v8 = vadd.f32 %v1410_v6, %v1338_v32  ;;  %v1412_v9 = vpop.f32.mrb[22].mxu1  ;;  %v1474_v20 = vld [vmem:[%s2407_s12 + $0x40] sm:$0xff] (%p2053_p6) }
 0x185   : > { %v1729_v59 = vadd.f32 %v1390_v5, %v1245_v57  ;;  %v1392_v60 = vpop.f32.mrb[6].mxu0  ;;  %1429 = vst [vmem:[%s2407_s12 + $0x60] sm:$0xff] %v1409_v4  ;;  %v1413_v2 = vadd.f32 %v1412_v9, %v1340_v34  ;;  %v1414_v11 = vpop.f32.mrb[23].mxu1  ;;  %v1458_v63 = vld [vmem:[%s2407_s12] sm:$0xff] (%p2053_p6)  ;;  %1475 = vst [vmem:[%s1445_s26 + $0x80] sm:$0xff] (%p2053_p6), %v1474_v20  ;;  %v1476_v21 = vld [vmem:[%s2407_s12 + $0x48] sm:$0xff] (%p2053_p6) }
 0x186   : > { %1421 = vst [vmem:[%s2407_s12 + $0x20] sm:$0xff] %v1727_v1  ;;  %v1731_v61 = vadd.f32 %v1392_v60, %v1247_v0  ;;  %v1394_v10 = vpop.f32.mrb[7].mxu0  ;;  %1430 = vst [vmem:[%s2407_s12 + $0x68] sm:$0xff] %v1411_v8  ;;  %v1415_v13 = vadd.f32 %v1414_v11, %v1342_v35  ;;  %v1460_v3 = vld [vmem:[%s2407_s12 + $0x8] sm:$0xff] (%p2053_p6)  ;;  %v1478_v22 = vld [vmem:[%s2407_s12 + $0x50] sm:$0xff] (%p2053_p6) }
 0x187   : > { %1422 = vst [vmem:[%s2407_s12 + $0x28] sm:$0xff] %v1729_v59  ;;  %v1733_v12 = vadd.f32 %v1394_v10, %v1249_v7  ;;  %1431 = vst [vmem:[%s2407_s12 + $0x70] sm:$0xff] %v1413_v2  ;;  %v1462_v14 = vld [vmem:[%s2407_s12 + $0x10] sm:$0xff] (%p2053_p6)  ;;  %v1480_v23 = vld [vmem:[%s2407_s12 + $0x58] sm:$0xff] (%p2053_p6) }
 0x188   : > { %1423 = vst [vmem:[%s2407_s12 + $0x30] sm:$0xff] %v1731_v61  ;;  %1432 = vst [vmem:[%s2407_s12 + $0x78] sm:$0xff] %v1415_v13  ;;  %v1464_v15 = vld [vmem:[%s2407_s12 + $0x18] sm:$0xff] (%p2053_p6) }
 0x189   : > { %1424 = vst [vmem:[%s2407_s12 + $0x38] sm:$0xff] %v1733_v12  ;;  %1459 = vst [vmem:[%s1445_s26] sm:$0xff] (%p2053_p6), %v1458_v63 }
 0x18a   : > { %1461 = vst [vmem:[%s1445_s26 + $0x8] sm:$0xff] %v1460_v3  ;;  %1463 = vst [vmem:[%s1445_s26 + $0x20] sm:$0xff] %v1462_v14 }
 0x18b   : > { %1465 = vst [vmem:[%s1445_s26 + $0x28] sm:$0xff] %v1464_v15  ;;  %1477 = vst [vmem:[%s1445_s26 + $0x88] sm:$0xff] %v1476_v21 }
 0x18c   : > { %1479 = vst [vmem:[%s1445_s26 + $0xa0] sm:$0xff] %v1478_v22  ;;  %1481 = vst [vmem:[%s1445_s26 + $0xa8] sm:$0xff] %v1480_v23  ;;  %v1482_v24 = vld [vmem:[%s2407_s12 + $0x60] sm:$0xff] }
 0x18d   : > { %v1466_v16 = vld [vmem:[%s2407_s12 + $0x20] sm:$0xff]  ;;  %v1484_v25 = vld [vmem:[%s2407_s12 + $0x68] sm:$0xff]  ;;  %1483 = vst [vmem:[%s1445_s26 + $0xc0] sm:$0xff] %v1482_v24 }
 0x18e   : > { %v1468_v17 = vld [vmem:[%s2407_s12 + $0x28] sm:$0xff]  ;;  %1467 = vst [vmem:[%s1445_s26 + $0x40] sm:$0xff] %v1466_v16  ;;  %v1486_v26 = vld [vmem:[%s2407_s12 + $0x70] sm:$0xff]  ;;  %1485 = vst [vmem:[%s1445_s26 + $0xc8] sm:$0xff] %v1484_v25 }
 0x18f   : > { %1469 = vst [vmem:[%s1445_s26 + $0x48] sm:$0xff] %v1468_v17  ;;  %v1470_v18 = vld [vmem:[%s2407_s12 + $0x30] sm:$0xff]  ;;  %1487 = vst [vmem:[%s1445_s26 + $0xe0] sm:$0xff] %v1486_v26  ;;  %v1488_v27 = vld [vmem:[%s2407_s12 + $0x78] sm:$0xff] }
 0x190   : > { %v1472_v19 = vld [vmem:[%s2407_s12 + $0x38] sm:$0xff]  ;;  %1471 = vst [vmem:[%s1445_s26 + $0x60] sm:$0xff] %v1470_v18  ;;  %1489 = vst [vmem:[%s1445_s26 + $0xe8] sm:$0xff] %v1488_v27 }
 0x191   : > { %1473 = vst [vmem:[%s1445_s26 + $0x68] sm:$0xff] %v1472_v19 }
 0x192 PF: > { %s13_s16 = sadd.s32 1, %s1995_s16   ;;  %s2475_s12 = smov %s1983_s13 }
 0x193   : > { %p10_p12 = scmp.ge.s32.totalorder %s13_s16, 4   ;;  %s2476_s13 = smov %s2058_s22 }
 0x194   : > { %s2477_s14 = smov %s1991_s15  ;;  %s2478_s15 = smov %s2480_s17 }
 0x195   :  { %12 = sbr.rel (!%p10_p12) target bundleno = 3 (0x3), region = 134 }

// kernel: _vision_forward_impl.7
= control target key start
LH: loop header
LB: loop body
LE: loop exit
PB: predicated region body
PF: predicated region fallthrough
CT: control target
= control target key end

     0   :  { %14 = vsyncpa [#allocation5], 0  ;;  %s7322_s0 = inlined_call_operand.vmem [shape: f32[2,32,512], index: 0, kind: input, shape index: {}]   ;;  %s7323_s1 = inlined_call_operand.vmem [shape: f32[2,32,1], index: 1, kind: input, shape index: {}]   ;;  %s7324_s2 = inlined_call_operand.vmem [shape: f32[128,128], index: 2, kind: input, shape index: {}]   ;;  %s7325_s3 = inlined_call_operand.vmem [shape: f32[128,128], index: 3, kind: input, shape index: {}]   ;;  %s7326_s4 = inlined_call_operand.vmem [shape: bf16[9,32,128], index: 4, kind: input, shape index: {}]   ;;  %s7327_s5 = inlined_call_operand.vmem [shape: bf16[9,128,512], index: 5, kind: input, shape index: {}]   ;;  %s7328_s6 = inlined_call_operand.hbm [shape: f32[2,32,128], index: 6, kind: output, shape index: {0}]   ;;  %s7329_s7 = inlined_call_operand.hbm [shape: f32[32,128], index: 7, kind: output, shape index: {1}]   ;;  %s7330_s8 = inlined_call_operand.hbm [shape: f32[32,128], index: 8, kind: output, shape index: {2}]  }
   0x1   :  { %16 = vsyncpa [#allocation5 + $0x1], 0 }
   0x2   :  { %17 = vsyncpa [#allocation7], 0  ;;  %s5922_s27 = smov 0   ;;  %s5924_s28 = smov 0  }
   0x3   :  { %s5926_s29 = smov 0   ;;  %s5928_s30 = smov 0  }
   0x4 LB: > { %s5943_s9 = sadd.s32 4294967295, %s5869_s30   ;;  %s4153_s10 = sadd.s32 4294967294, %s5869_s30   ;;  %s5869_s30 = sphi %s5928_s30, %s7340_s30   ;;  %s5865_s29 = sphi %s5926_s29, %s7339_s29   ;;  %s5861_s28 = sphi %s5924_s28, %s7338_s28   ;;  %s5857_s27 = sphi %s5922_s27, %s7337_s27  }
   0x5   : > { %s5947_s11 = sadd.s32 1, %s5869_s30   ;;  %s166_s12 = sadd.s32 1, %s5865_s29 }
   0x6   : > { %s163_s13 = ssub.s32 %s5869_s30, %s5947_s11  ;;  %p176_p0 = scmp.ne.s32.totalorder %s5865_s29, %s5861_s28 }
   0x7   : > { %p164_p1 = scmp.eq.s32.totalorder %s163_s13, 0  ;;  %p177_p2 = scmp.eq.s32.totalorder %s5943_s9, 1 }
   0x8   : > { %p182_p3 = scmp.ne.s32.totalorder %s5861_s28, %s5857_s27  ;;  %p183_p4 = scmp.eq.s32.totalorder %s4153_s10, 1 }
   0x9   : > { %s5958_s14 = scalar_select %p164_p1, %s5865_s29, %s166_s12  }
   0xa   : > { %p5962_p5 = por %p177_p2, %p176_p0  ;;  %p5966_p6 = por %p183_p4, %p182_p3 }
   0xb   : > { %7332 = sst [smem:[#allocation11_spill]] %s5958_s14  ;;  %p4156_p7 = scmp.ge.s32.totalorder %s5869_s30, 1 }
   0xc   : > { %p271_p8 = scmp.lt.s32.totalorder %s5869_s30, 3 }
   0xe   : > { %p272_p9 = pnand %p4156_p7, %p271_p8 }
   0xf   : > { %s7331_s17 = sand.u32 (!%p272_p9), 1, %s5861_s28   ;;  %p310_p10 = scmp.lt.s32.totalorder (!%p272_p9), %s5943_s9, 1 }
  0x10   : > { %275 = sbr.rel (%p272_p9) target bundleno = 2533 (0x9e5), region = 44  ;;  %s4157_s18 = sshll.u32 (!%p272_p9), %s7331_s17, 5 }
  0x11   : > { %s5987_s12 = scalar_lea.vmem (!%p272_p9), [#allocation4], %s4157_s18  ;;  %p4162_p11 = scmp.ne.s32.totalorder (!%p272_p9), %s5943_s9, 0 }
  0x17   : > { %s311_s19 = scalar_select %p310_p10, %s5943_s9, 1 }
  0x18   : > { %324 = sbr.rel (%p4162_p11) target bundleno = 35 (0x23), region = 48  ;;  %v325_v0 = vld [vmem:[%s7324_s2] sm:$0xff] (!%p4162_p11)  ;;  %v326_v1 = vld [vmem:[%s7324_s2 + $0x8] sm:$0xff] (!%p4162_p11)  ;;  %v327_v2 = vld [vmem:[%s7324_s2 + $0x10] sm:$0xff] (!%p4162_p11) }
  0x19   : > { %s4778_s20 = sshll.u32 %s311_s19, 7  ;;  %s4779_s21 = sshll.u32 %s311_s19, 5  ;;  %341 = vst [vmem:[#allocation2] sm:$0xff] (!%p4162_p11), %v325_v0  ;;  %342 = vst [vmem:[#allocation2 + $0x8] sm:$0xff] (!%p4162_p11), %v326_v1  ;;  %v328_v3 = vld [vmem:[%s7324_s2 + $0x18] sm:$0xff] (!%p4162_p11)  ;;  %v329_v4 = vld [vmem:[%s7324_s2 + $0x20] sm:$0xff] (!%p4162_p11) }
  0x1a   : > { %s5980_s24 = scalar_lea.vmem %s7322_s0, %s4778_s20  ;;  %s5985_s10 = scalar_lea.vmem %s7323_s1, %s4779_s21  ;;  %343 = vst [vmem:[#allocation2 + $0x10] sm:$0xff] (!%p4162_p11), %v327_v2  ;;  %v330_v5 = vld [vmem:[%s7324_s2 + $0x28] sm:$0xff] (!%p4162_p11)  ;;  %344 = vst [vmem:[#allocation2 + $0x18] sm:$0xff] (!%p4162_p11), %v328_v3  ;;  %v331_v6 = vld [vmem:[%s7324_s2 + $0x30] sm:$0xff] (!%p4162_p11) }
  0x1b   : > { %345 = vst [vmem:[#allocation2 + $0x20] sm:$0xff] (!%p4162_p11), %v329_v4  ;;  %346 = vst [vmem:[#allocation2 + $0x28] sm:$0xff] (!%p4162_p11), %v330_v5  ;;  %v332_v7 = vld [vmem:[%s7324_s2 + $0x38] sm:$0xff] (!%p4162_p11)  ;;  %v333_v8 = vld [vmem:[%s7324_s2 + $0x40] sm:$0xff] (!%p4162_p11) }
  0x1c   : > { %347 = vst [vmem:[#allocation2 + $0x30] sm:$0xff] (!%p4162_p11), %v331_v6  ;;  %348 = vst [vmem:[#allocation2 + $0x38] sm:$0xff] (!%p4162_p11), %v332_v7  ;;  %v334_v9 = vld [vmem:[%s7324_s2 + $0x48] sm:$0xff] (!%p4162_p11)  ;;  %v335_v10 = vld [vmem:[%s7324_s2 + $0x50] sm:$0xff] (!%p4162_p11) }
  0x1d   : > { %349 = vst [vmem:[#allocation2 + $0x40] sm:$0xff] (!%p4162_p11), %v333_v8  ;;  %v336_v11 = vld [vmem:[%s7324_s2 + $0x58] sm:$0xff] (!%p4162_p11)  ;;  %350 = vst [vmem:[#allocation2 + $0x48] sm:$0xff] (!%p4162_p11), %v334_v9  ;;  %v337_v12 = vld [vmem:[%s7324_s2 + $0x60] sm:$0xff] (!%p4162_p11) }
  0x1e   : > { %351 = vst [vmem:[#allocation2 + $0x50] sm:$0xff] (!%p4162_p11), %v335_v10  ;;  %352 = vst [vmem:[#allocation2 + $0x58] sm:$0xff] (!%p4162_p11), %v336_v11  ;;  %v338_v13 = vld [vmem:[%s7324_s2 + $0x68] sm:$0xff] (!%p4162_p11)  ;;  %v339_v14 = vld [vmem:[%s7324_s2 + $0x70] sm:$0xff] (!%p4162_p11) }
  0x1f   : > { %353 = vst [vmem:[#allocation2 + $0x60] sm:$0xff] %v337_v12  ;;  %354 = vst [vmem:[#allocation2 + $0x68] sm:$0xff] %v338_v13  ;;  %v340_v15 = vld [vmem:[%s7324_s2 + $0x78] sm:$0xff]  ;;  %v357_v16 = vld [vmem:[%s7325_s3] sm:$0xff] }
  0x20   : > { %355 = vst [vmem:[#allocation2 + $0x70] sm:$0xff] %v339_v14  ;;  %v358_v17 = vld [vmem:[%s7325_s3 + $0x8] sm:$0xff]  ;;  %356 = vst [vmem:[#allocation2 + $0x78] sm:$0xff] %v340_v15  ;;  %v359_v18 = vld [vmem:[%s7325_s3 + $0x10] sm:$0xff] }
  0x21   : > { %373 = vst [vmem:[#allocation3] sm:$0xff] %v357_v16  ;;  %374 = vst [vmem:[#allocation3 + $0x8] sm:$0xff] %v358_v17  ;;  %v360_v19 = vld [vmem:[%s7325_s3 + $0x18] sm:$0xff] }
  0x22   : > { %375 = vst [vmem:[#allocation3 + $0x10] sm:$0xff] %v359_v18  ;;  %376 = vst [vmem:[#allocation3 + $0x18] sm:$0xff] %v360_v19 }
  0x23 PF: > { %v391_v20 = vld [vmem:[%s5985_s10 + $0x10] sm:$0xff]  ;;  %v389_v21 = vld [vmem:[%s5985_s10] sm:$0xff]  ;;  %v5871_v22 = vmov 0   ;;  %v392_v23 = vld [vmem:[%s5985_s10 + $0x18] sm:$0xff]  ;;  %s4780_s23 = sshll.u32 %s5943_s9, 9  ;;  %s4032_s25 = sshll.u32 %s5987_s12, 4  ;;  %s7220_s25 = int_to_ptr.vmem [resolvable:$true] %s4032_s25 }
  0x24   : > { %5236 = vset.pattern.permute.xlu1 %v5871_v22  ;;  %5235 = vset.pattern.permute.xlu0 %v5871_v22  ;;  %v390_v24 = vld [vmem:[%s5985_s10 + $0x8] sm:$0xff]  ;;  %v5237_v25 = vld [vmem:[%s7326_s4 + $0x10] sm:$0xff]   ;;  %v5239_v26 = vld [vmem:[%s7326_s4] sm:$0xff]   ;;  %s5873_s17 = smov [#allocation8]   ;;  %s7218_s13 = scalar_lea.hbm %s7328_s6, %s4780_s23 }
  0x25   : > { %409 = vperm.xlu1 %5236, %v391_v20   ;;  %399 = vperm.xlu0 %5235, %v389_v21   ;;  %v395_v29 = vld [vmem:[#allocation2 + $0x10] sm:$0xff]  ;;  %v393_v30 = vld [vmem:[#allocation2] sm:$0xff]  ;;  %v396_v31 = vld [vmem:[#allocation2 + $0x18] sm:$0xff]  ;;  %s4058_s10 = sshll.u32 %s5873_s17, 4  ;;  %s7223_s10 = int_to_ptr.vmem [resolvable:$true] %s4058_s10 }
  0x26   : > { %4907 = vmatprep.mubr.bf16.mxu1 %v5237_v25  ;;  %4887 = vmatprep.mubr.bf16.mxu0 %v5239_v26  ;;  %v394_v32 = vld [vmem:[#allocation2 + $0x8] sm:$0xff]  ;;  %v437_v40 = vld [vmem:[#allocation2 + $0x20] sm:$0xff]  ;;  %v5238_v61 = vld [vmem:[%s7326_s4 + $0x18] sm:$0xff]  }
  0x27   : > { %v438_v41 = vld [vmem:[#allocation2 + $0x28] sm:$0xff]  ;;  %v439_v44 = vld [vmem:[#allocation2 + $0x30] sm:$0xff]  ;;  %v440_v45 = vld [vmem:[#allocation2 + $0x38] sm:$0xff] }
  0x28   : > { %v6084_v43 = vpack.c.bf16 %v438_v41, %v437_v40  ;;  %v6089_v46 = vpack.c.bf16 %v440_v45, %v439_v44  ;;  %v441_v47 = vld [vmem:[#allocation2 + $0x40] sm:$0xff]  ;;  %v442_v48 = vld [vmem:[#allocation2 + $0x48] sm:$0xff]  ;;  %v447_v56 = vld [vmem:[#allocation2 + $0x70] sm:$0xff] }
  0x29   : > { %414 = vperm.xlu1 %5236, %v392_v23   ;;  %404 = vperm.xlu0 %5235, %v390_v24   ;;  %v6095_v49 = vpack.c.bf16 %v442_v48, %v441_v47  ;;  %v443_v50 = vld [vmem:[#allocation2 + $0x50] sm:$0xff]  ;;  %v444_v51 = vld [vmem:[#allocation2 + $0x58] sm:$0xff]  ;;  %v445_v53 = vld [vmem:[#allocation2 + $0x60] sm:$0xff] }
  0x2a   : > { %v6101_v52 = vpack.c.bf16 %v444_v51, %v443_v50  ;;  %v446_v54 = vld [vmem:[#allocation2 + $0x68] sm:$0xff]  ;;  %v448_v57 = vld [vmem:[#allocation2 + $0x78] sm:$0xff]  ;;  %v5243_v59 = vld [vmem:[%s7327_s5 + $0x104] ss:$16 sps:$4 sm:$0xff]  }
  0x2b   : > { %v6107_v55 = vpack.c.bf16 %v446_v54, %v445_v53  ;;  %v6113_v58 = vpack.c.bf16 %v448_v57, %v447_v56  ;;  %v5246_v60 = vld [vmem:[%s7327_s5 + $0x10c] ss:$16 sps:$4 sm:$0xff]   ;;  %v5241_v63 = vld [vmem:[%s7327_s5 + $0x100] ss:$16 sps:$4 sm:$0xff]   ;;  %v5244_v0 = vld [vmem:[%s7327_s5 + $0x108] ss:$16 sps:$4 sm:$0xff]  }
  0x2c   : > { %v5240_v62 = vld [vmem:[%s7326_s4 + $0x8] sm:$0xff]   ;;  %v5249_v1 = vld [vmem:[%s7327_s5 + $0x124] ss:$16 sps:$4 sm:$0xff]   ;;  %v5247_v3 = vld [vmem:[%s7327_s5 + $0x120] ss:$16 sps:$4 sm:$0xff]  }
  0x2d   : > { %v5252_v2 = vld [vmem:[%s7327_s5 + $0x12c] ss:$16 sps:$4 sm:$0xff]   ;;  %v5250_v4 = vld [vmem:[%s7327_s5 + $0x128] ss:$16 sps:$4 sm:$0xff]   ;;  %v5255_v5 = vld [vmem:[%s7327_s5 + $0x144] ss:$16 sps:$4 sm:$0xff]  }
  0x2e   : > { %v5258_v6 = vld [vmem:[%s7327_s5 + $0x14c] ss:$16 sps:$4 sm:$0xff]   ;;  %v5253_v7 = vld [vmem:[%s7327_s5 + $0x140] ss:$16 sps:$4 sm:$0xff]   ;;  %v5256_v8 = vld [vmem:[%s7327_s5 + $0x148] ss:$16 sps:$4 sm:$0xff]  }
  0x2f   : > { %v5261_v9 = vld [vmem:[%s7327_s5 + $0x164] ss:$16 sps:$4 sm:$0xff]   ;;  %v5264_v10 = vld [vmem:[%s7327_s5 + $0x16c] ss:$16 sps:$4 sm:$0xff]   ;;  %v5259_v11 = vld [vmem:[%s7327_s5 + $0x160] ss:$16 sps:$4 sm:$0xff]  }
  0x30   : > { %v5262_v12 = vld [vmem:[%s7327_s5 + $0x168] ss:$16 sps:$4 sm:$0xff]   ;;  %v5267_v13 = vld [vmem:[%s7327_s5 + $0x184] ss:$16 sps:$4 sm:$0xff]   ;;  %v5270_v14 = vld [vmem:[%s7327_s5 + $0x18c] ss:$16 sps:$4 sm:$0xff]  }
  0x31   : > { %v5265_v15 = vld [vmem:[%s7327_s5 + $0x180] ss:$16 sps:$4 sm:$0xff]   ;;  %v5268_v16 = vld [vmem:[%s7327_s5 + $0x188] ss:$16 sps:$4 sm:$0xff]   ;;  %v5273_v17 = vld [vmem:[%s7327_s5 + $0x1a4] ss:$16 sps:$4 sm:$0xff]  }
  0x32   : > { %v5276_v18 = vld [vmem:[%s7327_s5 + $0x1ac] ss:$16 sps:$4 sm:$0xff]   ;;  %v5271_v19 = vld [vmem:[%s7327_s5 + $0x1a0] ss:$16 sps:$4 sm:$0xff]   ;;  %v5274_v20 = vld [vmem:[%s7327_s5 + $0x1a8] ss:$16 sps:$4 sm:$0xff]  }
  0x33   : > { %v5279_v21 = vld [vmem:[%s7327_s5 + $0x1c4] ss:$16 sps:$4 sm:$0xff]   ;;  %v5282_v23 = vld [vmem:[%s7327_s5 + $0x1cc] ss:$16 sps:$4 sm:$0xff]   ;;  %v5277_v24 = vld [vmem:[%s7327_s5 + $0x1c0] ss:$16 sps:$4 sm:$0xff]  }
  0x34   : > { %v5280_v25 = vld [vmem:[%s7327_s5 + $0x1c8] ss:$16 sps:$4 sm:$0xff]   ;;  %v5285_v26 = vld [vmem:[%s7327_s5 + $0x1e4] ss:$16 sps:$4 sm:$0xff]   ;;  %v5289_v48 = vld [vmem:[%s7327_s5] ss:$16 sps:$4 sm:$0xff]  }
  0x35   : > { %v5292_v50 = vld [vmem:[%s7327_s5 + $0x8] ss:$16 sps:$4 sm:$0xff]   ;;  %v5297_v56 = vld [vmem:[%s7327_s5 + $0x24] ss:$16 sps:$4 sm:$0xff]   ;;  %v5300_v57 = vld [vmem:[%s7327_s5 + $0x2c] ss:$16 sps:$4 sm:$0xff]  }
  0xa4   : > { %v6062_v27 = vpop.permute.xlu1 %409  ;;  %v6064_v28 = vpop.permute.xlu0 %399 }
  0xa5   : > { %v419_v35 = vmul.f32 %v6062_v27, %v395_v29  ;;  %v417_v36 = vmul.f32 %v6064_v28, %v393_v30  ;;  %v5288_v29 = vld [vmem:[%s7327_s5 + $0x1ec] ss:$16 sps:$4 sm:$0xff]   ;;  %v5283_v30 = vld [vmem:[%s7327_s5 + $0x1e0] ss:$16 sps:$4 sm:$0xff]  }
  0xa8   : > { %v6066_v33 = vpop.permute.xlu1 %414  ;;  %v6068_v34 = vpop.permute.xlu0 %404 }
  0xa9   : > { %v420_v37 = vmul.f32 %v6066_v33, %v396_v31  ;;  %v418_v38 = vmul.f32 %v6068_v34, %v394_v32  ;;  %v5286_v31 = vld [vmem:[%s7327_s5 + $0x1e8] ss:$16 sps:$4 sm:$0xff]   ;;  %v5291_v32 = vld [vmem:[%s7327_s5 + $0x4] ss:$16 sps:$4 sm:$0xff]  }
  0xab   : > { %v6074_v39 = vpack.c.bf16 %v418_v38, %v417_v36  ;;  %v6076_v42 = vpack.c.bf16 %v420_v37, %v419_v35  ;;  %v5294_v35 = vld [vmem:[%s7327_s5 + $0xc] ss:$16 sps:$4 sm:$0xff]  }
  0xad   : > { %4871 = vmatprep.subr.bf16.mxu0 %v6074_v39  ;;  %4891 = vmatprep.subr.bf16.mxu1 %v6074_v39 }
  0xae   : > { %4872 = vmatpush3.bf16.msra.mxu0 %v6074_v39  ;;  %4892 = vmatpush3.bf16.msra.mxu1 %v6074_v39 }
  0xaf   : > { %4873 = vmatprep.subr.bf16.mxu0 %v6076_v42  ;;  %4893 = vmatprep.subr.bf16.mxu1 %v6076_v42 }
  0xb2   : > { %4874 = vmatpush3.bf16.msra.mxu0 %v6076_v42  ;;  %4894 = vmatpush3.bf16.msra.mxu1 %v6076_v42 }
  0xb3   : > { %4895 = vmatprep.subr.bf16.mxu1 %v6084_v43  ;;  %4875 = vmatprep.subr.bf16.mxu0 %v6084_v43 }
  0xb6   : > { %4896 = vmatpush3.bf16.msra.mxu1 %v6084_v43  ;;  %4876 = vmatpush3.bf16.msra.mxu0 %v6084_v43 }
  0xb7   : > { %4897 = vmatprep.subr.bf16.mxu1 %v6089_v46  ;;  %4877 = vmatprep.subr.bf16.mxu0 %v6089_v46 }
  0xba   : > { %4898 = vmatpush3.bf16.msra.mxu1 %v6089_v46  ;;  %4878 = vmatpush3.bf16.msra.mxu0 %v6089_v46 }
  0xbb   : > { %4899 = vmatprep.subr.bf16.mxu1 %v6095_v49  ;;  %4879 = vmatprep.subr.bf16.mxu0 %v6095_v49 }
  0xbe   : > { %4900 = vmatpush3.bf16.msra.mxu1 %v6095_v49  ;;  %4880 = vmatpush3.bf16.msra.mxu0 %v6095_v49 }
  0xbf   : > { %4901 = vmatprep.subr.bf16.mxu1 %v6101_v52  ;;  %4881 = vmatprep.subr.bf16.mxu0 %v6101_v52 }
  0xc2   : > { %4902 = vmatpush3.bf16.msra.mxu1 %v6101_v52  ;;  %4882 = vmatpush3.bf16.msra.mxu0 %v6101_v52 }
  0xc3   : > { %4903 = vmatprep.subr.bf16.mxu1 %v6107_v55  ;;  %4883 = vmatprep.subr.bf16.mxu0 %v6107_v55 }
  0xc6   : > { %4904 = vmatpush3.bf16.msra.mxu1 %v6107_v55  ;;  %4884 = vmatpush3.bf16.msra.mxu0 %v6107_v55 }
  0xc7   : > { %4905 = vmatprep.subr.bf16.mxu1 %v6113_v58  ;;  %4885 = vmatprep.subr.bf16.mxu0 %v6113_v58 }
  0xca   : > { %4906 = vmatpush3.bf16.msra.mxu1 %v6113_v58  ;;  %4886 = vmatpush3.bf16.msra.mxu0 %v6113_v58 }
  0xcb   : > { %817 = vmatprep.subr.bf16.mxu0 %v5243_v59  ;;  %870 = vmatprep.subr.bf16.mxu1 %v5246_v60  ;;  %v5295_v60 = vld [vmem:[%s7327_s5 + $0x20] ss:$16 sps:$4 sm:$0xff]  }
  0xcd   : > { %4908 = vmatmul.mubr.bf16.vlgmr.msra.gmra.mrb[0].mxu1 %v5238_v61  ;;  %4888 = vmatmul.mubr.bf16.vlgmr.msra.gmra.mrb[0].mxu0 %v5240_v62  ;;  %v5298_v61 = vld [vmem:[%s7327_s5 + $0x28] ss:$16 sps:$4 sm:$0xff]   ;;  %v5303_v62 = vld [vmem:[%s7327_s5 + $0x44] ss:$16 sps:$4 sm:$0xff]  }
  0xce   : > { %818 = vmatpush1.bf16.msra.mxu0 %v5241_v63  ;;  %871 = vmatpush1.bf16.msra.mxu1 %v5244_v0  ;;  %v5306_v63 = vld [vmem:[%s7327_s5 + $0x4c] ss:$16 sps:$4 sm:$0xff]   ;;  %v5301_v0 = vld [vmem:[%s7327_s5 + $0x40] ss:$16 sps:$4 sm:$0xff]  }
  0xcf   : > { %819 = vmatprep.subr.bf16.mxu0 %v5249_v1  ;;  %872 = vmatprep.subr.bf16.mxu1 %v5252_v2  ;;  %v5304_v1 = vld [vmem:[%s7327_s5 + $0x48] ss:$16 sps:$4 sm:$0xff]   ;;  %v5309_v2 = vld [vmem:[%s7327_s5 + $0x64] ss:$16 sps:$4 sm:$0xff]  }
  0xd0   : > { %849 = vmatprep.mubr.bf16.mxu0 %v5871_v22  ;;  %902 = vmatprep.mubr.bf16.mxu1 %v5871_v22 }
  0xd2   : > { %820 = vmatpush1.bf16.msra.mxu0 %v5247_v3  ;;  %873 = vmatpush1.bf16.msra.mxu1 %v5250_v4  ;;  %v5312_v3 = vld [vmem:[%s7327_s5 + $0x6c] ss:$16 sps:$4 sm:$0xff]   ;;  %v5307_v4 = vld [vmem:[%s7327_s5 + $0x60] ss:$16 sps:$4 sm:$0xff]  }
  0xd3   : > { %821 = vmatprep.subr.bf16.mxu0 %v5255_v5  ;;  %874 = vmatprep.subr.bf16.mxu1 %v5258_v6  ;;  %v5310_v5 = vld [vmem:[%s7327_s5 + $0x68] ss:$16 sps:$4 sm:$0xff]   ;;  %v5315_v6 = vld [vmem:[%s7327_s5 + $0x84] ss:$16 sps:$4 sm:$0xff]  }
  0xd6   : > { %822 = vmatpush1.bf16.msra.mxu0 %v5253_v7  ;;  %875 = vmatpush1.bf16.msra.mxu1 %v5256_v8  ;;  %v5318_v7 = vld [vmem:[%s7327_s5 + $0x8c] ss:$16 sps:$4 sm:$0xff]   ;;  %v5313_v8 = vld [vmem:[%s7327_s5 + $0x80] ss:$16 sps:$4 sm:$0xff]  }
  0xd7   : > { %823 = vmatprep.subr.bf16.mxu0 %v5261_v9  ;;  %876 = vmatprep.subr.bf16.mxu1 %v5264_v10  ;;  %v5316_v9 = vld [vmem:[%s7327_s5 + $0x88] ss:$16 sps:$4 sm:$0xff]   ;;  %v5321_v10 = vld [vmem:[%s7327_s5 + $0xa4] ss:$16 sps:$4 sm:$0xff]  }
  0xda   : > { %824 = vmatpush1.bf16.msra.mxu0 %v5259_v11  ;;  %877 = vmatpush1.bf16.msra.mxu1 %v5262_v12  ;;  %v5324_v11 = vld [vmem:[%s7327_s5 + $0xac] ss:$16 sps:$4 sm:$0xff]   ;;  %v5319_v12 = vld [vmem:[%s7327_s5 + $0xa0] ss:$16 sps:$4 sm:$0xff]  }
  0xdb   : > { %825 = vmatprep.subr.bf16.mxu0 %v5267_v13  ;;  %878 = vmatprep.subr.bf16.mxu1 %v5270_v14  ;;  %v5322_v13 = vld [vmem:[%s7327_s5 + $0xa8] ss:$16 sps:$4 sm:$0xff]   ;;  %v5327_v14 = vld [vmem:[%s7327_s5 + $0xc4] ss:$16 sps:$4 sm:$0xff]  }
  0xde   : > { %826 = vmatpush1.bf16.msra.mxu0 %v5265_v15  ;;  %879 = vmatpush1.bf16.msra.mxu1 %v5268_v16  ;;  %v5330_v15 = vld [vmem:[%s7327_s5 + $0xcc] ss:$16 sps:$4 sm:$0xff]   ;;  %v5325_v16 = vld [vmem:[%s7327_s5 + $0xc0] ss:$16 sps:$4 sm:$0xff]  }
  0xdf   : > { %827 = vmatprep.subr.bf16.mxu0 %v5273_v17  ;;  %880 = vmatprep.subr.bf16.mxu1 %v5276_v18  ;;  %v5328_v17 = vld [vmem:[%s7327_s5 + $0xc8] ss:$16 sps:$4 sm:$0xff]   ;;  %v5333_v18 = vld [vmem:[%s7327_s5 + $0xe4] ss:$16 sps:$4 sm:$0xff]  }
  0xe2   : > { %828 = vmatpush1.bf16.msra.mxu0 %v5271_v19  ;;  %881 = vmatpush1.bf16.msra.mxu1 %v5274_v20  ;;  %v5336_v19 = vld [vmem:[%s7327_s5 + $0xec] ss:$16 sps:$4 sm:$0xff]   ;;  %v5331_v20 = vld [vmem:[%s7327_s5 + $0xe0] ss:$16 sps:$4 sm:$0xff]  }
  0xe3   : > { %829 = vmatprep.subr.bf16.mxu0 %v5279_v21  ;;  %882 = vmatprep.subr.bf16.mxu1 %v5282_v23  ;;  %v5334_v21 = vld [vmem:[%s7327_s5 + $0xe8] ss:$16 sps:$4 sm:$0xff]   ;;  %v5339_v23 = vld [vmem:[%s7327_s5 + $0x20c] ss:$16 sps:$4 sm:$0xff]  }
  0xe6   : > { %830 = vmatpush1.bf16.msra.mxu0 %v5277_v24  ;;  %883 = vmatpush1.bf16.msra.mxu1 %v5280_v25  ;;  %v5337_v24 = vld [vmem:[%s7327_s5 + $0x208] ss:$16 sps:$4 sm:$0xff]   ;;  %v5342_v25 = vld [vmem:[%s7327_s5 + $0x22c] ss:$16 sps:$4 sm:$0xff]  }
  0xe7   : > { %831 = vmatprep.subr.bf16.mxu0 %v5285_v26  ;;  %884 = vmatprep.subr.bf16.mxu1 %v5288_v29  ;;  %v5340_v26 = vld [vmem:[%s7327_s5 + $0x228] ss:$16 sps:$4 sm:$0xff]   ;;  %v5345_v29 = vld [vmem:[%s7327_s5 + $0x24c] ss:$16 sps:$4 sm:$0xff]  }
  0xea   : > { %832 = vmatpush1.bf16.msra.mxu0 %v5283_v30  ;;  %885 = vmatpush1.bf16.msra.mxu1 %v5286_v31  ;;  %v5343_v30 = vld [vmem:[%s7327_s5 + $0x248] ss:$16 sps:$4 sm:$0xff]   ;;  %v5348_v31 = vld [vmem:[%s7327_s5 + $0x26c] ss:$16 sps:$4 sm:$0xff]  }
  0xeb   : > { %1083 = vmatprep.subr.bf16.mxu0 %v5291_v32  ;;  %1136 = vmatprep.subr.bf16.mxu1 %v5294_v35  ;;  %v5361_v32 = vld [vmem:[%s7326_s4 + $0x20] sm:$0xff]   ;;  %v5346_v35 = vld [vmem:[%s7327_s5 + $0x268] ss:$16 sps:$4 sm:$0xff]  }
 0x1a0   : > { %v4909_v36 = vpop.f32.mrb[0].mxu1  ;;  %v4889_v37 = vpop.f32.mrb[0].mxu0 }
 0x1a1   : > { %v607_v38 = vpop.f32.mrb[1].mxu1  ;;  %v507_v40 = vpop.f32.mrb[1].mxu0 }
 0x1a2   : > { %v4910_v41 = vpop.f32.mrb[2].mxu1  ;;  %v4890_v44 = vpop.f32.mrb[2].mxu0 }
 0x1a3   : > { %v623_v45 = vpack.c.bf16 %v4910_v41, %v4909_v36  ;;  %v610_v47 = vpop.f32.mrb[3].mxu1  ;;  %v6238_v51 = vpack.c.bf16 %v4890_v44, %v4889_v37  ;;  %v510_v53 = vpop.f32.mrb[3].mxu0  ;;  %v5351_v36 = vld [vmem:[%s7327_s5 + $0x28c] ss:$16 sps:$4 sm:$0xff]   ;;  %v5349_v37 = vld [vmem:[%s7327_s5 + $0x288] ss:$16 sps:$4 sm:$0xff]  }
 0x1a4   : > { %v622_v54 = vpack.c.bf16 %v610_v47, %v607_v38  ;;  %v6246_v59 = vpack.c.bf16 %v510_v53, %v507_v40  ;;  %v5354_v38 = vld [vmem:[%s7327_s5 + $0x2ac] ss:$16 sps:$4 sm:$0xff]   ;;  %v5352_v40 = vld [vmem:[%s7327_s5 + $0x2a8] ss:$16 sps:$4 sm:$0xff]   ;;  %v5368_v53 = vld [vmem:[%s7327_s5 + $0x224] ss:$16 sps:$4 sm:$0xff]  }
 0x1a5   : > { %v5357_v41 = vld [vmem:[%s7327_s5 + $0x2cc] ss:$16 sps:$4 sm:$0xff]   ;;  %v5355_v44 = vld [vmem:[%s7327_s5 + $0x2c8] ss:$16 sps:$4 sm:$0xff]  }
 0x1a6   : > { %850 = vmatmul.mubr.bf16.vlgmr.msra.gmra.mrb[4].mxu0 %v622_v54  ;;  %903 = vmatmul.mubr.bf16.vlgmr.msra.gmra.mrb[4].mxu1 %v622_v54  ;;  %v5358_v47 = vld [vmem:[%s7327_s5 + $0x2e8] ss:$16 sps:$4 sm:$0xff]   ;;  %v5366_v54 = vld [vmem:[%s7327_s5 + $0x220] ss:$16 sps:$4 sm:$0xff]  }
 0x1a7   : > { %1084 = vmatpush1.bf16.msra.mxu0 %v5289_v48  ;;  %1137 = vmatpush1.bf16.msra.mxu1 %v5292_v50  ;;  %v5365_v48 = vld [vmem:[%s7327_s5 + $0x204] ss:$16 sps:$4 sm:$0xff]   ;;  %v5362_v50 = vld [vmem:[%s7326_s4 + $0x28] sm:$0xff]  }
 0x1a8   : > { %1085 = vmatprep.subr.bf16.mxu0 %v5297_v56  ;;  %1138 = vmatprep.subr.bf16.mxu1 %v5300_v57  ;;  %v5371_v56 = vld [vmem:[%s7327_s5 + $0x244] ss:$16 sps:$4 sm:$0xff]   ;;  %v5369_v57 = vld [vmem:[%s7327_s5 + $0x240] ss:$16 sps:$4 sm:$0xff]  }
 0x1a9   : > { %859 = vmatprep.mubr.bf16.mxu0 %v5871_v22  ;;  %912 = vmatprep.mubr.bf16.mxu1 %v5871_v22 }
 0x1ab   : > { %1086 = vmatpush1.bf16.msra.mxu0 %v5295_v60  ;;  %1139 = vmatpush1.bf16.msra.mxu1 %v5298_v61  ;;  %v5372_v60 = vld [vmem:[%s7327_s5 + $0x260] ss:$16 sps:$4 sm:$0xff]   ;;  %v5377_v61 = vld [vmem:[%s7327_s5 + $0x284] ss:$16 sps:$4 sm:$0xff]  }
 0x1ac   : > { %1087 = vmatprep.subr.bf16.mxu0 %v5303_v62  ;;  %1140 = vmatprep.subr.bf16.mxu1 %v5306_v63  ;;  %v5375_v62 = vld [vmem:[%s7327_s5 + $0x280] ss:$16 sps:$4 sm:$0xff]   ;;  %v5380_v63 = vld [vmem:[%s7327_s5 + $0x2a4] ss:$16 sps:$4 sm:$0xff]  }
 0x1ae   : > { %860 = vmatmul.mubr.bf16.gmra.mrb[8].mxu0 %v623_v45  ;;  %913 = vmatmul.mubr.bf16.gmra.mrb[8].mxu1 %v623_v45  ;;  %v5360_v45 = vld [vmem:[%s7327_s5 + $0x2ec] ss:$16 sps:$4 sm:$0xff]  }
 0x1af   : > { %1088 = vmatpush1.bf16.msra.mxu0 %v5301_v0  ;;  %1141 = vmatpush1.bf16.msra.mxu1 %v5304_v1  ;;  %v5378_v0 = vld [vmem:[%s7327_s5 + $0x2a0] ss:$16 sps:$4 sm:$0xff]   ;;  %v5383_v1 = vld [vmem:[%s7327_s5 + $0x2c4] ss:$16 sps:$4 sm:$0xff]  }
 0x1b0   : > { %1089 = vmatprep.subr.bf16.mxu0 %v5309_v2  ;;  %1142 = vmatprep.subr.bf16.mxu1 %v5312_v3  ;;  %v5381_v2 = vld [vmem:[%s7327_s5 + $0x2c0] ss:$16 sps:$4 sm:$0xff]   ;;  %v5386_v3 = vld [vmem:[%s7327_s5 + $0x2e4] ss:$16 sps:$4 sm:$0xff]  }
 0x1b1   : > { %1115 = vmatprep.mubr.bf16.mxu0 %v5871_v22  ;;  %1168 = vmatprep.mubr.bf16.mxu1 %v5871_v22 }
 0x1b3   : > { %1090 = vmatpush1.bf16.msra.mxu0 %v5307_v4  ;;  %1143 = vmatpush1.bf16.msra.mxu1 %v5310_v5  ;;  %v5384_v4 = vld [vmem:[%s7327_s5 + $0x2e0] ss:$16 sps:$4 sm:$0xff]   ;;  %v5389_v5 = vld [vmem:[%s7327_s5 + $0x304] ss:$16 sps:$4 sm:$0xff]  }
 0x1b4   : > { %1091 = vmatprep.subr.bf16.mxu0 %v5315_v6  ;;  %1144 = vmatprep.subr.bf16.mxu1 %v5318_v7 }
 0x1b7   : > { %1092 = vmatpush1.bf16.msra.mxu0 %v5313_v8  ;;  %1145 = vmatpush1.bf16.msra.mxu1 %v5316_v9 }
 0x1b8   : > { %1093 = vmatprep.subr.bf16.mxu0 %v5321_v10  ;;  %1146 = vmatprep.subr.bf16.mxu1 %v5324_v11  ;;  %v5387_v11 = vld [vmem:[%s7327_s5 + $0x300] ss:$16 sps:$4 sm:$0xff]  }
 0x1bb   : > { %1094 = vmatpush1.bf16.msra.mxu0 %v5319_v12  ;;  %1147 = vmatpush1.bf16.msra.mxu1 %v5322_v13  ;;  %v5392_v13 = vld [vmem:[%s7327_s5 + $0x324] ss:$16 sps:$4 sm:$0xff]  }
 0x1bc   : > { %1095 = vmatprep.subr.bf16.mxu0 %v5327_v14  ;;  %1148 = vmatprep.subr.bf16.mxu1 %v5330_v15  ;;  %v5390_v14 = vld [vmem:[%s7327_s5 + $0x320] ss:$16 sps:$4 sm:$0xff]   ;;  %v5395_v15 = vld [vmem:[%s7327_s5 + $0x344] ss:$16 sps:$4 sm:$0xff]  }
 0x1bf   : > { %1096 = vmatpush1.bf16.msra.mxu0 %v5325_v16  ;;  %1149 = vmatpush1.bf16.msra.mxu1 %v5328_v17  ;;  %v5393_v16 = vld [vmem:[%s7327_s5 + $0x340] ss:$16 sps:$4 sm:$0xff]   ;;  %v5398_v17 = vld [vmem:[%s7327_s5 + $0x364] ss:$16 sps:$4 sm:$0xff]  }
 0x1c0   : > { %1097 = vmatprep.subr.bf16.mxu0 %v5333_v18  ;;  %1150 = vmatprep.subr.bf16.mxu1 %v5336_v19  ;;  %v5411_v18 = vld [vmem:[%s7326_s4 + $0x30] sm:$0xff]  }
 0x1c1   : > { %v5396_v19 = vld [vmem:[%s7327_s5 + $0x360] ss:$16 sps:$4 sm:$0xff]  }
 0x1c3   : > { %1098 = vmatpush1.bf16.msra.mxu0 %v5331_v20  ;;  %1151 = vmatpush1.bf16.msra.mxu1 %v5334_v21  ;;  %v5401_v20 = vld [vmem:[%s7327_s5 + $0x384] ss:$16 sps:$4 sm:$0xff]   ;;  %v5399_v21 = vld [vmem:[%s7327_s5 + $0x380] ss:$16 sps:$4 sm:$0xff]  }
 0x1c4   : > { %4911 = vmatprep.subr.bf16.mxu0 %v6074_v39  ;;  %1503 = vmatprep.subr.bf16.mxu1 %v5339_v23  ;;  %v5404_v23 = vld [vmem:[%s7327_s5 + $0x3a4] ss:$16 sps:$4 sm:$0xff]  }
 0x1c6   : > { %1116 = vmatmul.mubr.bf16.vlgmr.msra.gmra.mrb[4].mxu0 %v6246_v59  ;;  %1169 = vmatmul.mubr.bf16.vlgmr.msra.gmra.mrb[4].mxu1 %v6246_v59  ;;  %v5374_v59 = vld [vmem:[%s7327_s5 + $0x264] ss:$16 sps:$4 sm:$0xff]  }
 0x1c7   : > { %4912 = vmatpush3.bf16.msra.mxu0 %v6074_v39  ;;  %1504 = vmatpush1.bf16.msra.mxu1 %v5337_v24  ;;  %v5402_v24 = vld [vmem:[%s7327_s5 + $0x3a0] ss:$16 sps:$4 sm:$0xff]  }
 0x1c8   : > { %4913 = vmatprep.subr.bf16.mxu0 %v6076_v42  ;;  %1505 = vmatprep.subr.bf16.mxu1 %v5342_v25  ;;  %v5407_v25 = vld [vmem:[%s7327_s5 + $0x3c4] ss:$16 sps:$4 sm:$0xff]  }
 0x1c9   : > { %1125 = vmatprep.mubr.bf16.mxu0 %v5871_v22  ;;  %1178 = vmatprep.mubr.bf16.mxu1 %v5871_v22 }
 0x1cb   : > { %4914 = vmatpush3.bf16.msra.mxu0 %v6076_v42  ;;  %1506 = vmatpush1.bf16.msra.mxu1 %v5340_v26  ;;  %v5405_v26 = vld [vmem:[%s7327_s5 + $0x3c0] ss:$16 sps:$4 sm:$0xff]  }
 0x1cc   : > { %4915 = vmatprep.subr.bf16.mxu0 %v6084_v43  ;;  %1507 = vmatprep.subr.bf16.mxu1 %v5345_v29  ;;  %v5410_v29 = vld [vmem:[%s7327_s5 + $0x3e4] ss:$16 sps:$4 sm:$0xff]  }
 0x1ce   : > { %1126 = vmatmul.mubr.bf16.gmra.mrb[8].mxu0 %v6238_v51  ;;  %1179 = vmatmul.mubr.bf16.gmra.mrb[8].mxu1 %v6238_v51  ;;  %v5363_v51 = vld [vmem:[%s7327_s5 + $0x200] ss:$16 sps:$4 sm:$0xff]  }
 0x1cf   : > { %4916 = vmatpush3.bf16.msra.mxu0 %v6084_v43  ;;  %1508 = vmatpush1.bf16.msra.mxu1 %v5343_v30  ;;  %v5408_v30 = vld [vmem:[%s7327_s5 + $0x3e0] ss:$16 sps:$4 sm:$0xff]  }
 0x1d0   : > { %4917 = vmatprep.subr.bf16.mxu0 %v6089_v46  ;;  %1509 = vmatprep.subr.bf16.mxu1 %v5348_v31  ;;  %v5415_v31 = vld [vmem:[%s7327_s5 + $0x30c] ss:$16 sps:$4 sm:$0xff]  }
 0x1d1   : > { %4927 = vmatprep.mubr.bf16.mxu0 %v5361_v32  ;;  %1535 = vmatprep.mubr.bf16.mxu1 %v5871_v22  ;;  %v5412_v32 = vld [vmem:[%s7326_s4 + $0x38] sm:$0xff]  }
 0x1d3   : > { %4918 = vmatpush3.bf16.msra.mxu0 %v6089_v46  ;;  %1510 = vmatpush1.bf16.msra.mxu1 %v5346_v35  ;;  %v5413_v35 = vld [vmem:[%s7327_s5 + $0x308] ss:$16 sps:$4 sm:$0xff]  }
 0x1d4   : > { %4919 = vmatprep.subr.bf16.mxu0 %v6095_v49  ;;  %1511 = vmatprep.subr.bf16.mxu1 %v5351_v36  ;;  %v5418_v36 = vld [vmem:[%s7327_s5 + $0x32c] ss:$16 sps:$4 sm:$0xff]  }
 0x1d7   : > { %4920 = vmatpush3.bf16.msra.mxu0 %v6095_v49  ;;  %1512 = vmatpush1.bf16.msra.mxu1 %v5349_v37  ;;  %v5416_v37 = vld [vmem:[%s7327_s5 + $0x328] ss:$16 sps:$4 sm:$0xff]  }
 0x1d8   : > { %4921 = vmatprep.subr.bf16.mxu0 %v6101_v52  ;;  %1513 = vmatprep.subr.bf16.mxu1 %v5354_v38  ;;  %v5421_v38 = vld [vmem:[%s7327_s5 + $0x34c] ss:$16 sps:$4 sm:$0xff]  }
 0x1db   : > { %4922 = vmatpush3.bf16.msra.mxu0 %v6101_v52  ;;  %1514 = vmatpush1.bf16.msra.mxu1 %v5352_v40  ;;  %v5419_v40 = vld [vmem:[%s7327_s5 + $0x348] ss:$16 sps:$4 sm:$0xff]  }
 0x1dc   : > { %4923 = vmatprep.subr.bf16.mxu0 %v6107_v55  ;;  %1515 = vmatprep.subr.bf16.mxu1 %v5357_v41  ;;  %v5424_v41 = vld [vmem:[%s7327_s5 + $0x36c] ss:$16 sps:$4 sm:$0xff]  }
 0x1df   : > { %4924 = vmatpush3.bf16.msra.mxu0 %v6107_v55  ;;  %1516 = vmatpush1.bf16.msra.mxu1 %v5355_v44  ;;  %v5422_v44 = vld [vmem:[%s7327_s5 + $0x368] ss:$16 sps:$4 sm:$0xff]  }
 0x1e0   : > { %4925 = vmatprep.subr.bf16.mxu0 %v6113_v58  ;;  %1517 = vmatprep.subr.bf16.mxu1 %v5360_v45  ;;  %v5427_v45 = vld [vmem:[%s7327_s5 + $0x38c] ss:$16 sps:$4 sm:$0xff]  }
 0x1e3   : > { %4926 = vmatpush3.bf16.msra.mxu0 %v6113_v58  ;;  %1518 = vmatpush1.bf16.msra.mxu1 %v5358_v47  ;;  %v5425_v47 = vld [vmem:[%s7327_s5 + $0x388] ss:$16 sps:$4 sm:$0xff]  }
 0x1e4   : > { %4931 = vmatprep.subr.bf16.mxu1 %v6074_v39  ;;  %1450 = vmatprep.subr.bf16.mxu0 %v5365_v48  ;;  %v5430_v48 = vld [vmem:[%s7327_s5 + $0x3ac] ss:$16 sps:$4 sm:$0xff]  }
 0x1e6   : > { %4928 = vmatmul.mubr.bf16.vlgmr.msra.gmra.mrb[12].mxu0 %v5362_v50  ;;  %v5428_v50 = vld [vmem:[%s7327_s5 + $0x3a8] ss:$16 sps:$4 sm:$0xff]  }
 0x1e7   : > { %1451 = vmatpush1.bf16.msra.mxu0 %v5363_v51  ;;  %1482 = vmatprep.mubr.bf16.mxu0 %v5871_v22  ;;  %v5433_v51 = vld [vmem:[%s7327_s5 + $0x3cc] ss:$16 sps:$4 sm:$0xff]  }
 0x1e8   : > { %1452 = vmatprep.subr.bf16.mxu0 %v5368_v53  ;;  %v5431_v53 = vld [vmem:[%s7327_s5 + $0x3c8] ss:$16 sps:$4 sm:$0xff]  }
 0x1eb   : > { %1453 = vmatpush1.bf16.msra.mxu0 %v5366_v54  ;;  %v5436_v54 = vld [vmem:[%s7327_s5 + $0x3ec] ss:$16 sps:$4 sm:$0xff]  }
 0x1ec   : > { %1454 = vmatprep.subr.bf16.mxu0 %v5371_v56  ;;  %v5434_v56 = vld [vmem:[%s7327_s5 + $0x3e8] ss:$16 sps:$4 sm:$0xff]  }
 0x1ef   : > { %1455 = vmatpush1.bf16.msra.mxu0 %v5369_v57  ;;  %v5439_v57 = vld [vmem:[%s7327_s5 + $0x40c] ss:$16 sps:$4 sm:$0xff]  }
 0x1f0   : > { %1456 = vmatprep.subr.bf16.mxu0 %v5374_v59 }
 0x1f3   : > { %1457 = vmatpush1.bf16.msra.mxu0 %v5372_v60 }
 0x1f4   : > { %1458 = vmatprep.subr.bf16.mxu0 %v5377_v61 }
 0x1f7   : > { %1459 = vmatpush1.bf16.msra.mxu0 %v5375_v62 }
 0x1f8   : > { %1460 = vmatprep.subr.bf16.mxu0 %v5380_v63 }
 0x1fb   : > { %1461 = vmatpush1.bf16.msra.mxu0 %v5378_v0  ;;  %v5437_v0 = vld [vmem:[%s7327_s5 + $0x408] ss:$16 sps:$4 sm:$0xff]  }
 0x1fc   : > { %1462 = vmatprep.subr.bf16.mxu0 %v5383_v1 }
 0x1ff   : > { %1463 = vmatpush1.bf16.msra.mxu0 %v5381_v2  ;;  %v5442_v2 = vld [vmem:[%s7327_s5 + $0x42c] ss:$16 sps:$4 sm:$0xff]  }
 0x200   : > { %1464 = vmatprep.subr.bf16.mxu0 %v5386_v3  ;;  %v5440_v3 = vld [vmem:[%s7327_s5 + $0x428] ss:$16 sps:$4 sm:$0xff]  }
 0x203   : > { %1465 = vmatpush1.bf16.msra.mxu0 %v5384_v4  ;;  %v5445_v4 = vld [vmem:[%s7327_s5 + $0x44c] ss:$16 sps:$4 sm:$0xff]  }
 0x204   : > { %1833 = vmatprep.subr.bf16.mxu0 %v5389_v5  ;;  %v5443_v5 = vld [vmem:[%s7327_s5 + $0x448] ss:$16 sps:$4 sm:$0xff]  }
 0x2b9   : > { %v4929_v6 = vpop.f32.mrb[12].mxu0 }
 0x2ba   : > { %v1240_v7 = vpop.f32.mrb[13].mxu0 }
 0x2bb   : > { %v4930_v8 = vpop.f32.mrb[14].mxu0 }
 0x2bc   : > { %v1256_v9 = vpack.c.bf16 %v4930_v8, %v4929_v6  ;;  %v1243_v10 = vpop.f32.mrb[15].mxu0  ;;  %v5448_v6 = vld [vmem:[%s7327_s5 + $0x46c] ss:$16 sps:$4 sm:$0xff]   ;;  %v5446_v8 = vld [vmem:[%s7327_s5 + $0x468] ss:$16 sps:$4 sm:$0xff]  }
 0x2bd   : > { %v1255_v12 = vpack.c.bf16 %v1243_v10, %v1240_v7  ;;  %v5461_v7 = vld [vmem:[%s7326_s4 + $0x40] sm:$0xff]   ;;  %v5449_v10 = vld [vmem:[%s7327_s5 + $0x488] ss:$16 sps:$4 sm:$0xff]  }
 0x2bf   : > { %1483 = vmatmul.mubr.bf16.vlgmr.msra.gmra.mrb[4].mxu0 %v1255_v12  ;;  %1536 = vmatmul.mubr.bf16.vlgmr.msra.gmra.mrb[4].mxu1 %v1255_v12  ;;  %v5452_v12 = vld [vmem:[%s7327_s5 + $0x4a8] ss:$16 sps:$4 sm:$0xff]  }
 0x2c0   : > { %4932 = vmatpush3.bf16.msra.mxu1 %v6074_v39  ;;  %1834 = vmatpush1.bf16.msra.mxu0 %v5387_v11  ;;  %v5454_v11 = vld [vmem:[%s7327_s5 + $0x4ac] ss:$16 sps:$4 sm:$0xff]  }
 0x2c1   : > { %4933 = vmatprep.subr.bf16.mxu1 %v6076_v42  ;;  %1835 = vmatprep.subr.bf16.mxu0 %v5392_v13  ;;  %v5457_v13 = vld [vmem:[%s7327_s5 + $0x4cc] ss:$16 sps:$4 sm:$0xff]  }
 0x2c2   : > { %1492 = vmatprep.mubr.bf16.mxu0 %v5871_v22  ;;  %1545 = vmatprep.mubr.bf16.mxu1 %v5871_v22 }
 0x2c4   : > { %4934 = vmatpush3.bf16.msra.mxu1 %v6076_v42  ;;  %1836 = vmatpush1.bf16.msra.mxu0 %v5390_v14  ;;  %v5455_v14 = vld [vmem:[%s7327_s5 + $0x4c8] ss:$16 sps:$4 sm:$0xff]  }
 0x2c5   : > { %4935 = vmatprep.subr.bf16.mxu1 %v6084_v43  ;;  %1837 = vmatprep.subr.bf16.mxu0 %v5395_v15  ;;  %v5460_v15 = vld [vmem:[%s7327_s5 + $0x4ec] ss:$16 sps:$4 sm:$0xff]  }
 0x2c7   : > { %1493 = vmatmul.mubr.bf16.gmra.mrb[8].mxu0 %v1256_v9  ;;  %1546 = vmatmul.mubr.bf16.gmra.mrb[8].mxu1 %v1256_v9  ;;  %v5451_v9 = vld [vmem:[%s7327_s5 + $0x48c] ss:$16 sps:$4 sm:$0xff]  }
 0x2c8   : > { %4936 = vmatpush3.bf16.msra.mxu1 %v6084_v43  ;;  %1838 = vmatpush1.bf16.msra.mxu0 %v5393_v16  ;;  %v5458_v16 = vld [vmem:[%s7327_s5 + $0x4e8] ss:$16 sps:$4 sm:$0xff]  }
 0x2c9   : > { %4937 = vmatprep.subr.bf16.mxu1 %v6089_v46  ;;  %1839 = vmatprep.subr.bf16.mxu0 %v5398_v17  ;;  %v5465_v17 = vld [vmem:[%s7327_s5 + $0x404] ss:$16 sps:$4 sm:$0xff]  }
 0x2ca   : > { %4947 = vmatprep.mubr.bf16.mxu1 %v5411_v18  ;;  %1865 = vmatprep.mubr.bf16.mxu0 %v5871_v22  ;;  %v5462_v18 = vld [vmem:[%s7326_s4 + $0x48] sm:$0xff]  }
 0x2cc   : > { %4938 = vmatpush3.bf16.msra.mxu1 %v6089_v46  ;;  %1840 = vmatpush1.bf16.msra.mxu0 %v5396_v19  ;;  %v5463_v19 = vld [vmem:[%s7327_s5 + $0x400] ss:$16 sps:$4 sm:$0xff]  }
 0x2cd   : > { %4939 = vmatprep.subr.bf16.mxu1 %v6095_v49  ;;  %1841 = vmatprep.subr.bf16.mxu0 %v5401_v20  ;;  %v5468_v20 = vld [vmem:[%s7327_s5 + $0x424] ss:$16 sps:$4 sm:$0xff]  }
 0x2d0   : > { %4940 = vmatpush3.bf16.msra.mxu1 %v6095_v49  ;;  %1842 = vmatpush1.bf16.msra.mxu0 %v5399_v21  ;;  %v5466_v21 = vld [vmem:[%s7327_s5 + $0x420] ss:$16 sps:$4 sm:$0xff]  }
 0x2d1   : > { %4941 = vmatprep.subr.bf16.mxu1 %v6101_v52  ;;  %1843 = vmatprep.subr.bf16.mxu0 %v5404_v23  ;;  %v5471_v23 = vld [vmem:[%s7327_s5 + $0x444] ss:$16 sps:$4 sm:$0xff]  }
 0x2d4   : > { %4942 = vmatpush3.bf16.msra.mxu1 %v6101_v52  ;;  %1844 = vmatpush1.bf16.msra.mxu0 %v5402_v24  ;;  %v5469_v24 = vld [vmem:[%s7327_s5 + $0x440] ss:$16 sps:$4 sm:$0xff]  }
 0x2d5   : > { %4943 = vmatprep.subr.bf16.mxu1 %v6107_v55  ;;  %1845 = vmatprep.subr.bf16.mxu0 %v5407_v25  ;;  %v5474_v25 = vld [vmem:[%s7327_s5 + $0x464] ss:$16 sps:$4 sm:$0xff]  }
 0x2d8   : > { %4944 = vmatpush3.bf16.msra.mxu1 %v6107_v55  ;;  %1846 = vmatpush1.bf16.msra.mxu0 %v5405_v26  ;;  %v5472_v26 = vld [vmem:[%s7327_s5 + $0x460] ss:$16 sps:$4 sm:$0xff]  }
 0x2d9   : > { %4945 = vmatprep.subr.bf16.mxu1 %v6113_v58  ;;  %1847 = vmatprep.subr.bf16.mxu0 %v5410_v29  ;;  %v5477_v29 = vld [vmem:[%s7327_s5 + $0x484] ss:$16 sps:$4 sm:$0xff]  }
 0x2dc   : > { %4946 = vmatpush3.bf16.msra.mxu1 %v6113_v58  ;;  %1848 = vmatpush1.bf16.msra.mxu0 %v5408_v30  ;;  %v5475_v30 = vld [vmem:[%s7327_s5 + $0x480] ss:$16 sps:$4 sm:$0xff]  }
 0x2dd   : > { %4951 = vmatprep.subr.bf16.mxu0 %v6074_v39  ;;  %1886 = vmatprep.subr.bf16.mxu1 %v5415_v31  ;;  %v5480_v31 = vld [vmem:[%s7327_s5 + $0x4a4] ss:$16 sps:$4 sm:$0xff]  }
 0x2df   : > { %4948 = vmatmul.mubr.bf16.vlgmr.msra.gmra.mrb[12].mxu1 %v5412_v32  ;;  %v5478_v32 = vld [vmem:[%s7327_s5 + $0x4a0] ss:$16 sps:$4 sm:$0xff]  }
 0x2e0   : > { %1887 = vmatpush1.bf16.msra.mxu1 %v5413_v35  ;;  %1918 = vmatprep.mubr.bf16.mxu1 %v5871_v22  ;;  %v5483_v35 = vld [vmem:[%s7327_s5 + $0x4c4] ss:$16 sps:$4 sm:$0xff]  }
 0x2e1   : > { %1888 = vmatprep.subr.bf16.mxu1 %v5418_v36  ;;  %v5481_v36 = vld [vmem:[%s7327_s5 + $0x4c0] ss:$16 sps:$4 sm:$0xff]  }
 0x2e4   : > { %1889 = vmatpush1.bf16.msra.mxu1 %v5416_v37  ;;  %v5486_v37 = vld [vmem:[%s7327_s5 + $0x4e4] ss:$16 sps:$4 sm:$0xff]  }
 0x2e5   : > { %1890 = vmatprep.subr.bf16.mxu1 %v5421_v38  ;;  %v5484_v38 = vld [vmem:[%s7327_s5 + $0x4e0] ss:$16 sps:$4 sm:$0xff]  }
 0x2e8   : > { %1891 = vmatpush1.bf16.msra.mxu1 %v5419_v40  ;;  %v5489_v40 = vld [vmem:[%s7327_s5 + $0x504] ss:$16 sps:$4 sm:$0xff]  }
 0x2e9   : > { %1892 = vmatprep.subr.bf16.mxu1 %v5424_v41 }
 0x2ec   : > { %1893 = vmatpush1.bf16.msra.mxu1 %v5422_v44 }
 0x2ed   : > { %1894 = vmatprep.subr.bf16.mxu1 %v5427_v45 }
 0x2f0   : > { %1895 = vmatpush1.bf16.msra.mxu1 %v5425_v47 }
 0x2f1   : > { %1896 = vmatprep.subr.bf16.mxu1 %v5430_v48 }
 0x2f4   : > { %1897 = vmatpush1.bf16.msra.mxu1 %v5428_v50  ;;  %v5487_v50 = vld [vmem:[%s7327_s5 + $0x500] ss:$16 sps:$4 sm:$0xff]  }
 0x2f5   : > { %1898 = vmatprep.subr.bf16.mxu1 %v5433_v51 }
 0x2f8   : > { %1899 = vmatpush1.bf16.msra.mxu1 %v5431_v53  ;;  %v5492_v53 = vld [vmem:[%s7327_s5 + $0x524] ss:$16 sps:$4 sm:$0xff]  }
 0x2f9   : > { %1900 = vmatprep.subr.bf16.mxu1 %v5436_v54  ;;  %v5490_v54 = vld [vmem:[%s7327_s5 + $0x520] ss:$16 sps:$4 sm:$0xff]  }
 0x2fc   : > { %1901 = vmatpush1.bf16.msra.mxu1 %v5434_v56  ;;  %v5495_v56 = vld [vmem:[%s7327_s5 + $0x544] ss:$16 sps:$4 sm:$0xff]  }
 0x2fd   : > { %2269 = vmatprep.subr.bf16.mxu1 %v5439_v57  ;;  %v5493_v57 = vld [vmem:[%s7327_s5 + $0x540] ss:$16 sps:$4 sm:$0xff]  }
 0x3b2   : > { %v4949_v59 = vpop.f32.mrb[12].mxu1 }
 0x3b3   : > { %v1623_v60 = vpop.f32.mrb[13].mxu1 }
 0x3b4   : > { %v4950_v61 = vpop.f32.mrb[14].mxu1 }
 0x3b5   : > { %v1639_v62 = vpack.c.bf16 %v4950_v61, %v4949_v59  ;;  %v1626_v63 = vpop.f32.mrb[15].mxu1  ;;  %v5498_v59 = vld [vmem:[%s7327_s5 + $0x564] ss:$16 sps:$4 sm:$0xff]   ;;  %v5496_v61 = vld [vmem:[%s7327_s5 + $0x560] ss:$16 sps:$4 sm:$0xff]  }
 0x3b6   : > { %v1638_v1 = vpack.c.bf16 %v1626_v63, %v1623_v60  ;;  %v5511_v60 = vld [vmem:[%s7326_s4 + $0x50] sm:$0xff]  }
 0x3b7   : > { %v5499_v63 = vld [vmem:[%s7327_s5 + $0x580] ss:$16 sps:$4 sm:$0xff]  }
 0x3b8   : > { %1866 = vmatmul.mubr.bf16.vlgmr.msra.gmra.mrb[4].mxu0 %v1638_v1  ;;  %1919 = vmatmul.mubr.bf16.vlgmr.msra.gmra.mrb[4].mxu1 %v1638_v1  ;;  %v5502_v1 = vld [vmem:[%s7327_s5 + $0x5a0] ss:$16 sps:$4 sm:$0xff]  }
 0x3b9   : > { %4952 = vmatpush3.bf16.msra.mxu0 %v6074_v39  ;;  %2270 = vmatpush1.bf16.msra.mxu1 %v5437_v0  ;;  %v5504_v0 = vld [vmem:[%s7327_s5 + $0x5a4] ss:$16 sps:$4 sm:$0xff]  }
 0x3ba   : > { %4953 = vmatprep.subr.bf16.mxu0 %v6076_v42  ;;  %2271 = vmatprep.subr.bf16.mxu1 %v5442_v2  ;;  %v5507_v2 = vld [vmem:[%s7327_s5 + $0x5c4] ss:$16 sps:$4 sm:$0xff]  }
 0x3bb   : > { %1875 = vmatprep.mubr.bf16.mxu0 %v5871_v22  ;;  %1928 = vmatprep.mubr.bf16.mxu1 %v5871_v22 }
 0x3bd   : > { %4954 = vmatpush3.bf16.msra.mxu0 %v6076_v42  ;;  %2272 = vmatpush1.bf16.msra.mxu1 %v5440_v3  ;;  %v5505_v3 = vld [vmem:[%s7327_s5 + $0x5c0] ss:$16 sps:$4 sm:$0xff]  }
 0x3be   : > { %4955 = vmatprep.subr.bf16.mxu0 %v6084_v43  ;;  %2273 = vmatprep.subr.bf16.mxu1 %v5445_v4  ;;  %v5510_v4 = vld [vmem:[%s7327_s5 + $0x5e4] ss:$16 sps:$4 sm:$0xff]  }
 0x3c0   : > { %1876 = vmatmul.mubr.bf16.gmra.mrb[8].mxu0 %v1639_v62  ;;  %1929 = vmatmul.mubr.bf16.gmra.mrb[8].mxu1 %v1639_v62  ;;  %v5501_v62 = vld [vmem:[%s7327_s5 + $0x584] ss:$16 sps:$4 sm:$0xff]  }
 0x3c1   : > { %4956 = vmatpush3.bf16.msra.mxu0 %v6084_v43  ;;  %2274 = vmatpush1.bf16.msra.mxu1 %v5443_v5  ;;  %v5508_v5 = vld [vmem:[%s7327_s5 + $0x5e0] ss:$16 sps:$4 sm:$0xff]  }
 0x3c2   : > { %4957 = vmatprep.subr.bf16.mxu0 %v6089_v46  ;;  %2275 = vmatprep.subr.bf16.mxu1 %v5448_v6  ;;  %v5515_v6 = vld [vmem:[%s7327_s5 + $0x50c] ss:$16 sps:$4 sm:$0xff]  }
 0x3c3   : > { %4967 = vmatprep.mubr.bf16.mxu0 %v5461_v7  ;;  %2301 = vmatprep.mubr.bf16.mxu1 %v5871_v22  ;;  %v5512_v7 = vld [vmem:[%s7326_s4 + $0x58] sm:$0xff]  }
 0x3c5   : > { %4958 = vmatpush3.bf16.msra.mxu0 %v6089_v46  ;;  %2276 = vmatpush1.bf16.msra.mxu1 %v5446_v8  ;;  %v5513_v8 = vld [vmem:[%s7327_s5 + $0x508] ss:$16 sps:$4 sm:$0xff]  }
 0x3c6   : > { %4959 = vmatprep.subr.bf16.mxu0 %v6095_v49  ;;  %2277 = vmatprep.subr.bf16.mxu1 %v5451_v9  ;;  %v5518_v9 = vld [vmem:[%s7327_s5 + $0x52c] ss:$16 sps:$4 sm:$0xff]  }
 0x3c9   : > { %4960 = vmatpush3.bf16.msra.mxu0 %v6095_v49  ;;  %2278 = vmatpush1.bf16.msra.mxu1 %v5449_v10  ;;  %v5516_v10 = vld [vmem:[%s7327_s5 + $0x528] ss:$16 sps:$4 sm:$0xff]  }
 0x3ca   : > { %4961 = vmatprep.subr.bf16.mxu0 %v6101_v52  ;;  %2279 = vmatprep.subr.bf16.mxu1 %v5454_v11  ;;  %v5521_v11 = vld [vmem:[%s7327_s5 + $0x54c] ss:$16 sps:$4 sm:$0xff]  }
 0x3cd   : > { %4962 = vmatpush3.bf16.msra.mxu0 %v6101_v52  ;;  %2280 = vmatpush1.bf16.msra.mxu1 %v5452_v12  ;;  %v5519_v12 = vld [vmem:[%s7327_s5 + $0x548] ss:$16 sps:$4 sm:$0xff]  }
 0x3ce   : > { %4963 = vmatprep.subr.bf16.mxu0 %v6107_v55  ;;  %2281 = vmatprep.subr.bf16.mxu1 %v5457_v13  ;;  %v5524_v13 = vld [vmem:[%s7327_s5 + $0x56c] ss:$16 sps:$4 sm:$0xff]  }
 0x3d1   : > { %4964 = vmatpush3.bf16.msra.mxu0 %v6107_v55  ;;  %2282 = vmatpush1.bf16.msra.mxu1 %v5455_v14  ;;  %v5522_v14 = vld [vmem:[%s7327_s5 + $0x568] ss:$16 sps:$4 sm:$0xff]  }
 0x3d2   : > { %4965 = vmatprep.subr.bf16.mxu0 %v6113_v58  ;;  %2283 = vmatprep.subr.bf16.mxu1 %v5460_v15  ;;  %v5527_v15 = vld [vmem:[%s7327_s5 + $0x58c] ss:$16 sps:$4 sm:$0xff]  }
 0x3d5   : > { %4966 = vmatpush3.bf16.msra.mxu0 %v6113_v58  ;;  %2284 = vmatpush1.bf16.msra.mxu1 %v5458_v16  ;;  %v5525_v16 = vld [vmem:[%s7327_s5 + $0x588] ss:$16 sps:$4 sm:$0xff]  }
 0x3d6   : > { %4971 = vmatprep.subr.bf16.mxu1 %v6074_v39  ;;  %2216 = vmatprep.subr.bf16.mxu0 %v5465_v17  ;;  %v5530_v17 = vld [vmem:[%s7327_s5 + $0x5ac] ss:$16 sps:$4 sm:$0xff]  }
 0x3d8   : > { %4968 = vmatmul.mubr.bf16.vlgmr.msra.gmra.mrb[16].mxu0 %v5462_v18  ;;  %v5528_v18 = vld [vmem:[%s7327_s5 + $0x5a8] ss:$16 sps:$4 sm:$0xff]  }
 0x3d9   : > { %2217 = vmatpush1.bf16.msra.mxu0 %v5463_v19  ;;  %2248 = vmatprep.mubr.bf16.mxu0 %v5871_v22  ;;  %v5533_v19 = vld [vmem:[%s7327_s5 + $0x5cc] ss:$16 sps:$4 sm:$0xff]  }
 0x3da   : > { %2218 = vmatprep.subr.bf16.mxu0 %v5468_v20  ;;  %v5531_v20 = vld [vmem:[%s7327_s5 + $0x5c8] ss:$16 sps:$4 sm:$0xff]  }
 0x3dd   : > { %2219 = vmatpush1.bf16.msra.mxu0 %v5466_v21  ;;  %v5536_v21 = vld [vmem:[%s7327_s5 + $0x5ec] ss:$16 sps:$4 sm:$0xff]  }
 0x3de   : > { %2220 = vmatprep.subr.bf16.mxu0 %v5471_v23  ;;  %v5534_v23 = vld [vmem:[%s7327_s5 + $0x5e8] ss:$16 sps:$4 sm:$0xff]  }
 0x3e1   : > { %2221 = vmatpush1.bf16.msra.mxu0 %v5469_v24  ;;  %v5539_v24 = vld [vmem:[%s7327_s5 + $0x60c] ss:$16 sps:$4 sm:$0xff]  }
 0x3e2   : > { %2222 = vmatprep.subr.bf16.mxu0 %v5474_v25 }
 0x3e5   : > { %2223 = vmatpush1.bf16.msra.mxu0 %v5472_v26 }
 0x3e6   : > { %2224 = vmatprep.subr.bf16.mxu0 %v5477_v29 }
 0x3e9   : > { %2225 = vmatpush1.bf16.msra.mxu0 %v5475_v30 }
 0x3ea   : > { %2226 = vmatprep.subr.bf16.mxu0 %v5480_v31 }
 0x3ed   : > { %2227 = vmatpush1.bf16.msra.mxu0 %v5478_v32  ;;  %v5537_v32 = vld [vmem:[%s7327_s5 + $0x608] ss:$16 sps:$4 sm:$0xff]  }
 0x3ee   : > { %2228 = vmatprep.subr.bf16.mxu0 %v5483_v35 }
 0x3f1   : > { %2229 = vmatpush1.bf16.msra.mxu0 %v5481_v36  ;;  %v5542_v36 = vld [vmem:[%s7327_s5 + $0x62c] ss:$16 sps:$4 sm:$0xff]  }
 0x3f2   : > { %2230 = vmatprep.subr.bf16.mxu0 %v5486_v37  ;;  %v5540_v37 = vld [vmem:[%s7327_s5 + $0x628] ss:$16 sps:$4 sm:$0xff]  }
 0x3f5   : > { %2231 = vmatpush1.bf16.msra.mxu0 %v5484_v38  ;;  %v5545_v38 = vld [vmem:[%s7327_s5 + $0x64c] ss:$16 sps:$4 sm:$0xff]  }
 0x3f6   : > { %2599 = vmatprep.subr.bf16.mxu0 %v5489_v40  ;;  %v5543_v40 = vld [vmem:[%s7327_s5 + $0x648] ss:$16 sps:$4 sm:$0xff]  }
 0x4ab   : > { %v4969_v41 = vpop.f32.mrb[16].mxu0 }
 0x4ac   : > { %v2006_v44 = vpop.f32.mrb[17].mxu0 }
 0x4ad   : > { %v4970_v45 = vpop.f32.mrb[18].mxu0 }
 0x4ae   : > { %v2022_v47 = vpack.c.bf16 %v4970_v45, %v4969_v41  ;;  %v2009_v48 = vpop.f32.mrb[19].mxu0  ;;  %v5548_v41 = vld [vmem:[%s7327_s5 + $0x66c] ss:$16 sps:$4 sm:$0xff]   ;;  %v5546_v45 = vld [vmem:[%s7327_s5 + $0x668] ss:$16 sps:$4 sm:$0xff]  }
 0x4af   : > { %v2021_v51 = vpack.c.bf16 %v2009_v48, %v2006_v44  ;;  %v5561_v44 = vld [vmem:[%s7326_s4 + $0x60] sm:$0xff]   ;;  %v5549_v48 = vld [vmem:[%s7327_s5 + $0x688] ss:$16 sps:$4 sm:$0xff]  }
 0x4b1   : > { %2249 = vmatmul.mubr.bf16.vlgmr.msra.gmra.mrb[4].mxu0 %v2021_v51  ;;  %2302 = vmatmul.mubr.bf16.vlgmr.msra.gmra.mrb[4].mxu1 %v2021_v51  ;;  %v5552_v51 = vld [vmem:[%s7327_s5 + $0x6a8] ss:$16 sps:$4 sm:$0xff]  }
 0x4b2   : > { %4972 = vmatpush3.bf16.msra.mxu1 %v6074_v39  ;;  %2600 = vmatpush1.bf16.msra.mxu0 %v5487_v50  ;;  %v5554_v50 = vld [vmem:[%s7327_s5 + $0x6ac] ss:$16 sps:$4 sm:$0xff]  }
 0x4b3   : > { %4973 = vmatprep.subr.bf16.mxu1 %v6076_v42  ;;  %2601 = vmatprep.subr.bf16.mxu0 %v5492_v53  ;;  %v5557_v53 = vld [vmem:[%s7327_s5 + $0x6cc] ss:$16 sps:$4 sm:$0xff]  }
 0x4b4   : > { %2258 = vmatprep.mubr.bf16.mxu0 %v5871_v22  ;;  %2311 = vmatprep.mubr.bf16.mxu1 %v5871_v22 }
 0x4b6   : > { %4974 = vmatpush3.bf16.msra.mxu1 %v6076_v42  ;;  %2602 = vmatpush1.bf16.msra.mxu0 %v5490_v54  ;;  %v5555_v54 = vld [vmem:[%s7327_s5 + $0x6c8] ss:$16 sps:$4 sm:$0xff]  }
 0x4b7   : > { %4975 = vmatprep.subr.bf16.mxu1 %v6084_v43  ;;  %2603 = vmatprep.subr.bf16.mxu0 %v5495_v56  ;;  %v5560_v56 = vld [vmem:[%s7327_s5 + $0x6ec] ss:$16 sps:$4 sm:$0xff]  }
 0x4b9   : > { %2259 = vmatmul.mubr.bf16.gmra.mrb[8].mxu0 %v2022_v47  ;;  %2312 = vmatmul.mubr.bf16.gmra.mrb[8].mxu1 %v2022_v47  ;;  %v5551_v47 = vld [vmem:[%s7327_s5 + $0x68c] ss:$16 sps:$4 sm:$0xff]  }
 0x4ba   : > { %4976 = vmatpush3.bf16.msra.mxu1 %v6084_v43  ;;  %2604 = vmatpush1.bf16.msra.mxu0 %v5493_v57  ;;  %v5558_v57 = vld [vmem:[%s7327_s5 + $0x6e8] ss:$16 sps:$4 sm:$0xff]  }
 0x4bb   : > { %4977 = vmatprep.subr.bf16.mxu1 %v6089_v46  ;;  %2605 = vmatprep.subr.bf16.mxu0 %v5498_v59  ;;  %v5565_v59 = vld [vmem:[%s7327_s5 + $0x604] ss:$16 sps:$4 sm:$0xff]  }
 0x4bc   : > { %4987 = vmatprep.mubr.bf16.mxu1 %v5511_v60  ;;  %2631 = vmatprep.mubr.bf16.mxu0 %v5871_v22  ;;  %v5562_v60 = vld [vmem:[%s7326_s4 + $0x68] sm:$0xff]  }
 0x4be   : > { %4978 = vmatpush3.bf16.msra.mxu1 %v6089_v46  ;;  %2606 = vmatpush1.bf16.msra.mxu0 %v5496_v61  ;;  %v5563_v61 = vld [vmem:[%s7327_s5 + $0x600] ss:$16 sps:$4 sm:$0xff]  }
 0x4bf   : > { %4979 = vmatprep.subr.bf16.mxu1 %v6095_v49  ;;  %2607 = vmatprep.subr.bf16.mxu0 %v5501_v62  ;;  %v5568_v62 = vld [vmem:[%s7327_s5 + $0x624] ss:$16 sps:$4 sm:$0xff]  }
 0x4c2   : > { %4980 = vmatpush3.bf16.msra.mxu1 %v6095_v49  ;;  %2608 = vmatpush1.bf16.msra.mxu0 %v5499_v63  ;;  %v5566_v63 = vld [vmem:[%s7327_s5 + $0x620] ss:$16 sps:$4 sm:$0xff]  }
 0x4c3   : > { %4981 = vmatprep.subr.bf16.mxu1 %v6101_v52  ;;  %2609 = vmatprep.subr.bf16.mxu0 %v5504_v0  ;;  %v5571_v0 = vld [vmem:[%s7327_s5 + $0x644] ss:$16 sps:$4 sm:$0xff]  }
 0x4c6   : > { %4982 = vmatpush3.bf16.msra.mxu1 %v6101_v52  ;;  %2610 = vmatpush1.bf16.msra.mxu0 %v5502_v1  ;;  %v5569_v1 = vld [vmem:[%s7327_s5 + $0x640] ss:$16 sps:$4 sm:$0xff]  }
 0x4c7   : > { %4983 = vmatprep.subr.bf16.mxu1 %v6107_v55  ;;  %2611 = vmatprep.subr.bf16.mxu0 %v5507_v2  ;;  %v5574_v2 = vld [vmem:[%s7327_s5 + $0x664] ss:$16 sps:$4 sm:$0xff]  }
 0x4ca   : > { %4984 = vmatpush3.bf16.msra.mxu1 %v6107_v55  ;;  %2612 = vmatpush1.bf16.msra.mxu0 %v5505_v3  ;;  %v5572_v3 = vld [vmem:[%s7327_s5 + $0x660] ss:$16 sps:$4 sm:$0xff]  }
 0x4cb   : > { %4985 = vmatprep.subr.bf16.mxu1 %v6113_v58  ;;  %2613 = vmatprep.subr.bf16.mxu0 %v5510_v4  ;;  %v5577_v4 = vld [vmem:[%s7327_s5 + $0x684] ss:$16 sps:$4 sm:$0xff]  }
 0x4ce   : > { %4986 = vmatpush3.bf16.msra.mxu1 %v6113_v58  ;;  %2614 = vmatpush1.bf16.msra.mxu0 %v5508_v5  ;;  %v5575_v5 = vld [vmem:[%s7327_s5 + $0x680] ss:$16 sps:$4 sm:$0xff]  }
 0x4cf   : > { %4991 = vmatprep.subr.bf16.mxu0 %v6074_v39  ;;  %2652 = vmatprep.subr.bf16.mxu1 %v5515_v6  ;;  %v5580_v6 = vld [vmem:[%s7327_s5 + $0x6a4] ss:$16 sps:$4 sm:$0xff]  }
 0x4d1   : > { %4988 = vmatmul.mubr.bf16.vlgmr.msra.gmra.mrb[16].mxu1 %v5512_v7  ;;  %v5578_v7 = vld [vmem:[%s7327_s5 + $0x6a0] ss:$16 sps:$4 sm:$0xff]  }
 0x4d2   : > { %2653 = vmatpush1.bf16.msra.mxu1 %v5513_v8  ;;  %2684 = vmatprep.mubr.bf16.mxu1 %v5871_v22  ;;  %v5583_v8 = vld [vmem:[%s7327_s5 + $0x6c4] ss:$16 sps:$4 sm:$0xff]  }
 0x4d3   : > { %2654 = vmatprep.subr.bf16.mxu1 %v5518_v9  ;;  %v5581_v9 = vld [vmem:[%s7327_s5 + $0x6c0] ss:$16 sps:$4 sm:$0xff]  }
 0x4d6   : > { %2655 = vmatpush1.bf16.msra.mxu1 %v5516_v10  ;;  %v5586_v10 = vld [vmem:[%s7327_s5 + $0x6e4] ss:$16 sps:$4 sm:$0xff]  }
 0x4d7   : > { %2656 = vmatprep.subr.bf16.mxu1 %v5521_v11  ;;  %v5584_v11 = vld [vmem:[%s7327_s5 + $0x6e0] ss:$16 sps:$4 sm:$0xff]  }
 0x4da   : > { %2657 = vmatpush1.bf16.msra.mxu1 %v5519_v12  ;;  %v5589_v12 = vld [vmem:[%s7327_s5 + $0x704] ss:$16 sps:$4 sm:$0xff]  }
 0x4db   : > { %2658 = vmatprep.subr.bf16.mxu1 %v5524_v13 }
 0x4de   : > { %2659 = vmatpush1.bf16.msra.mxu1 %v5522_v14 }
 0x4df   : > { %2660 = vmatprep.subr.bf16.mxu1 %v5527_v15 }
 0x4e2   : > { %2661 = vmatpush1.bf16.msra.mxu1 %v5525_v16 }
 0x4e3   : > { %2662 = vmatprep.subr.bf16.mxu1 %v5530_v17 }
 0x4e6   : > { %2663 = vmatpush1.bf16.msra.mxu1 %v5528_v18  ;;  %v5587_v18 = vld [vmem:[%s7327_s5 + $0x700] ss:$16 sps:$4 sm:$0xff]  }
 0x4e7   : > { %2664 = vmatprep.subr.bf16.mxu1 %v5533_v19 }
 0x4ea   : > { %2665 = vmatpush1.bf16.msra.mxu1 %v5531_v20  ;;  %v5592_v20 = vld [vmem:[%s7327_s5 + $0x724] ss:$16 sps:$4 sm:$0xff]  }
 0x4eb   : > { %2666 = vmatprep.subr.bf16.mxu1 %v5536_v21  ;;  %v5590_v21 = vld [vmem:[%s7327_s5 + $0x720] ss:$16 sps:$4 sm:$0xff]  }
 0x4ee   : > { %2667 = vmatpush1.bf16.msra.mxu1 %v5534_v23  ;;  %v5595_v23 = vld [vmem:[%s7327_s5 + $0x744] ss:$16 sps:$4 sm:$0xff]  }
 0x4ef   : > { %3035 = vmatprep.subr.bf16.mxu1 %v5539_v24  ;;  %v5593_v24 = vld [vmem:[%s7327_s5 + $0x740] ss:$16 sps:$4 sm:$0xff]  }
 0x5a4   : > { %v4989_v25 = vpop.f32.mrb[16].mxu1 }
 0x5a5   : > { %v2389_v26 = vpop.f32.mrb[17].mxu1 }
 0x5a6   : > { %v4990_v29 = vpop.f32.mrb[18].mxu1 }
 0x5a7   : > { %v2405_v30 = vpack.c.bf16 %v4990_v29, %v4989_v25  ;;  %v2392_v31 = vpop.f32.mrb[19].mxu1  ;;  %v5598_v25 = vld [vmem:[%s7327_s5 + $0x764] ss:$16 sps:$4 sm:$0xff]   ;;  %v5596_v29 = vld [vmem:[%s7327_s5 + $0x760] ss:$16 sps:$4 sm:$0xff]  }
 0x5a8   : > { %v2404_v35 = vpack.c.bf16 %v2392_v31, %v2389_v26  ;;  %v5611_v26 = vld [vmem:[%s7326_s4 + $0x70] sm:$0xff]  }
 0x5a9   : > { %v5599_v31 = vld [vmem:[%s7327_s5 + $0x780] ss:$16 sps:$4 sm:$0xff]  }
 0x5aa   : > { %2632 = vmatmul.mubr.bf16.vlgmr.msra.gmra.mrb[4].mxu0 %v2404_v35  ;;  %2685 = vmatmul.mubr.bf16.vlgmr.msra.gmra.mrb[4].mxu1 %v2404_v35  ;;  %v5602_v35 = vld [vmem:[%s7327_s5 + $0x7a0] ss:$16 sps:$4 sm:$0xff]  }
 0x5ab   : > { %4992 = vmatpush3.bf16.msra.mxu0 %v6074_v39  ;;  %3036 = vmatpush1.bf16.msra.mxu1 %v5537_v32  ;;  %v5604_v32 = vld [vmem:[%s7327_s5 + $0x7a4] ss:$16 sps:$4 sm:$0xff]  }
 0x5ac   : > { %4993 = vmatprep.subr.bf16.mxu0 %v6076_v42  ;;  %3037 = vmatprep.subr.bf16.mxu1 %v5542_v36  ;;  %v5607_v36 = vld [vmem:[%s7327_s5 + $0x7c4] ss:$16 sps:$4 sm:$0xff]  }
 0x5ad   : > { %2641 = vmatprep.mubr.bf16.mxu0 %v5871_v22  ;;  %2694 = vmatprep.mubr.bf16.mxu1 %v5871_v22 }
 0x5af   : > { %4994 = vmatpush3.bf16.msra.mxu0 %v6076_v42  ;;  %3038 = vmatpush1.bf16.msra.mxu1 %v5540_v37  ;;  %v5605_v37 = vld [vmem:[%s7327_s5 + $0x7c0] ss:$16 sps:$4 sm:$0xff]  }
 0x5b0   : > { %4995 = vmatprep.subr.bf16.mxu0 %v6084_v43  ;;  %3039 = vmatprep.subr.bf16.mxu1 %v5545_v38  ;;  %v5610_v38 = vld [vmem:[%s7327_s5 + $0x7e4] ss:$16 sps:$4 sm:$0xff]  }
 0x5b2   : > { %2642 = vmatmul.mubr.bf16.gmra.mrb[8].mxu0 %v2405_v30  ;;  %2695 = vmatmul.mubr.bf16.gmra.mrb[8].mxu1 %v2405_v30  ;;  %v5601_v30 = vld [vmem:[%s7327_s5 + $0x784] ss:$16 sps:$4 sm:$0xff]  }
 0x5b3   : > { %4996 = vmatpush3.bf16.msra.mxu0 %v6084_v43  ;;  %3040 = vmatpush1.bf16.msra.mxu1 %v5543_v40  ;;  %v5608_v40 = vld [vmem:[%s7327_s5 + $0x7e0] ss:$16 sps:$4 sm:$0xff]  }
 0x5b4   : > { %4997 = vmatprep.subr.bf16.mxu0 %v6089_v46  ;;  %3041 = vmatprep.subr.bf16.mxu1 %v5548_v41  ;;  %v5615_v41 = vld [vmem:[%s7327_s5 + $0x70c] ss:$16 sps:$4 sm:$0xff]  }
 0x5b5   : > { %5007 = vmatprep.mubr.bf16.mxu0 %v5561_v44  ;;  %3067 = vmatprep.mubr.bf16.mxu1 %v5871_v22  ;;  %v5612_v44 = vld [vmem:[%s7326_s4 + $0x78] sm:$0xff]  }
 0x5b7   : > { %4998 = vmatpush3.bf16.msra.mxu0 %v6089_v46  ;;  %3042 = vmatpush1.bf16.msra.mxu1 %v5546_v45  ;;  %v5613_v45 = vld [vmem:[%s7327_s5 + $0x708] ss:$16 sps:$4 sm:$0xff]  }
 0x5b8   : > { %4999 = vmatprep.subr.bf16.mxu0 %v6095_v49  ;;  %3043 = vmatprep.subr.bf16.mxu1 %v5551_v47  ;;  %v5618_v47 = vld [vmem:[%s7327_s5 + $0x72c] ss:$16 sps:$4 sm:$0xff]  }
 0x5bb   : > { %5000 = vmatpush3.bf16.msra.mxu0 %v6095_v49  ;;  %3044 = vmatpush1.bf16.msra.mxu1 %v5549_v48  ;;  %v5616_v48 = vld [vmem:[%s7327_s5 + $0x728] ss:$16 sps:$4 sm:$0xff]  }
 0x5bc   : > { %5001 = vmatprep.subr.bf16.mxu0 %v6101_v52  ;;  %3045 = vmatprep.subr.bf16.mxu1 %v5554_v50  ;;  %v5621_v50 = vld [vmem:[%s7327_s5 + $0x74c] ss:$16 sps:$4 sm:$0xff]  }
 0x5bf   : > { %5002 = vmatpush3.bf16.msra.mxu0 %v6101_v52  ;;  %3046 = vmatpush1.bf16.msra.mxu1 %v5552_v51  ;;  %v5619_v51 = vld [vmem:[%s7327_s5 + $0x748] ss:$16 sps:$4 sm:$0xff]  }
 0x5c0   : > { %5003 = vmatprep.subr.bf16.mxu0 %v6107_v55  ;;  %3047 = vmatprep.subr.bf16.mxu1 %v5557_v53  ;;  %v5624_v53 = vld [vmem:[%s7327_s5 + $0x76c] ss:$16 sps:$4 sm:$0xff]  }
 0x5c3   : > { %5004 = vmatpush3.bf16.msra.mxu0 %v6107_v55  ;;  %3048 = vmatpush1.bf16.msra.mxu1 %v5555_v54  ;;  %v5622_v54 = vld [vmem:[%s7327_s5 + $0x768] ss:$16 sps:$4 sm:$0xff]  }
 0x5c4   : > { %5005 = vmatprep.subr.bf16.mxu0 %v6113_v58  ;;  %3049 = vmatprep.subr.bf16.mxu1 %v5560_v56  ;;  %v5627_v56 = vld [vmem:[%s7327_s5 + $0x78c] ss:$16 sps:$4 sm:$0xff]  }
 0x5c7   : > { %5006 = vmatpush3.bf16.msra.mxu0 %v6113_v58  ;;  %3050 = vmatpush1.bf16.msra.mxu1 %v5558_v57  ;;  %v5625_v57 = vld [vmem:[%s7327_s5 + $0x788] ss:$16 sps:$4 sm:$0xff]  }
 0x5c8   : > { %5011 = vmatprep.subr.bf16.mxu1 %v6074_v39  ;;  %2982 = vmatprep.subr.bf16.mxu0 %v5565_v59  ;;  %v5630_v59 = vld [vmem:[%s7327_s5 + $0x7ac] ss:$16 sps:$4 sm:$0xff]  }
 0x5ca   : > { %5008 = vmatmul.mubr.bf16.vlgmr.msra.gmra.mrb[20].mxu0 %v5562_v60  ;;  %v5628_v60 = vld [vmem:[%s7327_s5 + $0x7a8] ss:$16 sps:$4 sm:$0xff]  }
 0x5cb   : > { %2983 = vmatpush1.bf16.msra.mxu0 %v5563_v61  ;;  %3014 = vmatprep.mubr.bf16.mxu0 %v5871_v22  ;;  %v5633_v61 = vld [vmem:[%s7327_s5 + $0x7cc] ss:$16 sps:$4 sm:$0xff]  }
 0x5cc   : > { %2984 = vmatprep.subr.bf16.mxu0 %v5568_v62  ;;  %v5631_v62 = vld [vmem:[%s7327_s5 + $0x7c8] ss:$16 sps:$4 sm:$0xff]  }
 0x5cf   : > { %2985 = vmatpush1.bf16.msra.mxu0 %v5566_v63  ;;  %v5636_v63 = vld [vmem:[%s7327_s5 + $0x7ec] ss:$16 sps:$4 sm:$0xff]  }
 0x5d0   : > { %2986 = vmatprep.subr.bf16.mxu0 %v5571_v0  ;;  %v5634_v0 = vld [vmem:[%s7327_s5 + $0x7e8] ss:$16 sps:$4 sm:$0xff]  }
 0x5d3   : > { %2987 = vmatpush1.bf16.msra.mxu0 %v5569_v1  ;;  %v5644_v1 = vld [vmem:[%s7327_s5 + $0x80c] ss:$16 sps:$4 sm:$0xff]  }
 0x5d4   : > { %2988 = vmatprep.subr.bf16.mxu0 %v5574_v2 }
 0x5d7   : > { %2989 = vmatpush1.bf16.msra.mxu0 %v5572_v3 }
 0x5d8   : > { %2990 = vmatprep.subr.bf16.mxu0 %v5577_v4 }
 0x5db   : > { %2991 = vmatpush1.bf16.msra.mxu0 %v5575_v5 }
 0x5dc   : > { %2992 = vmatprep.subr.bf16.mxu0 %v5580_v6 }
 0x5df   : > { %2993 = vmatpush1.bf16.msra.mxu0 %v5578_v7 }
 0x5e0   : > { %2994 = vmatprep.subr.bf16.mxu0 %v5583_v8  ;;  %v5642_v8 = vld [vmem:[%s7327_s5 + $0x808] ss:$16 sps:$4 sm:$0xff]  }
 0x5e3   : > { %2995 = vmatpush1.bf16.msra.mxu0 %v5581_v9  ;;  %v5650_v9 = vld [vmem:[%s7327_s5 + $0x82c] ss:$16 sps:$4 sm:$0xff]  }
 0x5e4   : > { %2996 = vmatprep.subr.bf16.mxu0 %v5586_v10  ;;  %v5648_v10 = vld [vmem:[%s7327_s5 + $0x828] ss:$16 sps:$4 sm:$0xff]  }
 0x5e7   : > { %2997 = vmatpush1.bf16.msra.mxu0 %v5584_v11  ;;  %v5637_v11 = vld [vmem:[%s7326_s4 + $0x80] sm:$0xff]  }
 0x5e8   : > { %3365 = vmatprep.subr.bf16.mxu0 %v5589_v12  ;;  %v5654_v12 = vld [vmem:[%s7327_s5 + $0x848] ss:$16 sps:$4 sm:$0xff]  }
 0x69d   : > { %v5009_v13 = vpop.f32.mrb[20].mxu0 }
 0x69e   : > { %v2772_v14 = vpop.f32.mrb[21].mxu0 }
 0x69f   : > { %v5010_v15 = vpop.f32.mrb[22].mxu0 }
 0x6a0   : > { %v2788_v16 = vpack.c.bf16 %v5010_v15, %v5009_v13  ;;  %v2775_v17 = vpop.f32.mrb[23].mxu0  ;;  %v5660_v13 = vld [vmem:[%s7327_s5 + $0x868] ss:$16 sps:$4 sm:$0xff]   ;;  %v5674_v15 = vld [vmem:[%s7327_s5 + $0x8ac] ss:$16 sps:$4 sm:$0xff]  }
 0x6a1   : > { %v2787_v19 = vpack.c.bf16 %v2775_v17, %v2772_v14  ;;  %v5668_v14 = vld [vmem:[%s7327_s5 + $0x88c] ss:$16 sps:$4 sm:$0xff]   ;;  %v5641_v17 = vld [vmem:[%s7327_s5 + $0x804] ss:$16 sps:$4 sm:$0xff]  }
 0x6a3   : > { %3015 = vmatmul.mubr.bf16.vlgmr.msra.gmra.mrb[4].mxu0 %v2787_v19  ;;  %3068 = vmatmul.mubr.bf16.vlgmr.msra.gmra.mrb[4].mxu1 %v2787_v19  ;;  %v5645_v19 = vld [vmem:[%s7327_s5 + $0x820] ss:$16 sps:$4 sm:$0xff]  }
 0x6a4   : > { %5012 = vmatpush3.bf16.msra.mxu1 %v6074_v39  ;;  %3366 = vmatpush1.bf16.msra.mxu0 %v5587_v18  ;;  %v5639_v18 = vld [vmem:[%s7327_s5 + $0x800] ss:$16 sps:$4 sm:$0xff]  }
 0x6a5   : > { %5013 = vmatprep.subr.bf16.mxu1 %v6076_v42  ;;  %3367 = vmatprep.subr.bf16.mxu0 %v5592_v20  ;;  %v5651_v20 = vld [vmem:[%s7327_s5 + $0x840] ss:$16 sps:$4 sm:$0xff]  }
 0x6a6   : > { %3024 = vmatprep.mubr.bf16.mxu0 %v5871_v22  ;;  %3077 = vmatprep.mubr.bf16.mxu1 %v5871_v22 }
 0x6a8   : > { %5014 = vmatpush3.bf16.msra.mxu1 %v6076_v42  ;;  %3368 = vmatpush1.bf16.msra.mxu0 %v5590_v21  ;;  %v5659_v21 = vld [vmem:[%s7327_s5 + $0x864] ss:$16 sps:$4 sm:$0xff]  }
 0x6a9   : > { %5015 = vmatprep.subr.bf16.mxu1 %v6084_v43  ;;  %3369 = vmatprep.subr.bf16.mxu0 %v5595_v23  ;;  %v5657_v23 = vld [vmem:[%s7327_s5 + $0x860] ss:$16 sps:$4 sm:$0xff]  }
 0x6ab   : > { %3025 = vmatmul.mubr.bf16.gmra.mrb[8].mxu0 %v2788_v16  ;;  %3078 = vmatmul.mubr.bf16.gmra.mrb[8].mxu1 %v2788_v16  ;;  %v5680_v16 = vld [vmem:[%s7327_s5 + $0x8cc] ss:$16 sps:$4 sm:$0xff]  }
 0x6ac   : > { %5016 = vmatpush3.bf16.msra.mxu1 %v6084_v43  ;;  %3370 = vmatpush1.bf16.msra.mxu0 %v5593_v24  ;;  %v5665_v24 = vld [vmem:[%s7327_s5 + $0x884] ss:$16 sps:$4 sm:$0xff]  }
 0x6ad   : > { %5017 = vmatprep.subr.bf16.mxu1 %v6089_v46  ;;  %3371 = vmatprep.subr.bf16.mxu0 %v5598_v25  ;;  %v5663_v25 = vld [vmem:[%s7327_s5 + $0x880] ss:$16 sps:$4 sm:$0xff]  }
 0x6ae   : > { %5027 = vmatprep.mubr.bf16.mxu1 %v5611_v26  ;;  %3397 = vmatprep.mubr.bf16.mxu0 %v5871_v22  ;;  %v5671_v26 = vld [vmem:[%s7327_s5 + $0x8a4] ss:$16 sps:$4 sm:$0xff]  }
 0x6b0   : > { %5018 = vmatpush3.bf16.msra.mxu1 %v6089_v46  ;;  %3372 = vmatpush1.bf16.msra.mxu0 %v5596_v29  ;;  %v5669_v29 = vld [vmem:[%s7327_s5 + $0x8a0] ss:$16 sps:$4 sm:$0xff]  }
 0x6b1   : > { %5019 = vmatprep.subr.bf16.mxu1 %v6095_v49  ;;  %3373 = vmatprep.subr.bf16.mxu0 %v5601_v30  ;;  %v5677_v30 = vld [vmem:[%s7327_s5 + $0x8c4] ss:$16 sps:$4 sm:$0xff]  }
 0x6b4   : > { %5020 = vmatpush3.bf16.msra.mxu1 %v6095_v49  ;;  %3374 = vmatpush1.bf16.msra.mxu0 %v5599_v31  ;;  %v5675_v31 = vld [vmem:[%s7327_s5 + $0x8c0] ss:$16 sps:$4 sm:$0xff]  }
 0x6b5   : > { %5021 = vmatprep.subr.bf16.mxu1 %v6101_v52  ;;  %3375 = vmatprep.subr.bf16.mxu0 %v5604_v32  ;;  %v5683_v32 = vld [vmem:[%s7327_s5 + $0x8e4] ss:$16 sps:$4 sm:$0xff]  }
 0x6b8   : > { %5022 = vmatpush3.bf16.msra.mxu1 %v6101_v52  ;;  %3376 = vmatpush1.bf16.msra.mxu0 %v5602_v35  ;;  %v5686_v35 = vld [vmem:[%s7327_s5 + $0x8ec] ss:$16 sps:$4 sm:$0xff]  }
 0x6b9   : > { %5023 = vmatprep.subr.bf16.mxu1 %v6107_v55  ;;  %3377 = vmatprep.subr.bf16.mxu0 %v5607_v36  ;;  %v5681_v36 = vld [vmem:[%s7327_s5 + $0x8e0] ss:$16 sps:$4 sm:$0xff]  }
 0x6bc   : > { %5024 = vmatpush3.bf16.msra.mxu1 %v6107_v55  ;;  %3378 = vmatpush1.bf16.msra.mxu0 %v5605_v37  ;;  %v5684_v37 = vld [vmem:[%s7327_s5 + $0x8e8] ss:$16 sps:$4 sm:$0xff]  }
 0x6bd   : > { %5025 = vmatprep.subr.bf16.mxu1 %v6113_v58  ;;  %3379 = vmatprep.subr.bf16.mxu0 %v5610_v38 }
 0x6c0   : > { %5026 = vmatpush3.bf16.msra.mxu1 %v6113_v58  ;;  %3380 = vmatpush1.bf16.msra.mxu0 %v5608_v40 }
 0x6c1   : > { %5031 = vmatprep.subr.bf16.mxu0 %v6074_v39  ;;  %3418 = vmatprep.subr.bf16.mxu1 %v5615_v41 }
 0x6c3   : > { %5028 = vmatmul.mubr.bf16.vlgmr.msra.gmra.mrb[20].mxu1 %v5612_v44 }
 0x6c4   : > { %3419 = vmatpush1.bf16.msra.mxu1 %v5613_v45  ;;  %3450 = vmatprep.mubr.bf16.mxu1 %v5871_v22 }
 0x6c5   : > { %3420 = vmatprep.subr.bf16.mxu1 %v5618_v47 }
 0x6c8   : > { %3421 = vmatpush1.bf16.msra.mxu1 %v5616_v48  ;;  %v3870_v48 = vld [vmem:[%s5980_s24] sm:$0xff] }
 0x6c9   : > { %3422 = vmatprep.subr.bf16.mxu1 %v5621_v50  ;;  %v3871_v50 = vld [vmem:[%s5980_s24 + $0x8] sm:$0xff] }
 0x6cc   : > { %3423 = vmatpush1.bf16.msra.mxu1 %v5619_v51 }
 0x6cd   : > { %3424 = vmatprep.subr.bf16.mxu1 %v5624_v53 }
 0x6d0   : > { %3425 = vmatpush1.bf16.msra.mxu1 %v5622_v54  ;;  %v3874_v54 = vld [vmem:[%s5980_s24 + $0x20] sm:$0xff] }
 0x6d1   : > { %3426 = vmatprep.subr.bf16.mxu1 %v5627_v56 }
 0x6d4   : > { %3427 = vmatpush1.bf16.msra.mxu1 %v5625_v57 }
 0x6d5   : > { %3428 = vmatprep.subr.bf16.mxu1 %v5630_v59 }
 0x6d8   : > { %3429 = vmatpush1.bf16.msra.mxu1 %v5628_v60  ;;  %v3875_v60 = vld [vmem:[%s5980_s24 + $0x28] sm:$0xff] }
 0x6d9   : > { %3430 = vmatprep.subr.bf16.mxu1 %v5633_v61 }
 0x6dc   : > { %3431 = vmatpush1.bf16.msra.mxu1 %v5631_v62 }
 0x6dd   : > { %3432 = vmatprep.subr.bf16.mxu1 %v5636_v63 }
 0x6e0   : > { %3433 = vmatpush1.bf16.msra.mxu1 %v5634_v0 }
 0x6e1   : > { %3801 = vmatprep.subr.bf16.mxu1 %v5644_v1 }
 0x796   : > { %v5029_v2 = vpop.f32.mrb[20].mxu1 }
 0x797   : > { %v3155_v3 = vpop.f32.mrb[21].mxu1 }
 0x798   : > { %v5030_v4 = vpop.f32.mrb[22].mxu1 }
 0x799   : > { %v3171_v5 = vpack.c.bf16 %v5030_v4, %v5029_v2  ;;  %v3158_v6 = vpop.f32.mrb[23].mxu1  ;;  %v3873_v4 = vld [vmem:[%s5980_s24 + $0x18] sm:$0xff] }
 0x79a   : > { %v3170_v7 = vpack.c.bf16 %v3158_v6, %v3155_v3  ;;  %v3872_v6 = vld [vmem:[%s5980_s24 + $0x10] sm:$0xff] }
 0x79c   : > { %3398 = vmatmul.mubr.bf16.vlgmr.msra.gmra.mrb[4].mxu0 %v3170_v7  ;;  %3451 = vmatmul.mubr.bf16.vlgmr.msra.gmra.mrb[4].mxu1 %v3170_v7 }
 0x79d   : > { %5032 = vmatpush3.bf16.msra.mxu0 %v6074_v39  ;;  %3407 = vmatprep.mubr.bf16.mxu0 %v5871_v22  ;;  %v5656_v39 = vld [vmem:[%s7327_s5 + $0x84c] ss:$16 sps:$4 sm:$0xff]  }
 0x79e   : > { %5033 = vmatprep.subr.bf16.mxu0 %v6076_v42  ;;  %3460 = vmatprep.mubr.bf16.mxu1 %v5871_v22 }
 0x79f   : > { %3802 = vmatpush1.bf16.msra.mxu1 %v5642_v8 }
 0x7a0   : > { %3803 = vmatprep.subr.bf16.mxu1 %v5650_v9  ;;  %v3878_v9 = vld [vmem:[%s5980_s24 + $0x40] sm:$0xff] }
 0x7a1   : > { %5034 = vmatpush3.bf16.msra.mxu0 %v6076_v42  ;;  %v5662_v42 = vld [vmem:[%s7327_s5 + $0x86c] ss:$16 sps:$4 sm:$0xff]  }
 0x7a2   : > { %5035 = vmatprep.subr.bf16.mxu0 %v6084_v43 }
 0x7a3   : > { %3804 = vmatpush1.bf16.msra.mxu1 %v5648_v10 }
 0x7a4   : > { %3408 = vmatmul.mubr.bf16.gmra.mrb[8].mxu0 %v3171_v5  ;;  %3461 = vmatmul.mubr.bf16.gmra.mrb[8].mxu1 %v3171_v5 }
 0x7a5   : > { %5036 = vmatpush3.bf16.msra.mxu0 %v6084_v43  ;;  %5047 = vmatprep.mubr.bf16.mxu0 %v5637_v11  ;;  %v5666_v43 = vld [vmem:[%s7327_s5 + $0x888] ss:$16 sps:$4 sm:$0xff]  }
 0x7a6   : > { %5037 = vmatprep.subr.bf16.mxu0 %v6089_v46  ;;  %3805 = vmatprep.subr.bf16.mxu1 %v5656_v39  ;;  %v3879_v11 = vld [vmem:[%s5980_s24 + $0x48] sm:$0xff] }
 0x7a7   : > { %3806 = vmatpush1.bf16.msra.mxu1 %v5654_v12  ;;  %3833 = vmatprep.mubr.bf16.mxu1 %v5871_v22 }
 0x7a8   : > { %3807 = vmatprep.subr.bf16.mxu1 %v5662_v42 }
 0x7a9   : > { %5038 = vmatpush3.bf16.msra.mxu0 %v6089_v46  ;;  %v5672_v46 = vld [vmem:[%s7327_s5 + $0x8a8] ss:$16 sps:$4 sm:$0xff]  }
 0x7aa   : > { %5039 = vmatprep.subr.bf16.mxu0 %v6095_v49 }
 0x7ab   : > { %3808 = vmatpush1.bf16.msra.mxu1 %v5660_v13  ;;  %v3882_v13 = vld [vmem:[%s5980_s24 + $0x60] sm:$0xff] }
 0x7ac   : > { %3809 = vmatprep.subr.bf16.mxu1 %v5668_v14  ;;  %v3877_v14 = vld [vmem:[%s5980_s24 + $0x38] sm:$0xff] }
 0x7ad   : > { %5040 = vmatpush3.bf16.msra.mxu0 %v6095_v49  ;;  %v5678_v49 = vld [vmem:[%s7327_s5 + $0x8c8] ss:$16 sps:$4 sm:$0xff]  }
 0x7ae   : > { %5041 = vmatprep.subr.bf16.mxu0 %v6101_v52 }
 0x7af   : > { %3810 = vmatpush1.bf16.msra.mxu1 %v5666_v43 }
 0x7b0   : > { %3811 = vmatprep.subr.bf16.mxu1 %v5674_v15 }
 0x7b1   : > { %5042 = vmatpush3.bf16.msra.mxu0 %v6101_v52  ;;  %v5638_v52 = vld [vmem:[%s7326_s4 + $0x88] sm:$0xff]  }
 0x7b2   : > { %5043 = vmatprep.subr.bf16.mxu0 %v6107_v55 }
 0x7b3   : > { %3812 = vmatpush1.bf16.msra.mxu1 %v5672_v46 }
 0x7b4   : > { %3813 = vmatprep.subr.bf16.mxu1 %v5680_v16  ;;  %v3876_v16 = vld [vmem:[%s5980_s24 + $0x30] sm:$0xff] }
 0x7b5   : > { %5044 = vmatpush3.bf16.msra.mxu0 %v6107_v55  ;;  %v5647_v55 = vld [vmem:[%s7327_s5 + $0x824] ss:$16 sps:$4 sm:$0xff]  }
 0x7b6   : > { %5045 = vmatprep.subr.bf16.mxu0 %v6113_v58 }
 0x7b7   : > { %3814 = vmatpush1.bf16.msra.mxu1 %v5678_v49 }
 0x7b8   : > { %3815 = vmatprep.subr.bf16.mxu1 %v5686_v35 }
 0x7b9   : > { %5046 = vmatpush3.bf16.msra.mxu0 %v6113_v58  ;;  %v5653_v58 = vld [vmem:[%s7327_s5 + $0x844] ss:$16 sps:$4 sm:$0xff]  }
 0x7ba   : > { %3748 = vmatprep.subr.bf16.mxu0 %v5641_v17 }
 0x7bb   : > { %3816 = vmatpush1.bf16.msra.mxu1 %v5684_v37 }
 0x7bc   : > { %5048 = vmatmul.mubr.bf16.vlgmr.msra.gmra.mrb[24].mxu0 %v5638_v52 }
 0x7bd   : > { %3749 = vmatpush1.bf16.msra.mxu0 %v5639_v18  ;;  %3780 = vmatprep.mubr.bf16.mxu0 %v5871_v22  ;;  %v3883_v18 = vld [vmem:[%s5980_s24 + $0x68] sm:$0xff] }
 0x7be   : > { %3750 = vmatprep.subr.bf16.mxu0 %v5647_v55 }
 0x7c1   : > { %3751 = vmatpush1.bf16.msra.mxu0 %v5645_v19 }
 0x7c2   : > { %3752 = vmatprep.subr.bf16.mxu0 %v5653_v58 }
 0x7c5   : > { %3753 = vmatpush1.bf16.msra.mxu0 %v5651_v20 }
 0x7c6   : > { %3754 = vmatprep.subr.bf16.mxu0 %v5659_v21 }
 0x7c9   : > { %3755 = vmatpush1.bf16.msra.mxu0 %v5657_v23 }
 0x7ca   : > { %3756 = vmatprep.subr.bf16.mxu0 %v5665_v24 }
 0x7cd   : > { %3757 = vmatpush1.bf16.msra.mxu0 %v5663_v25 }
 0x7ce   : > { %3758 = vmatprep.subr.bf16.mxu0 %v5671_v26  ;;  %v3881_v26 = vld [vmem:[%s5980_s24 + $0x58] sm:$0xff] }
 0x7d1   : > { %3759 = vmatpush1.bf16.msra.mxu0 %v5669_v29 }
 0x7d2   : > { %3760 = vmatprep.subr.bf16.mxu0 %v5677_v30 }
 0x7d5   : > { %3761 = vmatpush1.bf16.msra.mxu0 %v5675_v31 }
 0x7d6   : > { %3762 = vmatprep.subr.bf16.mxu0 %v5683_v32 }
 0x7d9   : > { %3763 = vmatpush1.bf16.msra.mxu0 %v5681_v36 }
 0x88f   : > { %v5049_v38 = vpop.f32.mrb[24].mxu0 }
 0x890   : > { %v3538_v40 = vpop.f32.mrb[25].mxu0 }
 0x891   : > { %v5050_v41 = vpop.f32.mrb[26].mxu0 }
 0x892   : > { %v3554_v44 = vpack.c.bf16 %v5050_v41, %v5049_v38  ;;  %v3541_v45 = vpop.f32.mrb[27].mxu0  ;;  %v3880_v41 = vld [vmem:[%s5980_s24 + $0x50] sm:$0xff] }
 0x893   : > { %v3553_v47 = vpack.c.bf16 %v3541_v45, %v3538_v40 }
 0x895   : > { %3781 = vmatmul.mubr.bf16.vlgmr.msra.gmra.mrb[4].mxu0 %v3553_v47  ;;  %3834 = vmatmul.mubr.bf16.vlgmr.msra.gmra.mrb[4].mxu1 %v3553_v47 }
 0x896   : > { %3790 = vmatprep.mubr.bf16.mxu0 %v5871_v22  ;;  %3843 = vmatprep.mubr.bf16.mxu1 %v5871_v22 }
 0x89d   : > { %3791 = vmatmul.mubr.bf16.gmra.mrb[8].mxu0 %v3554_v44  ;;  %3844 = vmatmul.mubr.bf16.gmra.mrb[8].mxu1 %v3554_v44 }
 0x968   : > { %v3782_v51 = vpop.f32.mrb[4].mxu0  ;;  %v3835_v53 = vpop.f32.mrb[4].mxu1 }
 0x969   : > { %v3886_v56 = vadd.f32 %v3870_v48, %v3782_v51  ;;  %v3784_v57 = vpop.f32.mrb[5].mxu0  ;;  %v3837_v59 = vpop.f32.mrb[5].mxu1  ;;  %v3888_v39 = vadd.f32 %v3872_v6, %v3835_v53  ;;  %v3884_v53 = vld [vmem:[%s5980_s24 + $0x70] sm:$0xff] }
 0x96a   : > { %v3887_v61 = vadd.f32 %v3871_v50, %v3784_v57  ;;  %v3786_v62 = vpop.f32.mrb[6].mxu0  ;;  %v3839_v63 = vpop.f32.mrb[6].mxu1  ;;  %v3889_v10 = vadd.f32 %v3873_v4, %v3837_v59 }
 0x96b   : > { %v4757_v0 = vmul.f32 -1.442695, %v3886_v56  ;;  %v3890_v22 = vadd.f32 %v3874_v54, %v3786_v62  ;;  %v3788_v1 = vpop.f32.mrb[7].mxu0  ;;  %v3841_v2 = vpop.f32.mrb[7].mxu1  ;;  %v3892_v25 = vadd.f32 %v3876_v16, %v3839_v63  ;;  %v3885_v54 = vld [vmem:[%s5980_s24 + $0x78] sm:$0xff]  ;;  %s5872_s24 = smov [#allocation6]  }
 0x96c   : > { %v4761_v3 = vmul.f32 -1.442695, %v3887_v61  ;;  %v3891_v5 = vadd.f32 %v3875_v60, %v3788_v1  ;;  %v4765_v55 = vmul.f32 -1.442695, %v3889_v10  ;;  %v3893_v23 = vadd.f32 %v3877_v14, %v3841_v2  ;;  %s4045_s21 = sshll.u32 %s5872_s24, 4  ;;  %s4046_s21 = int_to_ptr.vmem [resolvable:$true] %s4045_s21 }
 0x96d   : > { %5687 = vpow2.f32 %v4757_v0  ;;  %v4758_v7 = vmul.f32 -1.442695, %v3890_v22  ;;  %v425_v0 = vld [vmem:[#allocation3] sm:$0xff]  ;;  %s5751_s19 = scalar_lea.vmem %s4046_s21, 512  ;;  %p5758_p1 = scmp.lt.s32.totalorder %s4046_s21, %s4046_s21 }
 0x96e   : > { %5689 = vpow2.f32 %v4761_v3  ;;  %v4762_v8 = vmul.f32 -1.442695, %v3891_v5  ;;  %v4766_v36 = vmul.f32 -1.442695, %v3893_v23  ;;  %v429_v5 = vmul.f32 %v425_v0, %v6064_v28  ;;  %p5752_p12 = scmp.ne.s32.totalorder %s4046_s21, %s5751_s19  ;;  %p5759_p3 = scmp.lt.s32.totalorder %s5751_s19, %s5751_s19 }
 0x96f   : > { %5691 = vpow2.f32 %v4758_v7 }
 0x970   : > { %v3792_v12 = vpop.f32.mrb[8].mxu0  ;;  %v3845_v42 = vpop.f32.mrb[8].mxu1  ;;  %5693 = vpow2.f32 %v4762_v8  ;;  %v426_v8 = vld [vmem:[#allocation3 + $0x8] sm:$0xff]  ;;  %p5753_p13 = pnand %p5752_p12, %p177_p2  ;;  %p5760_p4 = por %p5759_p3, %p5758_p1 }
 0x971   : > { %v3894_v43 = vadd.f32 %v3878_v9, %v3792_v12  ;;  %v3794_v15 = vpop.f32.mrb[9].mxu0  ;;  %v3847_v46 = vpop.f32.mrb[9].mxu1  ;;  %5695 = vtanh.f32 %v3888_v39  ;;  %v3896_v51 = vadd.f32 %v3880_v41, %v3845_v42 }
 0x972   : > { %v3895_v49 = vadd.f32 %v3879_v11, %v3794_v15  ;;  %v3796_v17 = vpop.f32.mrb[10].mxu0  ;;  %v3849_v52 = vpop.f32.mrb[10].mxu1  ;;  %v3897_v37 = vadd.f32 %v3881_v26, %v3847_v46  ;;  %v427_v46 = vld [vmem:[#allocation3 + $0x10] sm:$0xff]  ;;  %p5754_p0 = pneg %p5753_p13 }
 0x973   : > { %v4759_v19 = vmul.f32 -1.442695, %v3894_v43  ;;  %v3898_v58 = vadd.f32 %v3882_v13, %v3796_v17  ;;  %v3798_v20 = vpop.f32.mrb[11].mxu0  ;;  %v3851_v21 = vpop.f32.mrb[11].mxu1  ;;  %v3900_v61 = vadd.f32 %v3884_v53, %v3849_v52  ;;  %v430_v13 = vmul.f32 %v426_v8, %v6068_v34 }
 0x974   : > { %v4763_v24 = vmul.f32 -1.442695, %v3895_v49  ;;  %v3899_v30 = vadd.f32 %v3883_v18, %v3798_v20  ;;  %v4767_v48 = vmul.f32 -1.442695, %v3897_v37  ;;  %v3901_v62 = vadd.f32 %v3885_v54, %v3851_v21  ;;  %p5761_p7 = pnand %p5760_p4, %p5754_p0 }
 0x975   : > { %5697 = vpow2.f32 %v4759_v19  ;;  %v4760_v29 = vmul.f32 -1.442695, %v3898_v58 }
 0x976   : > { %5699 = vpow2.f32 %v4763_v24  ;;  %v4764_v44 = vmul.f32 -1.442695, %v3899_v30  ;;  %v4768_v6 = vmul.f32 -1.442695, %v3901_v62 }
 0x977   : > { %v5688_v31 = vpop.eup %5687  ;;  %5701 = vpow2.f32 %v4765_v55  ;;  %v431_v55 = vmul.f32 %v427_v46, %v6062_v27 }
 0x978   : > { %v5690_v32 = vpop.eup %5689  ;;  %v3914_v35 = vadd.f32 1.0, %v5688_v31  ;;  %5703 = vpow2.f32 %v4760_v29  ;;  %v428_v29 = vld [vmem:[#allocation3 + $0x18] sm:$0xff] }
 0x979   : > { %v3938_v38 = vadd.f32 1.0, %v5690_v32  ;;  %5705 = vtanh.f32 %v3892_v25  ;;  %v5692_v40 = vpop.eup %5691  ;;  %v432_v32 = vmul.f32 %v428_v29, %v6066_v33 }
 0x97a   : > { %5707 = vrcp.f32 %v3914_v35  ;;  %v3915_v45 = vadd.f32 1.0, %v5692_v40  ;;  %v5694_v47 = vpop.eup %5693 }
 0x97b   : > { %5709 = vrcp.f32 %v3938_v38  ;;  %v3939_v50 = vadd.f32 1.0, %v5694_v47  ;;  %v5696_v56 = vpop.eup %5695 }
 0x97c   : > { %5711 = vpow2.f32 %v4766_v36 }
 0x97d   : > { %5713 = vrcp.f32 %v3915_v45 }
 0x97e   : > { %5715 = vpow2.f32 %v4764_v44 }
 0x97f   : > { %v5698_v57 = vpop.eup %5697  ;;  %5717 = vrcp.f32 %v3939_v50 }
 0x980   : > { %v5700_v59 = vpop.eup %5699  ;;  %v3916_v60 = vadd.f32 1.0, %v5698_v57  ;;  %5719 = vpow2.f32 %v4767_v48 }
 0x981   : > { %v5702_v63 = vpop.eup %5701  ;;  %5721 = vtanh.f32 %v3896_v51  ;;  %v3940_v22 = vadd.f32 1.0, %v5700_v59 }
 0x982   : > { %v5704_v1 = vpop.eup %5703  ;;  %5723 = vrcp.f32 %v3916_v60  ;;  %v3978_v10 = vadd.f32 1.0, %v5702_v63 }
 0x983   : > { %v5706_v2 = vpop.eup %5705  ;;  %5725 = vrcp.f32 %v3940_v22  ;;  %v3917_v3 = vadd.f32 1.0, %v5704_v1 }
 0x984   : > { %v5708_v4 = vpop.eup %5707  ;;  %5727 = vtanh.f32 %v3900_v61 }
 0x985   : > { %v5710_v7 = vpop.eup %5709  ;;  %v3958_v9 = vmul.f32 %v5708_v4, %v5696_v56  ;;  %5729 = vrcp.f32 %v3917_v3 }
 0x986   : > { %v5712_v11 = vpop.eup %5711  ;;  %v3950_v39 = vmul.f32 %v5710_v7, %v429_v5  ;;  %5731 = vpow2.f32 %v4768_v6 }
 0x987   : > { %v5714_v12 = vpop.eup %5713  ;;  %5733 = vrcp.f32 %v3978_v10  ;;  %v3979_v28 = vadd.f32 1.0, %v5712_v11 }
 0x988   : > { %v5716_v42 = vpop.eup %5715  ;;  %v3962_v14 = vadd.f32 %v3958_v9, %v3950_v39  ;;  %v3959_v43 = vmul.f32 %v5714_v12, %v5706_v2 }
 0x989   : > { %v5718_v15 = vpop.eup %5717  ;;  %v3941_v16 = vadd.f32 1.0, %v5716_v42 }
 0x98a   : > { %v5720_v49 = vpop.eup %5719  ;;  %5735 = vtanh.f32 %v3962_v14  ;;  %4002 = vst [vmem:[#allocation3] sm:$0xff] %v3962_v14  ;;  %4014 = vst [vmem:[#allocation8] sm:$0xff] %v3962_v14  ;;  %v3951_v17 = vmul.f32 %v5718_v15, %v430_v13 }
 0x98b   : > { %v5722_v52 = vpop.eup %5721  ;;  %5737 = vrcp.f32 %v3941_v16  ;;  %v3980_v20 = vadd.f32 1.0, %v5720_v49 }
 0x98c   : > { %v5724_v18 = vpop.eup %5723  ;;  %v3963_v19 = vadd.f32 %v3959_v43, %v3951_v17  ;;  %5739 = vrcp.f32 %v3979_v28 }
 0x98d   : > { %v5726_v34 = vpop.eup %5725  ;;  %v3960_v58 = vmul.f32 %v5724_v18, %v5722_v52 }
 0x98e   : > { %v5728_v21 = vpop.eup %5727  ;;  %5741 = vtanh.f32 %v3963_v19  ;;  %4003 = vst [vmem:[#allocation3 + $0x8] sm:$0xff] %v3963_v19  ;;  %4015 = vst [vmem:[#allocation8 + $0x8] sm:$0xff] %v3963_v19  ;;  %v3952_v23 = vmul.f32 %v5726_v34, %v431_v55 }
 0x98f   : > { %v5730_v24 = vpop.eup %5729  ;;  %5743 = vrcp.f32 %v3980_v20 }
 0x990   : > { %v3964_v25 = vadd.f32 %v3960_v58, %v3952_v23  ;;  %v3961_v26 = vmul.f32 %v5730_v24, %v5728_v21  ;;  %v5732_v30 = vpop.eup %5731 }
 0x991   : > { %v5734_v27 = vpop.eup %5733  ;;  %v3981_v37 = vadd.f32 1.0, %v5732_v30 }
 0x992   : > { %5745 = vtanh.f32 %v3964_v25  ;;  %4004 = vst [vmem:[#allocation3 + $0x10] sm:$0xff] %v3964_v25  ;;  %4016 = vst [vmem:[#allocation8 + $0x10] sm:$0xff] %v3964_v25 }
 0x993   : > { %5747 = vrcp.f32 %v3981_v37 }
 0x994   : > { %v5736_v31 = vpop.eup %5735 }
 0x995   : > { %v5738_v35 = vpop.eup %5737  ;;  %v3994_v36 = vmul.f32 %v5736_v31, %v5734_v27 }
 0x996   : > { %v3953_v38 = vmul.f32 %v5738_v35, %v432_v32  ;;  %v5740_v40 = vpop.eup %5739 }
 0x997   : > { %3998 = vst [vmem:[#allocation2] sm:$0xff] %v3994_v36  ;;  %4006 = vst [vmem:[%s5987_s12] sm:$0xff] %v3994_v36 }
 0x998   : > { %4010 = vst [vmem:[#allocation6] sm:$0xff] %v3994_v36  ;;  %v5742_v41 = vpop.eup %5741  ;;  %v3965_v44 = vadd.f32 %v3961_v26, %v3953_v38 }
 0x999   : > { %v3995_v45 = vmul.f32 %v5742_v41, %v5740_v40  ;;  %v5744_v33 = vpop.eup %5743 }
 0x99a   : > { %5749 = vtanh.f32 %v3965_v44  ;;  %4005 = vst [vmem:[#allocation3 + $0x18] sm:$0xff] %v3965_v44  ;;  %4017 = vst [vmem:[#allocation8 + $0x18] sm:$0xff] %v3965_v44 }
 0x99b   : > { %3999 = vst [vmem:[#allocation2 + $0x8] sm:$0xff] %v3995_v45  ;;  %4007 = vst [vmem:[%s5987_s12 + $0x8] sm:$0xff] %v3995_v45 }
 0x99c   : > { %4011 = vst [vmem:[#allocation6 + $0x8] sm:$0xff] %v3995_v45  ;;  %v5746_v47 = vpop.eup %5745 }
 0x99d   : > { %v3996_v48 = vmul.f32 %v5746_v47, %v5744_v33  ;;  %v5748_v50 = vpop.eup %5747 }
 0x99f   : > { %4000 = vst [vmem:[#allocation2 + $0x10] sm:$0xff] %v3996_v48  ;;  %4008 = vst [vmem:[%s5987_s12 + $0x10] sm:$0xff] %v3996_v48 }
 0x9a0   : > { %4012 = vst [vmem:[#allocation6 + $0x10] sm:$0xff] %v3996_v48 }
 0x9a4   : > { %v5750_v51 = vpop.eup %5749 }
 0x9a5   : > { %v3997_v53 = vmul.f32 %v5750_v51, %v5748_v50 }
 0x9a7   : > { %4001 = vst [vmem:[#allocation2 + $0x18] sm:$0xff] %v3997_v53  ;;  %4009 = vst [vmem:[%s5987_s12 + $0x18] sm:$0xff] %v3997_v53 }
 0x9a8   : > { %4013 = vst [vmem:[#allocation6 + $0x18] sm:$0xff] %v3997_v53 }
 0x9a9   : > { %5764 = shalt.err (!%p5761_p7)
}
 0x9aa   : > { %s5765_s18 = scalar_lea.hbm %s7329_s7, 512 }
 0x9ab   : > { %p5766_p8 = scmp.ne.s32.totalorder %s7329_s7, %s5765_s18  ;;  %p5771_p11 = scmp.lt.u32.totalorder %s5765_s18, %s7329_s7 }
 0x9ad   : > { %p5767_p9 = pnand %p5766_p8, %p177_p2 }
 0x9af   : > { %p5768_p10 = pneg %p5767_p9 }
 0x9b1   : > { %p5773_p12 = pnand %p5771_p11, %p5768_p10 }
 0x9b3   : > { %5776 = shalt.err (!%p5773_p12)
}
 0x9b4   : > { %s5874_s26 = smov 128   ;;  %s5875_s14 = smov 8  }
 0x9b5   : > { %5181 = dma.vmem_to_hbm [thread:$0]  (%p177_p2), %s4046_s21, 512, %s7329_s7, [#allocation7], %s5874_s26, %s5874_s26, %s5875_s14  }
 0x9b6   : > { %s7335_s22 = sand.u32 1, %s5861_s28   ;;  %s5777_s24 = scalar_lea.vmem %s7220_s25, 512 }
 0x9b7   : > { %s7248_s18 = scalar_lea.sflag [#allocation5], %s7335_s22  ;;  %p5778_p13 = scmp.ne.s32.totalorder %s7220_s25, %s5777_s24 }
 0x9b8   : > { %s5876_s12 = smov [#allocation4]  }
 0x9b9   : > { %p5779_p0 = pnand %p5778_p13, %p5962_p5  ;;  %s5781_s23 = sshll.u32 %s5876_s12, 4  ;;  %s5782_s23 = int_to_ptr.vmem [resolvable:$false] %s5781_s23 }
 0x9ba   : > { %s5783_s17 = scalar_lea.vmem %s5782_s23, 1024  ;;  %p5784_p3 = scmp.lt.s32.totalorder %s7220_s25, %s5782_s23 }
 0x9bb   : > { %p5780_p1 = pneg %p5779_p0  ;;  %p5785_p4 = scmp.lt.s32.totalorder %s5783_s17, %s5777_s24 }
 0x9bd   : > { %p5786_p7 = por %p5785_p4, %p5784_p3 }
 0x9bf   : > { %p5787_p8 = pnand %p5786_p7, %p5780_p1 }
 0x9c1   : > { %5790 = shalt.err (!%p5787_p8)
}
 0x9c2   : > { %s5791_s21 = scalar_lea.hbm %s7218_s13, 512  ;;  %s5795_s22 = scalar_lea.hbm %s7328_s6, 1024 }
 0x9c3   : > { %p5792_p9 = scmp.ne.s32.totalorder %s7218_s13, %s5791_s21  ;;  %p5796_p12 = scmp.lt.u32.totalorder %s7218_s13, %s7328_s6 }
 0x9c4   : > { %p5797_p13 = scmp.lt.u32.totalorder %s5795_s22, %s5791_s21  ;;  %p5799_p1 = scmp.lt.u32.totalorder %s5791_s21, %s7218_s13 }
 0x9c5   : > { %p5793_p10 = pnand %p5792_p9, %p5962_p5 }
 0x9c6   : > { %p5798_p0 = por %p5797_p13, %p5796_p12 }
 0x9c7   : > { %p5794_p11 = pneg %p5793_p10 }
 0x9c8   : > { %p5800_p3 = por %p5799_p1, %p5798_p0 }
 0x9ca   : > { %p5801_p4 = pnand %p5800_p3, %p5794_p11 }
 0x9cc   : > { %5804 = shalt.err (!%p5801_p4)
}
 0x9cd   : > { %5179 = dma.vmem_to_hbm [thread:$0]  (%p5962_p5), %s7220_s25, 512, %s7218_s13, %s7248_s18, %s5874_s26, %s5874_s26, %s5875_s14  }
 0x9ce   : > { %s5805_s24 = scalar_lea.vmem %s7223_s10, 512  ;;  %p5812_p10 = scmp.lt.s32.totalorder %s7223_s10, %s7223_s10 }
 0x9cf   : > { %p5806_p7 = scmp.ne.s32.totalorder %s7223_s10, %s5805_s24  ;;  %p5813_p11 = scmp.lt.s32.totalorder %s5805_s24, %s5805_s24 }
 0x9d1   : > { %p5807_p8 = pnand %p5806_p7, %p177_p2  ;;  %p5814_p12 = por %p5813_p11, %p5812_p10 }
 0x9d3   : > { %p5808_p9 = pneg %p5807_p8 }
 0x9d5   : > { %p5815_p13 = pnand %p5814_p12, %p5808_p9 }
 0x9d7   : > { %5818 = shalt.err (!%p5815_p13)
}
 0x9d8   : > { %s5819_s21 = scalar_lea.hbm %s7330_s8, 512 }
 0x9d9   : > { %p5820_p5 = scmp.ne.s32.totalorder %s7330_s8, %s5819_s21  ;;  %p5825_p3 = scmp.lt.u32.totalorder %s5819_s21, %s7330_s8 }
 0x9db   : > { %p5821_p0 = pnand %p5820_p5, %p177_p2 }
 0x9dd   : > { %p5822_p1 = pneg %p5821_p0 }
 0x9df   : > { %p5827_p4 = pnand %p5825_p3, %p5822_p1 }
 0x9e1   : > { %5830 = shalt.err (!%p5827_p4)
}
 0x9e2   : > { %5183 = dma.vmem_to_hbm [thread:$0]  (%p177_p2), %s7223_s10, 512, %s7330_s8, [#allocation7], %s5874_s26, %s5874_s26, %s5875_s14  }
 0x9e3   : > { %5848 = dma.done.wait (%p177_p2), [#allocation7], 1024  }
 0x9e4   : > { %5850 = vsyncadd (%p177_p2), [#allocation7], 4294966272 }
 0x9e5 PF: > { %p5197_p7 = scmp.ge.s32.totalorder %s5869_s30, 2  ;;  %s4081_s12 = sand.u32 1, %s5857_s27  }
 0x9e6   : > { %s4082_s23 = scalar_lea.sflag [#allocation5], %s4081_s12 }
 0x9e7   : > { %p5190_p8 = pnand %p5197_p7, %p5966_p6 }
 0x9e9   : > { %5852 = dma.done.wait (!%p5190_p8), %s4082_s23, 512  }
 0x9ea   : > { %5854 = vsyncadd (!%p5190_p8), %s4082_s23, 4294966784  ;;  %s7336_s10 = sld [smem:[#allocation11_spill]]  ;;  %p20_p9 = scmp.ge.s32.totalorder %s5947_s11, 4  }
 0x9eb   : > { %s7337_s27 = smov %s5861_s28  ;;  %s7338_s28 = smov %s5865_s29 }
 0x9ec   : > { %s7340_s30 = smov %s5947_s11  ;;  %22 = sbr.rel (!%p20_p9) target bundleno = 4 (0x4), region = 118 }
 0x9f0   : > { %s7339_s29 = smov %s7336_s10 }
 0x9f3   :  { %4087 = vsyncpa [#allocation5], 1 }
 0x9f4   :  { %4089 = vsyncpa [#allocation5 + $0x1], 1 }
 0x9f5   :  { %4090 = vsyncpa [#allocation7], 1 }

</bundles_post_ra>
